<compile_context>
chip_gen: v7x
topology: tpu7x:2x2x1
jax: 0.10.0
libtpu: 0.0.40
codegen_flags: <defaults>
</compile_context>

<pallas_src>
import jax
import jax.numpy as jnp
from jax import lax
from jax.experimental import pallas as pl
from jax.experimental.pallas import tpu as pltpu


def _make_denoiser_kernel(B, C, H, W):

    def kernel(w1_ref, b1_ref, w2_ref, b2_ref, x_ref, o_ref):
        # w1_ref: (C*9,) SMEM   conv1 weights, w1[c, 0, di, dj] at c*9 + di*3 + dj
        # b1_ref: (C,)   SMEM   conv1 bias
        # w2_ref: (C*9,) SMEM   conv2 weights, w2[0, c, di, dj] at c*9 + di*3 + dj
        # b2_ref: (1,)   SMEM   conv2 bias
        # x_ref : (B, H, W) VMEM   unpadded input images for this grid step
        # o_ref : (B, H, W) VMEM   output images
        x = x_ref[...]

        # Edge masks (built once, hoisted): a tap shifted by +-1 must read zero
        # where it falls outside the image (== the conv's zero padding).
        row_idx = lax.broadcasted_iota(jnp.int32, (B, H, W), 1)
        col_idx = lax.broadcasted_iota(jnp.int32, (B, H, W), 2)
        mask_h = {1: row_idx == H - 1, -1: row_idx == 0}
        mask_w = {1: col_idx == W - 1, -1: col_idx == 0}
        zero = jnp.zeros((B, H, W), jnp.float32)
        taps = (-1, 0, 1)

        def shift_h(v, dh):
            # s[b, i, j] = v[b, i + dh, j], zero outside. Sublane rotate (XLU).
            if dh == 0:
                return v
            r = pltpu.roll(v, shift=(-dh) % H, axis=1)
            return jnp.where(mask_h[dh], zero, r)

        def shift_w(v, dw):
            # s[b, i, j] = v[b, i, j + dw], zero outside. Lane rotate (XLU).
            if dw == 0:
                return v
            r = pltpu.roll(v, shift=(-dw) % W, axis=2)
            return jnp.where(mask_w[dw], zero, r)

        # Hoisted: the 9 shifted input taps, reused by every hidden channel.
        xh = {dh: shift_h(x, dh) for dh in taps}
        xs = {(dh, dw): shift_w(xh[dh], dw) for dh in taps for dw in taps}

        # Fused conv1 -> ReLU -> conv2: one hidden channel at a time, entirely
        # in registers (no hidden-activation VMEM round trip).
        out = jnp.full((B, H, W), b2_ref[0], dtype=jnp.float32)
        for c in range(C):
            acc = jnp.full((B, H, W), b1_ref[c], dtype=jnp.float32)
            for dh in taps:
                for dw in taps:
                    w = w1_ref[c * 9 + (dh + 1) * 3 + (dw + 1)]
                    acc = acc + w * xs[(dh, dw)]
            hid = jnp.maximum(acc, 0.0)
            hh = {dh: shift_h(hid, dh) for dh in taps}
            for dh in taps:
                for dw in taps:
                    w = w2_ref[c * 9 + (dh + 1) * 3 + (dw + 1)]
                    out = out + w * shift_w(hh[dh], dw)

        o_ref[...] = out

    return kernel


def fast_denoiser(x, w1, b1, w2, b2, *, max_images_per_step=8):
    """x: (N,1,H,W); w1: (C,1,3,3); b1: (C,); w2: (1,C,3,3); b2: (1,) -> (N,1,H,W)."""
    N, Cin, H, W = x.shape
    assert Cin == 1
    C = w1.shape[0]

    # Images per grid step: largest divisor of N up to the cap (bigger DMA
    # blocks, fewer grid steps).
    B = 1
    for cand in range(min(N, max_images_per_step), 0, -1):
        if N % cand == 0:
            B = cand
            break

    x2 = x[:, 0].astype(jnp.float32)              # (N, H, W): no wrapper pad
    w1f = w1.reshape(C * 9).astype(jnp.float32)   # flat 1-D SMEM weights
    w2f = w2.reshape(C * 9).astype(jnp.float32)
    b1f = b1.astype(jnp.float32)
    b2f = b2.reshape(1).astype(jnp.float32)

    smem = pl.BlockSpec(memory_space=pltpu.MemorySpace.SMEM)
    out = pl.pallas_call(
        _make_denoiser_kernel(B, C, H, W),
        out_shape=jax.ShapeDtypeStruct((N, H, W), jnp.float32),
        grid=(N // B,),
        in_specs=[smem, smem, smem, smem,
                  pl.BlockSpec((B, H, W), lambda g: (g, 0, 0))],
        out_specs=pl.BlockSpec((B, H, W), lambda g: (g, 0, 0)),
        compiler_params=pltpu.CompilerParams(
            dimension_semantics=("parallel",)),
    )(w1f, b1f, w2f, b2f, x2)

    return out[:, None, :, :]  # back to NCHW


def _ref_forward(x, w1, b1, w2, b2):
    dn = ("NCHW", "OIHW", "NCHW")
    h = lax.conv_general_dilated(x, w1, (1, 1), "SAME", dimension_numbers=dn)
    h = jnp.maximum(h + b1[None, :, None, None], 0.0)
    o = lax.conv_general_dilated(h, w2, (1, 1), "SAME", dimension_numbers=dn)
    return o + b2[None, :, None, None]


if __name__ == "__main__":
    N, C, H, W = 2, 4, 16, 16
    key = jax.random.PRNGKey(0)
    kx, k1, kb1, k2, kb2 = jax.random.split(key, 5)

    x = jax.random.normal(kx, (N, 1, H, W), dtype=jnp.float32)
    # Deterministic synthetic parameters (shapes match nn.Conv2d in __init__).
    w1 = jax.random.normal(k1, (C, 1, 3, 3), dtype=jnp.float32) * 0.3
    b1 = jax.random.normal(kb1, (C,), dtype=jnp.float32) * 0.1
    w2 = jax.random.normal(k2, (1, C, 3, 3), dtype=jnp.float32) * 0.3
    b2 = jax.random.normal(kb2, (1,), dtype=jnp.float32) * 0.1

    y = jax.block_until_ready(fast_denoiser(x, w1, b1, w2, b2))
    y_ref = _ref_forward(x, w1, b1, w2, b2)

    assert y.shape == (N, 1, H, W)
    err = float(jnp.max(jnp.abs(y - y_ref)))
    assert jnp.allclose(y, y_ref, atol=1e-4, rtol=1e-4), err

    print("KERNEL_OK")
</pallas_src>

<mosaic_0001>
module attributes {stable_mosaic.version = 11 : i64} {
  func.func @kernel(%arg0: i32, %arg1: memref<36xf32, #tpu.memory_space<smem>>, %arg2: memref<4xf32, #tpu.memory_space<smem>>, %arg3: memref<36xf32, #tpu.memory_space<smem>>, %arg4: memref<1xf32, #tpu.memory_space<smem>>, %arg5: memref<2x16x16xf32, #tpu.memory_space<vmem>>, %arg6: memref<2x16x16xf32, #tpu.memory_space<vmem>>) attributes {dimension_semantics = [#tpu.dimension_semantics<parallel>], iteration_bounds = array<i64: 1>, scalar_prefetch = 0 : i64, scratch_operands = 0 : i64, tpu.core_type = #tpu.core_type<tc>, window_params = [{transform_indices = @transform_0, window_bounds = array<i64: 36>}, {transform_indices = @transform_1, window_bounds = array<i64: 4>}, {transform_indices = @transform_2, window_bounds = array<i64: 36>}, {transform_indices = @transform_3, window_bounds = array<i64: 1>}, {transform_indices = @transform_4, window_bounds = array<i64: 2, 16, 16>}, {transform_indices = @transform_5, window_bounds = array<i64: 2, 16, 16>}]} {
    %c0 = arith.constant 0 : index
    %c0_0 = arith.constant 0 : index
    %c0_1 = arith.constant 0 : index
    %0 = vector.load %arg5[%c0, %c0_0, %c0_1] : memref<2x16x16xf32, #tpu.memory_space<vmem>>, vector<2x16x16xf32>
    %1 = tpu.iota {dimensions = array<i32: 1>} : vector<2x16x16xi32>
    %2 = tpu.iota {dimensions = array<i32: 2>} : vector<2x16x16xi32>
    %c15_i32 = arith.constant 15 : i32
    %3 = vector.broadcast %c15_i32 : i32 to vector<2x16x16xi32>
    %4 = arith.cmpi eq, %1, %3 : vector<2x16x16xi32>
    %c0_i32 = arith.constant 0 : i32
    %5 = vector.broadcast %c0_i32 : i32 to vector<2x16x16xi32>
    %6 = arith.cmpi eq, %1, %5 : vector<2x16x16xi32>
    %c15_i32_2 = arith.constant 15 : i32
    %7 = vector.broadcast %c15_i32_2 : i32 to vector<2x16x16xi32>
    %8 = arith.cmpi eq, %2, %7 : vector<2x16x16xi32>
    %c0_i32_3 = arith.constant 0 : i32
    %9 = vector.broadcast %c0_i32_3 : i32 to vector<2x16x16xi32>
    %10 = arith.cmpi eq, %2, %9 : vector<2x16x16xi32>
    %cst = arith.constant 0.000000e+00 : f32
    %11 = vector.broadcast %cst : f32 to vector<2x16x16xf32>
    %c1_i32 = arith.constant 1 : i32
    %12 = tpu.dynamic_rotate %0 by %c1_i32 dim 1 : vector<2x16x16xf32>, i32 -> vector<2x16x16xf32>
    %13 = arith.select %6, %11, %12 : vector<2x16x16xi1>, vector<2x16x16xf32>
    %c15_i32_4 = arith.constant 15 : i32
    %14 = tpu.dynamic_rotate %0 by %c15_i32_4 dim 1 : vector<2x16x16xf32>, i32 -> vector<2x16x16xf32>
    %15 = arith.select %4, %11, %14 : vector<2x16x16xi1>, vector<2x16x16xf32>
    %c1_i32_5 = arith.constant 1 : i32
    %16 = tpu.dynamic_rotate %13 by %c1_i32_5 dim 2 : vector<2x16x16xf32>, i32 -> vector<2x16x16xf32>
    %17 = arith.select %10, %11, %16 : vector<2x16x16xi1>, vector<2x16x16xf32>
    %c15_i32_6 = arith.constant 15 : i32
    %18 = tpu.dynamic_rotate %13 by %c15_i32_6 dim 2 : vector<2x16x16xf32>, i32 -> vector<2x16x16xf32>
    %19 = arith.select %8, %11, %18 : vector<2x16x16xi1>, vector<2x16x16xf32>
    %c1_i32_7 = arith.constant 1 : i32
    %20 = tpu.dynamic_rotate %0 by %c1_i32_7 dim 2 : vector<2x16x16xf32>, i32 -> vector<2x16x16xf32>
    %21 = arith.select %10, %11, %20 : vector<2x16x16xi1>, vector<2x16x16xf32>
    %c15_i32_8 = arith.constant 15 : i32
    %22 = tpu.dynamic_rotate %0 by %c15_i32_8 dim 2 : vector<2x16x16xf32>, i32 -> vector<2x16x16xf32>
    %23 = arith.select %8, %11, %22 : vector<2x16x16xi1>, vector<2x16x16xf32>
    %c1_i32_9 = arith.constant 1 : i32
    %24 = tpu.dynamic_rotate %15 by %c1_i32_9 dim 2 : vector<2x16x16xf32>, i32 -> vector<2x16x16xf32>
    %25 = arith.select %10, %11, %24 : vector<2x16x16xi1>, vector<2x16x16xf32>
    %c15_i32_10 = arith.constant 15 : i32
    %26 = tpu.dynamic_rotate %15 by %c15_i32_10 dim 2 : vector<2x16x16xf32>, i32 -> vector<2x16x16xf32>
    %27 = arith.select %8, %11, %26 : vector<2x16x16xi1>, vector<2x16x16xf32>
    %c0_11 = arith.constant 0 : index
    %28 = memref.load %arg4[%c0_11] : memref<1xf32, #tpu.memory_space<smem>>
    %29 = vector.broadcast %28 : f32 to vector<2x16x16xf32>
    %c0_12 = arith.constant 0 : index
    %30 = memref.load %arg2[%c0_12] : memref<4xf32, #tpu.memory_space<smem>>
    %31 = vector.broadcast %30 : f32 to vector<2x16x16xf32>
    %c0_13 = arith.constant 0 : index
    %32 = memref.load %arg1[%c0_13] : memref<36xf32, #tpu.memory_space<smem>>
    %33 = vector.broadcast %32 : f32 to vector<2x16x16xf32>
    %34 = arith.mulf %33, %17 : vector<2x16x16xf32>
    %35 = arith.addf %31, %34 : vector<2x16x16xf32>
    %c1 = arith.constant 1 : index
    %36 = memref.load %arg1[%c1] : memref<36xf32, #tpu.memory_space<smem>>
    %37 = vector.broadcast %36 : f32 to vector<2x16x16xf32>
    %38 = arith.mulf %37, %13 : vector<2x16x16xf32>
    %39 = arith.addf %35, %38 : vector<2x16x16xf32>
    %c2 = arith.constant 2 : index
    %40 = memref.load %arg1[%c2] : memref<36xf32, #tpu.memory_space<smem>>
    %41 = vector.broadcast %40 : f32 to vector<2x16x16xf32>
    %42 = arith.mulf %41, %19 : vector<2x16x16xf32>
    %43 = arith.addf %39, %42 : vector<2x16x16xf32>
    %c3 = arith.constant 3 : index
    %44 = memref.load %arg1[%c3] : memref<36xf32, #tpu.memory_space<smem>>
    %45 = vector.broadcast %44 : f32 to vector<2x16x16xf32>
    %46 = arith.mulf %45, %21 : vector<2x16x16xf32>
    %47 = arith.addf %43, %46 : vector<2x16x16xf32>
    %c4 = arith.constant 4 : index
    %48 = memref.load %arg1[%c4] : memref<36xf32, #tpu.memory_space<smem>>
    %49 = vector.broadcast %48 : f32 to vector<2x16x16xf32>
    %50 = arith.mulf %49, %0 : vector<2x16x16xf32>
    %51 = arith.addf %47, %50 : vector<2x16x16xf32>
    %c5 = arith.constant 5 : index
    %52 = memref.load %arg1[%c5] : memref<36xf32, #tpu.memory_space<smem>>
    %53 = vector.broadcast %52 : f32 to vector<2x16x16xf32>
    %54 = arith.mulf %53, %23 : vector<2x16x16xf32>
    %55 = arith.addf %51, %54 : vector<2x16x16xf32>
    %c6 = arith.constant 6 : index
    %56 = memref.load %arg1[%c6] : memref<36xf32, #tpu.memory_space<smem>>
    %57 = vector.broadcast %56 : f32 to vector<2x16x16xf32>
    %58 = arith.mulf %57, %25 : vector<2x16x16xf32>
    %59 = arith.addf %55, %58 : vector<2x16x16xf32>
    %c7 = arith.constant 7 : index
    %60 = memref.load %arg1[%c7] : memref<36xf32, #tpu.memory_space<smem>>
    %61 = vector.broadcast %60 : f32 to vector<2x16x16xf32>
    %62 = arith.mulf %61, %15 : vector<2x16x16xf32>
    %63 = arith.addf %59, %62 : vector<2x16x16xf32>
    %c8 = arith.constant 8 : index
    %64 = memref.load %arg1[%c8] : memref<36xf32, #tpu.memory_space<smem>>
    %65 = vector.broadcast %64 : f32 to vector<2x16x16xf32>
    %66 = arith.mulf %65, %27 : vector<2x16x16xf32>
    %67 = arith.addf %63, %66 : vector<2x16x16xf32>
    %cst_14 = arith.constant 0.000000e+00 : f32
    %68 = vector.broadcast %cst_14 : f32 to vector<2x16x16xf32>
    %69 = arith.maximumf %67, %68 : vector<2x16x16xf32>
    %c1_i32_15 = arith.constant 1 : i32
    %70 = tpu.dynamic_rotate %69 by %c1_i32_15 dim 1 : vector<2x16x16xf32>, i32 -> vector<2x16x16xf32>
    %71 = arith.select %6, %11, %70 : vector<2x16x16xi1>, vector<2x16x16xf32>
    %c15_i32_16 = arith.constant 15 : i32
    %72 = tpu.dynamic_rotate %69 by %c15_i32_16 dim 1 : vector<2x16x16xf32>, i32 -> vector<2x16x16xf32>
    %73 = arith.select %4, %11, %72 : vector<2x16x16xi1>, vector<2x16x16xf32>
    %c0_17 = arith.constant 0 : index
    %74 = memref.load %arg3[%c0_17] : memref<36xf32, #tpu.memory_space<smem>>
    %c1_i32_18 = arith.constant 1 : i32
    %75 = tpu.dynamic_rotate %71 by %c1_i32_18 dim 2 : vector<2x16x16xf32>, i32 -> vector<2x16x16xf32>
    %76 = arith.select %10, %11, %75 : vector<2x16x16xi1>, vector<2x16x16xf32>
    %77 = vector.broadcast %74 : f32 to vector<2x16x16xf32>
    %78 = arith.mulf %77, %76 : vector<2x16x16xf32>
    %79 = arith.addf %29, %78 : vector<2x16x16xf32>
    %c1_19 = arith.constant 1 : index
    %80 = memref.load %arg3[%c1_19] : memref<36xf32, #tpu.memory_space<smem>>
    %81 = vector.broadcast %80 : f32 to vector<2x16x16xf32>
    %82 = arith.mulf %81, %71 : vector<2x16x16xf32>
    %83 = arith.addf %79, %82 : vector<2x16x16xf32>
    %c2_20 = arith.constant 2 : index
    %84 = memref.load %arg3[%c2_20] : memref<36xf32, #tpu.memory_space<smem>>
    %c15_i32_21 = arith.constant 15 : i32
    %85 = tpu.dynamic_rotate %71 by %c15_i32_21 dim 2 : vector<2x16x16xf32>, i32 -> vector<2x16x16xf32>
    %86 = arith.select %8, %11, %85 : vector<2x16x16xi1>, vector<2x16x16xf32>
    %87 = vector.broadcast %84 : f32 to vector<2x16x16xf32>
    %88 = arith.mulf %87, %86 : vector<2x16x16xf32>
    %89 = arith.addf %83, %88 : vector<2x16x16xf32>
    %c3_22 = arith.constant 3 : index
    %90 = memref.load %arg3[%c3_22] : memref<36xf32, #tpu.memory_space<smem>>
    %c1_i32_23 = arith.constant 1 : i32
    %91 = tpu.dynamic_rotate %69 by %c1_i32_23 dim 2 : vector<2x16x16xf32>, i32 -> vector<2x16x16xf32>
    %92 = arith.select %10, %11, %91 : vector<2x16x16xi1>, vector<2x16x16xf32>
    %93 = vector.broadcast %90 : f32 to vector<2x16x16xf32>
    %94 = arith.mulf %93, %92 : vector<2x16x16xf32>
    %95 = arith.addf %89, %94 : vector<2x16x16xf32>
    %c4_24 = arith.constant 4 : index
    %96 = memref.load %arg3[%c4_24] : memref<36xf32, #tpu.memory_space<smem>>
    %97 = vector.broadcast %96 : f32 to vector<2x16x16xf32>
    %98 = arith.mulf %97, %69 : vector<2x16x16xf32>
    %99 = arith.addf %95, %98 : vector<2x16x16xf32>
    %c5_25 = arith.constant 5 : index
    %100 = memref.load %arg3[%c5_25] : memref<36xf32, #tpu.memory_space<smem>>
    %c15_i32_26 = arith.constant 15 : i32
    %101 = tpu.dynamic_rotate %69 by %c15_i32_26 dim 2 : vector<2x16x16xf32>, i32 -> vector<2x16x16xf32>
    %102 = arith.select %8, %11, %101 : vector<2x16x16xi1>, vector<2x16x16xf32>
    %103 = vector.broadcast %100 : f32 to vector<2x16x16xf32>
    %104 = arith.mulf %103, %102 : vector<2x16x16xf32>
    %105 = arith.addf %99, %104 : vector<2x16x16xf32>
    %c6_27 = arith.constant 6 : index
    %106 = memref.load %arg3[%c6_27] : memref<36xf32, #tpu.memory_space<smem>>
    %c1_i32_28 = arith.constant 1 : i32
    %107 = tpu.dynamic_rotate %73 by %c1_i32_28 dim 2 : vector<2x16x16xf32>, i32 -> vector<2x16x16xf32>
    %108 = arith.select %10, %11, %107 : vector<2x16x16xi1>, vector<2x16x16xf32>
    %109 = vector.broadcast %106 : f32 to vector<2x16x16xf32>
    %110 = arith.mulf %109, %108 : vector<2x16x16xf32>
    %111 = arith.addf %105, %110 : vector<2x16x16xf32>
    %c7_29 = arith.constant 7 : index
    %112 = memref.load %arg3[%c7_29] : memref<36xf32, #tpu.memory_space<smem>>
    %113 = vector.broadcast %112 : f32 to vector<2x16x16xf32>
    %114 = arith.mulf %113, %73 : vector<2x16x16xf32>
    %115 = arith.addf %111, %114 : vector<2x16x16xf32>
    %c8_30 = arith.constant 8 : index
    %116 = memref.load %arg3[%c8_30] : memref<36xf32, #tpu.memory_space<smem>>
    %c15_i32_31 = arith.constant 15 : i32
    %117 = tpu.dynamic_rotate %73 by %c15_i32_31 dim 2 : vector<2x16x16xf32>, i32 -> vector<2x16x16xf32>
    %118 = arith.select %8, %11, %117 : vector<2x16x16xi1>, vector<2x16x16xf32>
    %119 = vector.broadcast %116 : f32 to vector<2x16x16xf32>
    %120 = arith.mulf %119, %118 : vector<2x16x16xf32>
    %121 = arith.addf %115, %120 : vector<2x16x16xf32>
    %c1_32 = arith.constant 1 : index
    %122 = memref.load %arg2[%c1_32] : memref<4xf32, #tpu.memory_space<smem>>
    %123 = vector.broadcast %122 : f32 to vector<2x16x16xf32>
    %c9 = arith.constant 9 : index
    %124 = memref.load %arg1[%c9] : memref<36xf32, #tpu.memory_space<smem>>
    %125 = vector.broadcast %124 : f32 to vector<2x16x16xf32>
    %126 = arith.mulf %125, %17 : vector<2x16x16xf32>
    %127 = arith.addf %123, %126 : vector<2x16x16xf32>
    %c10 = arith.constant 10 : index
    %128 = memref.load %arg1[%c10] : memref<36xf32, #tpu.memory_space<smem>>
    %129 = vector.broadcast %128 : f32 to vector<2x16x16xf32>
    %130 = arith.mulf %129, %13 : vector<2x16x16xf32>
    %131 = arith.addf %127, %130 : vector<2x16x16xf32>
    %c11 = arith.constant 11 : index
    %132 = memref.load %arg1[%c11] : memref<36xf32, #tpu.memory_space<smem>>
    %133 = vector.broadcast %132 : f32 to vector<2x16x16xf32>
    %134 = arith.mulf %133, %19 : vector<2x16x16xf32>
    %135 = arith.addf %131, %134 : vector<2x16x16xf32>
    %c12 = arith.constant 12 : index
    %136 = memref.load %arg1[%c12] : memref<36xf32, #tpu.memory_space<smem>>
    %137 = vector.broadcast %136 : f32 to vector<2x16x16xf32>
    %138 = arith.mulf %137, %21 : vector<2x16x16xf32>
    %139 = arith.addf %135, %138 : vector<2x16x16xf32>
    %c13 = arith.constant 13 : index
    %140 = memref.load %arg1[%c13] : memref<36xf32, #tpu.memory_space<smem>>
    %141 = vector.broadcast %140 : f32 to vector<2x16x16xf32>
    %142 = arith.mulf %141, %0 : vector<2x16x16xf32>
    %143 = arith.addf %139, %142 : vector<2x16x16xf32>
    %c14 = arith.constant 14 : index
    %144 = memref.load %arg1[%c14] : memref<36xf32, #tpu.memory_space<smem>>
    %145 = vector.broadcast %144 : f32 to vector<2x16x16xf32>
    %146 = arith.mulf %145, %23 : vector<2x16x16xf32>
    %147 = arith.addf %143, %146 : vector<2x16x16xf32>
    %c15 = arith.constant 15 : index
    %148 = memref.load %arg1[%c15] : memref<36xf32, #tpu.memory_space<smem>>
    %149 = vector.broadcast %148 : f32 to vector<2x16x16xf32>
    %150 = arith.mulf %149, %25 : vector<2x16x16xf32>
    %151 = arith.addf %147, %150 : vector<2x16x16xf32>
    %c16 = arith.constant 16 : index
    %152 = memref.load %arg1[%c16] : memref<36xf32, #tpu.memory_space<smem>>
    %153 = vector.broadcast %152 : f32 to vector<2x16x16xf32>
    %154 = arith.mulf %153, %15 : vector<2x16x16xf32>
    %155 = arith.addf %151, %154 : vector<2x16x16xf32>
    %c17 = arith.constant 17 : index
    %156 = memref.load %arg1[%c17] : memref<36xf32, #tpu.memory_space<smem>>
    %157 = vector.broadcast %156 : f32 to vector<2x16x16xf32>
    %158 = arith.mulf %157, %27 : vector<2x16x16xf32>
    %159 = arith.addf %155, %158 : vector<2x16x16xf32>
    %cst_33 = arith.constant 0.000000e+00 : f32
    %160 = vector.broadcast %cst_33 : f32 to vector<2x16x16xf32>
    %161 = arith.maximumf %159, %160 : vector<2x16x16xf32>
    %c1_i32_34 = arith.constant 1 : i32
    %162 = tpu.dynamic_rotate %161 by %c1_i32_34 dim 1 : vector<2x16x16xf32>, i32 -> vector<2x16x16xf32>
    %163 = arith.select %6, %11, %162 : vector<2x16x16xi1>, vector<2x16x16xf32>
    %c15_i32_35 = arith.constant 15 : i32
    %164 = tpu.dynamic_rotate %161 by %c15_i32_35 dim 1 : vector<2x16x16xf32>, i32 -> vector<2x16x16xf32>
    %165 = arith.select %4, %11, %164 : vector<2x16x16xi1>, vector<2x16x16xf32>
    %c9_36 = arith.constant 9 : index
    %166 = memref.load %arg3[%c9_36] : memref<36xf32, #tpu.memory_space<smem>>
    %c1_i32_37 = arith.constant 1 : i32
    %167 = tpu.dynamic_rotate %163 by %c1_i32_37 dim 2 : vector<2x16x16xf32>, i32 -> vector<2x16x16xf32>
    %168 = arith.select %10, %11, %167 : vector<2x16x16xi1>, vector<2x16x16xf32>
    %169 = vector.broadcast %166 : f32 to vector<2x16x16xf32>
    %170 = arith.mulf %169, %168 : vector<2x16x16xf32>
    %171 = arith.addf %121, %170 : vector<2x16x16xf32>
    %c10_38 = arith.constant 10 : index
    %172 = memref.load %arg3[%c10_38] : memref<36xf32, #tpu.memory_space<smem>>
    %173 = vector.broadcast %172 : f32 to vector<2x16x16xf32>
    %174 = arith.mulf %173, %163 : vector<2x16x16xf32>
    %175 = arith.addf %171, %174 : vector<2x16x16xf32>
    %c11_39 = arith.constant 11 : index
    %176 = memref.load %arg3[%c11_39] : memref<36xf32, #tpu.memory_space<smem>>
    %c15_i32_40 = arith.constant 15 : i32
    %177 = tpu.dynamic_rotate %163 by %c15_i32_40 dim 2 : vector<2x16x16xf32>, i32 -> vector<2x16x16xf32>
    %178 = arith.select %8, %11, %177 : vector<2x16x16xi1>, vector<2x16x16xf32>
    %179 = vector.broadcast %176 : f32 to vector<2x16x16xf32>
    %180 = arith.mulf %179, %178 : vector<2x16x16xf32>
    %181 = arith.addf %175, %180 : vector<2x16x16xf32>
    %c12_41 = arith.constant 12 : index
    %182 = memref.load %arg3[%c12_41] : memref<36xf32, #tpu.memory_space<smem>>
    %c1_i32_42 = arith.constant 1 : i32
    %183 = tpu.dynamic_rotate %161 by %c1_i32_42 dim 2 : vector<2x16x16xf32>, i32 -> vector<2x16x16xf32>
    %184 = arith.select %10, %11, %183 : vector<2x16x16xi1>, vector<2x16x16xf32>
    %185 = vector.broadcast %182 : f32 to vector<2x16x16xf32>
    %186 = arith.mulf %185, %184 : vector<2x16x16xf32>
    %187 = arith.addf %181, %186 : vector<2x16x16xf32>
    %c13_43 = arith.constant 13 : index
    %188 = memref.load %arg3[%c13_43] : memref<36xf32, #tpu.memory_space<smem>>
    %189 = vector.broadcast %188 : f32 to vector<2x16x16xf32>
    %190 = arith.mulf %189, %161 : vector<2x16x16xf32>
    %191 = arith.addf %187, %190 : vector<2x16x16xf32>
    %c14_44 = arith.constant 14 : index
    %192 = memref.load %arg3[%c14_44] : memref<36xf32, #tpu.memory_space<smem>>
    %c15_i32_45 = arith.constant 15 : i32
    %193 = tpu.dynamic_rotate %161 by %c15_i32_45 dim 2 : vector<2x16x16xf32>, i32 -> vector<2x16x16xf32>
    %194 = arith.select %8, %11, %193 : vector<2x16x16xi1>, vector<2x16x16xf32>
    %195 = vector.broadcast %192 : f32 to vector<2x16x16xf32>
    %196 = arith.mulf %195, %194 : vector<2x16x16xf32>
    %197 = arith.addf %191, %196 : vector<2x16x16xf32>
    %c15_46 = arith.constant 15 : index
    %198 = memref.load %arg3[%c15_46] : memref<36xf32, #tpu.memory_space<smem>>
    %c1_i32_47 = arith.constant 1 : i32
    %199 = tpu.dynamic_rotate %165 by %c1_i32_47 dim 2 : vector<2x16x16xf32>, i32 -> vector<2x16x16xf32>
    %200 = arith.select %10, %11, %199 : vector<2x16x16xi1>, vector<2x16x16xf32>
    %201 = vector.broadcast %198 : f32 to vector<2x16x16xf32>
    %202 = arith.mulf %201, %200 : vector<2x16x16xf32>
    %203 = arith.addf %197, %202 : vector<2x16x16xf32>
    %c16_48 = arith.constant 16 : index
    %204 = memref.load %arg3[%c16_48] : memref<36xf32, #tpu.memory_space<smem>>
    %205 = vector.broadcast %204 : f32 to vector<2x16x16xf32>
    %206 = arith.mulf %205, %165 : vector<2x16x16xf32>
    %207 = arith.addf %203, %206 : vector<2x16x16xf32>
    %c17_49 = arith.constant 17 : index
    %208 = memref.load %arg3[%c17_49] : memref<36xf32, #tpu.memory_space<smem>>
    %c15_i32_50 = arith.constant 15 : i32
    %209 = tpu.dynamic_rotate %165 by %c15_i32_50 dim 2 : vector<2x16x16xf32>, i32 -> vector<2x16x16xf32>
    %210 = arith.select %8, %11, %209 : vector<2x16x16xi1>, vector<2x16x16xf32>
    %211 = vector.broadcast %208 : f32 to vector<2x16x16xf32>
    %212 = arith.mulf %211, %210 : vector<2x16x16xf32>
    %213 = arith.addf %207, %212 : vector<2x16x16xf32>
    %c2_51 = arith.constant 2 : index
    %214 = memref.load %arg2[%c2_51] : memref<4xf32, #tpu.memory_space<smem>>
    %215 = vector.broadcast %214 : f32 to vector<2x16x16xf32>
    %c18 = arith.constant 18 : index
    %216 = memref.load %arg1[%c18] : memref<36xf32, #tpu.memory_space<smem>>
    %217 = vector.broadcast %216 : f32 to vector<2x16x16xf32>
    %218 = arith.mulf %217, %17 : vector<2x16x16xf32>
    %219 = arith.addf %215, %218 : vector<2x16x16xf32>
    %c19 = arith.constant 19 : index
    %220 = memref.load %arg1[%c19] : memref<36xf32, #tpu.memory_space<smem>>
    %221 = vector.broadcast %220 : f32 to vector<2x16x16xf32>
    %222 = arith.mulf %221, %13 : vector<2x16x16xf32>
    %223 = arith.addf %219, %222 : vector<2x16x16xf32>
    %c20 = arith.constant 20 : index
    %224 = memref.load %arg1[%c20] : memref<36xf32, #tpu.memory_space<smem>>
    %225 = vector.broadcast %224 : f32 to vector<2x16x16xf32>
    %226 = arith.mulf %225, %19 : vector<2x16x16xf32>
    %227 = arith.addf %223, %226 : vector<2x16x16xf32>
    %c21 = arith.constant 21 : index
    %228 = memref.load %arg1[%c21] : memref<36xf32, #tpu.memory_space<smem>>
    %229 = vector.broadcast %228 : f32 to vector<2x16x16xf32>
    %230 = arith.mulf %229, %21 : vector<2x16x16xf32>
    %231 = arith.addf %227, %230 : vector<2x16x16xf32>
    %c22 = arith.constant 22 : index
    %232 = memref.load %arg1[%c22] : memref<36xf32, #tpu.memory_space<smem>>
    %233 = vector.broadcast %232 : f32 to vector<2x16x16xf32>
    %234 = arith.mulf %233, %0 : vector<2x16x16xf32>
    %235 = arith.addf %231, %234 : vector<2x16x16xf32>
    %c23 = arith.constant 23 : index
    %236 = memref.load %arg1[%c23] : memref<36xf32, #tpu.memory_space<smem>>
    %237 = vector.broadcast %236 : f32 to vector<2x16x16xf32>
    %238 = arith.mulf %237, %23 : vector<2x16x16xf32>
    %239 = arith.addf %235, %238 : vector<2x16x16xf32>
    %c24 = arith.constant 24 : index
    %240 = memref.load %arg1[%c24] : memref<36xf32, #tpu.memory_space<smem>>
    %241 = vector.broadcast %240 : f32 to vector<2x16x16xf32>
    %242 = arith.mulf %241, %25 : vector<2x16x16xf32>
    %243 = arith.addf %239, %242 : vector<2x16x16xf32>
    %c25 = arith.constant 25 : index
    %244 = memref.load %arg1[%c25] : memref<36xf32, #tpu.memory_space<smem>>
    %245 = vector.broadcast %244 : f32 to vector<2x16x16xf32>
    %246 = arith.mulf %245, %15 : vector<2x16x16xf32>
    %247 = arith.addf %243, %246 : vector<2x16x16xf32>
    %c26 = arith.constant 26 : index
    %248 = memref.load %arg1[%c26] : memref<36xf32, #tpu.memory_space<smem>>
    %249 = vector.broadcast %248 : f32 to vector<2x16x16xf32>
    %250 = arith.mulf %249, %27 : vector<2x16x16xf32>
    %251 = arith.addf %247, %250 : vector<2x16x16xf32>
    %cst_52 = arith.constant 0.000000e+00 : f32
    %252 = vector.broadcast %cst_52 : f32 to vector<2x16x16xf32>
    %253 = arith.maximumf %251, %252 : vector<2x16x16xf32>
    %c1_i32_53 = arith.constant 1 : i32
    %254 = tpu.dynamic_rotate %253 by %c1_i32_53 dim 1 : vector<2x16x16xf32>, i32 -> vector<2x16x16xf32>
    %255 = arith.select %6, %11, %254 : vector<2x16x16xi1>, vector<2x16x16xf32>
    %c15_i32_54 = arith.constant 15 : i32
    %256 = tpu.dynamic_rotate %253 by %c15_i32_54 dim 1 : vector<2x16x16xf32>, i32 -> vector<2x16x16xf32>
    %257 = arith.select %4, %11, %256 : vector<2x16x16xi1>, vector<2x16x16xf32>
    %c18_55 = arith.constant 18 : index
    %258 = memref.load %arg3[%c18_55] : memref<36xf32, #tpu.memory_space<smem>>
    %c1_i32_56 = arith.constant 1 : i32
    %259 = tpu.dynamic_rotate %255 by %c1_i32_56 dim 2 : vector<2x16x16xf32>, i32 -> vector<2x16x16xf32>
    %260 = arith.select %10, %11, %259 : vector<2x16x16xi1>, vector<2x16x16xf32>
    %261 = vector.broadcast %258 : f32 to vector<2x16x16xf32>
    %262 = arith.mulf %261, %260 : vector<2x16x16xf32>
    %263 = arith.addf %213, %262 : vector<2x16x16xf32>
    %c19_57 = arith.constant 19 : index
    %264 = memref.load %arg3[%c19_57] : memref<36xf32, #tpu.memory_space<smem>>
    %265 = vector.broadcast %264 : f32 to vector<2x16x16xf32>
    %266 = arith.mulf %265, %255 : vector<2x16x16xf32>
    %267 = arith.addf %263, %266 : vector<2x16x16xf32>
    %c20_58 = arith.constant 20 : index
    %268 = memref.load %arg3[%c20_58] : memref<36xf32, #tpu.memory_space<smem>>
    %c15_i32_59 = arith.constant 15 : i32
    %269 = tpu.dynamic_rotate %255 by %c15_i32_59 dim 2 : vector<2x16x16xf32>, i32 -> vector<2x16x16xf32>
    %270 = arith.select %8, %11, %269 : vector<2x16x16xi1>, vector<2x16x16xf32>
    %271 = vector.broadcast %268 : f32 to vector<2x16x16xf32>
    %272 = arith.mulf %271, %270 : vector<2x16x16xf32>
    %273 = arith.addf %267, %272 : vector<2x16x16xf32>
    %c21_60 = arith.constant 21 : index
    %274 = memref.load %arg3[%c21_60] : memref<36xf32, #tpu.memory_space<smem>>
    %c1_i32_61 = arith.constant 1 : i32
    %275 = tpu.dynamic_rotate %253 by %c1_i32_61 dim 2 : vector<2x16x16xf32>, i32 -> vector<2x16x16xf32>
    %276 = arith.select %10, %11, %275 : vector<2x16x16xi1>, vector<2x16x16xf32>
    %277 = vector.broadcast %274 : f32 to vector<2x16x16xf32>
    %278 = arith.mulf %277, %276 : vector<2x16x16xf32>
    %279 = arith.addf %273, %278 : vector<2x16x16xf32>
    %c22_62 = arith.constant 22 : index
    %280 = memref.load %arg3[%c22_62] : memref<36xf32, #tpu.memory_space<smem>>
    %281 = vector.broadcast %280 : f32 to vector<2x16x16xf32>
    %282 = arith.mulf %281, %253 : vector<2x16x16xf32>
    %283 = arith.addf %279, %282 : vector<2x16x16xf32>
    %c23_63 = arith.constant 23 : index
    %284 = memref.load %arg3[%c23_63] : memref<36xf32, #tpu.memory_space<smem>>
    %c15_i32_64 = arith.constant 15 : i32
    %285 = tpu.dynamic_rotate %253 by %c15_i32_64 dim 2 : vector<2x16x16xf32>, i32 -> vector<2x16x16xf32>
    %286 = arith.select %8, %11, %285 : vector<2x16x16xi1>, vector<2x16x16xf32>
    %287 = vector.broadcast %284 : f32 to vector<2x16x16xf32>
    %288 = arith.mulf %287, %286 : vector<2x16x16xf32>
    %289 = arith.addf %283, %288 : vector<2x16x16xf32>
    %c24_65 = arith.constant 24 : index
    %290 = memref.load %arg3[%c24_65] : memref<36xf32, #tpu.memory_space<smem>>
    %c1_i32_66 = arith.constant 1 : i32
    %291 = tpu.dynamic_rotate %257 by %c1_i32_66 dim 2 : vector<2x16x16xf32>, i32 -> vector<2x16x16xf32>
    %292 = arith.select %10, %11, %291 : vector<2x16x16xi1>, vector<2x16x16xf32>
    %293 = vector.broadcast %290 : f32 to vector<2x16x16xf32>
    %294 = arith.mulf %293, %292 : vector<2x16x16xf32>
    %295 = arith.addf %289, %294 : vector<2x16x16xf32>
    %c25_67 = arith.constant 25 : index
    %296 = memref.load %arg3[%c25_67] : memref<36xf32, #tpu.memory_space<smem>>
    %297 = vector.broadcast %296 : f32 to vector<2x16x16xf32>
    %298 = arith.mulf %297, %257 : vector<2x16x16xf32>
    %299 = arith.addf %295, %298 : vector<2x16x16xf32>
    %c26_68 = arith.constant 26 : index
    %300 = memref.load %arg3[%c26_68] : memref<36xf32, #tpu.memory_space<smem>>
    %c15_i32_69 = arith.constant 15 : i32
    %301 = tpu.dynamic_rotate %257 by %c15_i32_69 dim 2 : vector<2x16x16xf32>, i32 -> vector<2x16x16xf32>
    %302 = arith.select %8, %11, %301 : vector<2x16x16xi1>, vector<2x16x16xf32>
    %303 = vector.broadcast %300 : f32 to vector<2x16x16xf32>
    %304 = arith.mulf %303, %302 : vector<2x16x16xf32>
    %305 = arith.addf %299, %304 : vector<2x16x16xf32>
    %c3_70 = arith.constant 3 : index
    %306 = memref.load %arg2[%c3_70] : memref<4xf32, #tpu.memory_space<smem>>
    %307 = vector.broadcast %306 : f32 to vector<2x16x16xf32>
    %c27 = arith.constant 27 : index
    %308 = memref.load %arg1[%c27] : memref<36xf32, #tpu.memory_space<smem>>
    %309 = vector.broadcast %308 : f32 to vector<2x16x16xf32>
    %310 = arith.mulf %309, %17 : vector<2x16x16xf32>
    %311 = arith.addf %307, %310 : vector<2x16x16xf32>
    %c28 = arith.constant 28 : index
    %312 = memref.load %arg1[%c28] : memref<36xf32, #tpu.memory_space<smem>>
    %313 = vector.broadcast %312 : f32 to vector<2x16x16xf32>
    %314 = arith.mulf %313, %13 : vector<2x16x16xf32>
    %315 = arith.addf %311, %314 : vector<2x16x16xf32>
    %c29 = arith.constant 29 : index
    %316 = memref.load %arg1[%c29] : memref<36xf32, #tpu.memory_space<smem>>
    %317 = vector.broadcast %316 : f32 to vector<2x16x16xf32>
    %318 = arith.mulf %317, %19 : vector<2x16x16xf32>
    %319 = arith.addf %315, %318 : vector<2x16x16xf32>
    %c30 = arith.constant 30 : index
    %320 = memref.load %arg1[%c30] : memref<36xf32, #tpu.memory_space<smem>>
    %321 = vector.broadcast %320 : f32 to vector<2x16x16xf32>
    %322 = arith.mulf %321, %21 : vector<2x16x16xf32>
    %323 = arith.addf %319, %322 : vector<2x16x16xf32>
    %c31 = arith.constant 31 : index
    %324 = memref.load %arg1[%c31] : memref<36xf32, #tpu.memory_space<smem>>
    %325 = vector.broadcast %324 : f32 to vector<2x16x16xf32>
    %326 = arith.mulf %325, %0 : vector<2x16x16xf32>
    %327 = arith.addf %323, %326 : vector<2x16x16xf32>
    %c32 = arith.constant 32 : index
    %328 = memref.load %arg1[%c32] : memref<36xf32, #tpu.memory_space<smem>>
    %329 = vector.broadcast %328 : f32 to vector<2x16x16xf32>
    %330 = arith.mulf %329, %23 : vector<2x16x16xf32>
    %331 = arith.addf %327, %330 : vector<2x16x16xf32>
    %c33 = arith.constant 33 : index
    %332 = memref.load %arg1[%c33] : memref<36xf32, #tpu.memory_space<smem>>
    %333 = vector.broadcast %332 : f32 to vector<2x16x16xf32>
    %334 = arith.mulf %333, %25 : vector<2x16x16xf32>
    %335 = arith.addf %331, %334 : vector<2x16x16xf32>
    %c34 = arith.constant 34 : index
    %336 = memref.load %arg1[%c34] : memref<36xf32, #tpu.memory_space<smem>>
    %337 = vector.broadcast %336 : f32 to vector<2x16x16xf32>
    %338 = arith.mulf %337, %15 : vector<2x16x16xf32>
    %339 = arith.addf %335, %338 : vector<2x16x16xf32>
    %c35 = arith.constant 35 : index
    %340 = memref.load %arg1[%c35] : memref<36xf32, #tpu.memory_space<smem>>
    %341 = vector.broadcast %340 : f32 to vector<2x16x16xf32>
    %342 = arith.mulf %341, %27 : vector<2x16x16xf32>
    %343 = arith.addf %339, %342 : vector<2x16x16xf32>
    %cst_71 = arith.constant 0.000000e+00 : f32
    %344 = vector.broadcast %cst_71 : f32 to vector<2x16x16xf32>
    %345 = arith.maximumf %343, %344 : vector<2x16x16xf32>
    %c1_i32_72 = arith.constant 1 : i32
    %346 = tpu.dynamic_rotate %345 by %c1_i32_72 dim 1 : vector<2x16x16xf32>, i32 -> vector<2x16x16xf32>
    %347 = arith.select %6, %11, %346 : vector<2x16x16xi1>, vector<2x16x16xf32>
    %c15_i32_73 = arith.constant 15 : i32
    %348 = tpu.dynamic_rotate %345 by %c15_i32_73 dim 1 : vector<2x16x16xf32>, i32 -> vector<2x16x16xf32>
    %349 = arith.select %4, %11, %348 : vector<2x16x16xi1>, vector<2x16x16xf32>
    %c27_74 = arith.constant 27 : index
    %350 = memref.load %arg3[%c27_74] : memref<36xf32, #tpu.memory_space<smem>>
    %c1_i32_75 = arith.constant 1 : i32
    %351 = tpu.dynamic_rotate %347 by %c1_i32_75 dim 2 : vector<2x16x16xf32>, i32 -> vector<2x16x16xf32>
    %352 = arith.select %10, %11, %351 : vector<2x16x16xi1>, vector<2x16x16xf32>
    %353 = vector.broadcast %350 : f32 to vector<2x16x16xf32>
    %354 = arith.mulf %353, %352 : vector<2x16x16xf32>
    %355 = arith.addf %305, %354 : vector<2x16x16xf32>
    %c28_76 = arith.constant 28 : index
    %356 = memref.load %arg3[%c28_76] : memref<36xf32, #tpu.memory_space<smem>>
    %357 = vector.broadcast %356 : f32 to vector<2x16x16xf32>
    %358 = arith.mulf %357, %347 : vector<2x16x16xf32>
    %359 = arith.addf %355, %358 : vector<2x16x16xf32>
    %c29_77 = arith.constant 29 : index
    %360 = memref.load %arg3[%c29_77] : memref<36xf32, #tpu.memory_space<smem>>
    %c15_i32_78 = arith.constant 15 : i32
    %361 = tpu.dynamic_rotate %347 by %c15_i32_78 dim 2 : vector<2x16x16xf32>, i32 -> vector<2x16x16xf32>
    %362 = arith.select %8, %11, %361 : vector<2x16x16xi1>, vector<2x16x16xf32>
    %363 = vector.broadcast %360 : f32 to vector<2x16x16xf32>
    %364 = arith.mulf %363, %362 : vector<2x16x16xf32>
    %365 = arith.addf %359, %364 : vector<2x16x16xf32>
    %c30_79 = arith.constant 30 : index
    %366 = memref.load %arg3[%c30_79] : memref<36xf32, #tpu.memory_space<smem>>
    %c1_i32_80 = arith.constant 1 : i32
    %367 = tpu.dynamic_rotate %345 by %c1_i32_80 dim 2 : vector<2x16x16xf32>, i32 -> vector<2x16x16xf32>
    %368 = arith.select %10, %11, %367 : vector<2x16x16xi1>, vector<2x16x16xf32>
    %369 = vector.broadcast %366 : f32 to vector<2x16x16xf32>
    %370 = arith.mulf %369, %368 : vector<2x16x16xf32>
    %371 = arith.addf %365, %370 : vector<2x16x16xf32>
    %c31_81 = arith.constant 31 : index
    %372 = memref.load %arg3[%c31_81] : memref<36xf32, #tpu.memory_space<smem>>
    %373 = vector.broadcast %372 : f32 to vector<2x16x16xf32>
    %374 = arith.mulf %373, %345 : vector<2x16x16xf32>
    %375 = arith.addf %371, %374 : vector<2x16x16xf32>
    %c32_82 = arith.constant 32 : index
    %376 = memref.load %arg3[%c32_82] : memref<36xf32, #tpu.memory_space<smem>>
    %c15_i32_83 = arith.constant 15 : i32
    %377 = tpu.dynamic_rotate %345 by %c15_i32_83 dim 2 : vector<2x16x16xf32>, i32 -> vector<2x16x16xf32>
    %378 = arith.select %8, %11, %377 : vector<2x16x16xi1>, vector<2x16x16xf32>
    %379 = vector.broadcast %376 : f32 to vector<2x16x16xf32>
    %380 = arith.mulf %379, %378 : vector<2x16x16xf32>
    %381 = arith.addf %375, %380 : vector<2x16x16xf32>
    %c33_84 = arith.constant 33 : index
    %382 = memref.load %arg3[%c33_84] : memref<36xf32, #tpu.memory_space<smem>>
    %c1_i32_85 = arith.constant 1 : i32
    %383 = tpu.dynamic_rotate %349 by %c1_i32_85 dim 2 : vector<2x16x16xf32>, i32 -> vector<2x16x16xf32>
    %384 = arith.select %10, %11, %383 : vector<2x16x16xi1>, vector<2x16x16xf32>
    %385 = vector.broadcast %382 : f32 to vector<2x16x16xf32>
    %386 = arith.mulf %385, %384 : vector<2x16x16xf32>
    %387 = arith.addf %381, %386 : vector<2x16x16xf32>
    %c34_86 = arith.constant 34 : index
    %388 = memref.load %arg3[%c34_86] : memref<36xf32, #tpu.memory_space<smem>>
    %389 = vector.broadcast %388 : f32 to vector<2x16x16xf32>
    %390 = arith.mulf %389, %349 : vector<2x16x16xf32>
    %391 = arith.addf %387, %390 : vector<2x16x16xf32>
    %c35_87 = arith.constant 35 : index
    %392 = memref.load %arg3[%c35_87] : memref<36xf32, #tpu.memory_space<smem>>
    %c15_i32_88 = arith.constant 15 : i32
    %393 = tpu.dynamic_rotate %349 by %c15_i32_88 dim 2 : vector<2x16x16xf32>, i32 -> vector<2x16x16xf32>
    %394 = arith.select %8, %11, %393 : vector<2x16x16xi1>, vector<2x16x16xf32>
    %395 = vector.broadcast %392 : f32 to vector<2x16x16xf32>
    %396 = arith.mulf %395, %394 : vector<2x16x16xf32>
    %397 = arith.addf %391, %396 : vector<2x16x16xf32>
    %c0_89 = arith.constant 0 : index
    %c0_90 = arith.constant 0 : index
    %c0_91 = arith.constant 0 : index
    %398 = vector.load %arg6[%c0_89, %c0_90, %c0_91] : memref<2x16x16xf32, #tpu.memory_space<vmem>>, vector<2x16x16xf32>
    tpu.vector_store %arg6[%c0_89, %c0_90, %c0_91], %397 {strides = array<i32>} : memref<2x16x16xf32, #tpu.memory_space<vmem>>, vector<2x16x16xf32>,
    return
  }
  func.func @transform_0(%arg0: i32) -> i32 {
    %c0_i32 = arith.constant 0 : i32
    %c0_i32_0 = arith.constant 0 : i32
    return %c0_i32 : i32
  }
  func.func @transform_1(%arg0: i32) -> i32 {
    %c0_i32 = arith.constant 0 : i32
    %c0_i32_0 = arith.constant 0 : i32
    return %c0_i32 : i32
  }
  func.func @transform_2(%arg0: i32) -> i32 {
    %c0_i32 = arith.constant 0 : i32
    %c0_i32_0 = arith.constant 0 : i32
    return %c0_i32 : i32
  }
  func.func @transform_3(%arg0: i32) -> i32 {
    %c0_i32 = arith.constant 0 : i32
    %c0_i32_0 = arith.constant 0 : i32
    return %c0_i32 : i32
  }
  func.func @transform_4(%arg0: i32) -> (i32, i32, i32) {
    %c0_i32 = arith.constant 0 : i32
    %c0_i32_0 = arith.constant 0 : i32
    %c0_i32_1 = arith.constant 0 : i32
    return %arg0, %c0_i32, %c0_i32_0 : i32, i32, i32
  }
  func.func @transform_5(%arg0: i32) -> (i32, i32, i32) {
    %c0_i32 = arith.constant 0 : i32
    %c0_i32_0 = arith.constant 0 : i32
    %c0_i32_1 = arith.constant 0 : i32
    return %arg0, %c0_i32, %c0_i32_0 : i32, i32, i32
  }
}

</mosaic_0001>

<bundles_post_ra>
// kernel: tpu_custom_call.1
= control target key start
LH: loop header
LB: loop body
LE: loop exit
PB: predicated region body
PF: predicated region fallthrough
CT: control target
= control target key end

     0   :  { %s4659_s0 = inlined_call_operand.vmem [shape: f32[36], index: 0, kind: input, shape index: {}]   ;;  %s4660_s1 = inlined_call_operand.vmem [shape: f32[4], index: 1, kind: input, shape index: {}]   ;;  %s4661_s2 = inlined_call_operand.vmem [shape: f32[36], index: 2, kind: input, shape index: {}]   ;;  %s4662_s3 = inlined_call_operand.<no memory space> [shape: f32[1], index: 3, kind: input, shape index: {}]   ;;  %s4663_s4 = inlined_call_operand.hbm [shape: f32[2,16,16], index: 4, kind: input, shape index: {}]   ;;  %s4664_s5 = inlined_call_operand.hbm [shape: f32[2,16,16], index: 5, kind: output, shape index: {}]  }
   0x1   :  { %4744 = sst [smem:[#allocation93_spill]] %s4662_s3 }
   0x2   :  { %4745 = sst [smem:[#allocation94_spill]] %s4664_s5 }
   0x3   :  { %11 = vsyncpa [#allocation6], 0 }
   0x4   :  { %12 = vsyncpa [#allocation8], 0 }
   0x5   :  { %13 = vsyncpa [#allocation4], 0  ;;  %s31_s20 = sshll.u32 %s4660_s1, 4  ;;  %s32_s20 = int_to_ptr.vmem [resolvable:$true] %s31_s20 }
   0x6   :  { %14 = vsyncpa [#allocation5], 0  ;;  %s21_s23 = sshll.u32 %s4659_s0, 4  ;;  %s1964_s24 = scalar_lea.vmem %s32_s20, 16  ;;  %s22_s23 = int_to_ptr.vmem [resolvable:$true] %s21_s23 }
   0x7   :  { %p1965_p0 = scmp.ne.s32.totalorder %s32_s20, %s1964_s24  ;;  %p1969_p1 = scmp.lt.s32.totalorder %s32_s20, %s32_s20 }
   0x8   :  { %p1970_p2 = scmp.lt.s32.totalorder %s1964_s24, %s1964_s24 }
   0xa   :  { %p1971_p3 = por %p1970_p2, %p1969_p1 }
   0xc   :  { %p1972_p4 = pnand %p1971_p3, %p1965_p0 }
   0xe   :  { %1975 = shalt.err (!%p1972_p4)
}
   0xf   :  { %s2052_s25 = smov [#allocation7]   ;;  %s1976_s26 = scalar_lea.vmem %s22_s23, 16 }
  0x10   :  { %34 = dma.vmem_to_smem %s32_s20, 16, %s2052_s25, [#allocation8]  }
  0x11   :  { %p1977_p5 = scmp.ne.s32.totalorder %s22_s23, %s1976_s26  ;;  %p1981_p6 = scmp.lt.s32.totalorder %s22_s23, %s22_s23 }
  0x12   :  { %p1982_p7 = scmp.lt.s32.totalorder %s1976_s26, %s1976_s26 }
  0x14   :  { %p1983_p8 = por %p1982_p7, %p1981_p6 }
  0x16   :  { %p1984_p9 = pnand %p1983_p8, %p1977_p5 }
  0x18   :  { %1987 = shalt.err (!%p1984_p9)
}
  0x19   :  { %s2053_s1 = smov [#allocation3]   ;;  %s41_s28 = sshll.u32 %s4661_s2, 4  ;;  %s42_s28 = int_to_ptr.vmem [resolvable:$true] %s41_s28 }
  0x1a   :  { %24 = dma.vmem_to_smem %s22_s23, 16, %s2053_s1, [#allocation6]  }
  0x1b   :  { %s1988_s29 = scalar_lea.vmem %s42_s28, 16  ;;  %p1993_p11 = scmp.lt.s32.totalorder %s42_s28, %s42_s28 }
  0x1c   :  { %p1989_p10 = scmp.ne.s32.totalorder %s42_s28, %s1988_s29  ;;  %p1994_p12 = scmp.lt.s32.totalorder %s1988_s29, %s1988_s29 }
  0x1e   :  { %p1995_p13 = por %p1994_p12, %p1993_p11 }
  0x20   :  { %p1996_p0 = pnand %p1995_p13, %p1989_p10 }
  0x22   :  { %1999 = shalt.err (!%p1996_p0)
}
  0x23   :  { %s2054_s30 = smov [#allocation9]   ;;  %s2055_s6 = smov [#allocation10]  }
  0x24   :  { %44 = dma.vmem_to_smem %s42_s28, 16, %s2054_s30, [#allocation8]  }
  0x25   :  { %s52_s7 = sshll.u32 %s2055_s6, 4  ;;  %s2000_s10 = scalar_lea.hbm %s4663_s4, 512  ;;  %s53_s7 = int_to_ptr.vmem [resolvable:$true] %s52_s7 }
  0x26   :  { %p2001_p1 = scmp.ne.s32.totalorder %s4663_s4, %s2000_s10  ;;  %p2004_p2 = scmp.lt.u32.totalorder %s2000_s10, %s4663_s4 }
  0x28   :  { %p2006_p3 = pnand %p2004_p2, %p2001_p1 }
  0x2a   :  { %2009 = shalt.err (!%p2006_p3)
}
  0x2b   :  { %s2010_s14 = scalar_lea.vmem %s53_s7, 512  ;;  %p2015_p5 = scmp.lt.s32.totalorder %s53_s7, %s53_s7 }
  0x2c   :  { %p2011_p4 = scmp.ne.s32.totalorder %s53_s7, %s2010_s14  ;;  %p2016_p6 = scmp.lt.s32.totalorder %s2010_s14, %s2010_s14 }
  0x2e   :  { %p2017_p7 = por %p2016_p6, %p2015_p5 }
  0x30   :  { %p2018_p8 = pnand %p2017_p7, %p2011_p4 }
  0x32   :  { %2021 = shalt.err (!%p2018_p8)
}
  0x33   :  { %s4665_s15 = smov 128   ;;  %s4666_s16 = smov 8  }
  0x34   :  { %58 = dma.hbm_to_vmem [thread:$0]  %s4663_s4, 512, %s53_s7, [#allocation4], %s4665_s15, %s4665_s15, %s4666_s16  }
  0x35   :  { %2044 = dma.done.wait [#allocation6], 16  }
  0x36   :  { %2045 = vsyncadd [#allocation6], 4294967280 }
  0x37   :  { %2046 = dma.done.wait [#allocation8], 32  }
  0x38   :  { %2047 = vsyncadd [#allocation8], 4294967264 }
  0x39   :  { %2048 = dma.done.wait [#allocation4], 512  }
  0x3a   :  { %2049 = vsyncadd [#allocation4], 4294966784 }
  0x3b   :  { %71 = sfence }
  0x3c   :  { %v2116_v0 = vld [vmem:[#allocation10 + $0x10] sm:$0xff]  ;;  %v2118_v1 = vld [vmem:[#allocation10 + $0x18] sm:$0xff]  ;;  %v76_v2 = vlaneseq  ;;  %v2120_v3 = vld [vmem:[#allocation10] sm:$0xff]  ;;  %s4671_s4 = smov 16   ;;  %vm113_vm4 = vcmask 1047680   ;;  %s4669_s19 = smov 113  }
  0x3d   :  { %v88_v4 = vrot.slane %v2116_v0, 7  ;;  %v90_v5 = vrot.slane %v2118_v1, 7  ;;  %v2124_v6 = vld [vmem:[#allocation10 + $0x8] sm:$0xff]  ;;  %v87_v7 = vrot.slane %v2120_v3, 7  ;;  %v100_v17 = vrot.slane %v2120_v3, 1  ;;  %s4667_s20 = smov 127  }
  0x3e   :  { %v2128_v8 = vshrl.u32 %v76_v2, 7  ;;  %v89_v9 = vrot.slane %v2124_v6, 7  ;;  %v102_v18 = vrot.slane %v2124_v6, 1  ;;  %v101_v20 = vrot.slane %v2116_v0, 1  ;;  %s2290_s21 = sld [smem:[#allocation3 + $0x3]]  ;;  %s2292_s22 = sld [smem:[#allocation3 + $0xc]] }
  0x3f   :  { %v103_v21 = vrot.slane %v2118_v1, 1  ;;  %s2294_s23 = sld [smem:[#allocation3 + $0x15]]  ;;  %s2296_s24 = sld [smem:[#allocation3 + $0x1e]]  ;;  %vm1856_vm7 = vcmask 130048  }
  0x40   :  { %4746 = vst [vmem:[#allocation16_spill] sm:$0xff] %v2128_v8  ;;  %vm91_vm0 = vcmp.lt.s32.totalorder %v2128_v8, 1  ;;  %vm83_vm1 = vcmp.eq.s32.totalorder %v2128_v8, 0  ;;  %v2162_v16 = vadd.s32 8, %v2128_v8  ;;  %vm104_vm2 = vcmp.lt.s32.totalorder %v2128_v8, 7  ;;  %s2298_s25 = sld [smem:[#allocation3 + $0x5]] }
  0x41   :  { %v2135_v10 = vsel %vm91_vm0, %v88_v4, %v90_v5  ;;  %v2139_v11 = vsel %vm91_vm0, %v87_v7, %v89_v9  ;;  %v95_v12 = vsel %vm91_vm0, %v90_v5, %v88_v4  ;;  %v94_v13 = vsel %vm91_vm0, %v89_v9, %v87_v7  ;;  %s2300_s26 = sld [smem:[#allocation3 + $0xe]]  ;;  %s2302_s1 = sld [smem:[#allocation3 + $0x17]] }
  0x42   :  { %123 = vrot.lane.b32.xlu1 %v2135_v10, %s4671_s4  ;;  %117 = vrot.lane.b32.xlu0 %v2139_v11, %s4671_s4  ;;  %v2151_v14 = vsel %vm83_vm1, 0.0, %v95_v12  ;;  %v2155_v15 = vsel %vm83_vm1, 0.0, %v94_v13  ;;  %4747 = vst [vmem:[#allocation17_spill] sm:$0xff] %v2162_v16  ;;  %vm82_vm3 = vcmp.eq.s32.totalorder %v2162_v16, 15  ;;  %v107_v19 = vsel %vm104_vm2, %v102_v18, %v100_v17  ;;  %s2304_s0 = sld [smem:[#allocation3 + $0x20]]  ;;  %s2308_s28 = sld [smem:[#allocation3 + $0x9]] }
  0x43   :  { %v2182_v22 = vsel %vm104_vm2, %v100_v17, %v102_v18  ;;  %v2186_v23 = vsel %vm82_vm3, 0.0, %v107_v19  ;;  %v108_v24 = vsel %vm104_vm2, %v103_v21, %v101_v20  ;;  %v2196_v25 = vsel %vm104_vm2, %v101_v20, %v103_v21  ;;  %s2306_s27 = sld [smem:[#allocation3]]  ;;  %s2310_s29 = sld [smem:[#allocation3 + $0x12]] }
  0x44   :  { %4748 = vst [vmem:[#allocation18_spill] sm:$0xff] %v2182_v22  ;;  %4749 = vst [vmem:[#allocation19_spill] sm:$0xff] %v2196_v25  ;;  %v2200_v26 = vsel %vm82_vm3, 0.0, %v108_v24  ;;  %s2312_s30 = sld [smem:[#allocation3 + $0x1b]]  ;;  %s2314_s6 = sld [smem:[#allocation7]]  ;;  %v2351_v24 = vand.u32 127, %v76_v2 }
  0x45   :  { %s2316_s7 = sld [smem:[#allocation7 + $0x1]]  ;;  %s2318_s8 = sld [smem:[#allocation7 + $0x2]] }
  0x46   :  { %120 = vrot.lane.b32.xlu1 %v2151_v14, %s4671_s4  ;;  %114 = vrot.lane.b32.xlu0 %v2155_v15, %s4671_s4  ;;  %s2320_s9 = sld [smem:[#allocation7 + $0x3]]  ;;  %s2322_s10 = sld [smem:[#allocation3 + $0x6]]  ;;  %vm86_vm5 = vcmp.eq.s32.totalorder %v2351_v24, 0  ;;  %vm85_vm6 = vcmp.eq.s32.totalorder %v2351_v24, 15 }
  0x47   :  { %s2324_s11 = sld [smem:[#allocation3 + $0xf]]  ;;  %s2326_s12 = sld [smem:[#allocation3 + $0x18]] }
  0x48   :  { %s2328_s2 = sld [smem:[#allocation3 + $0x21]]  ;;  %s2332_s14 = sld [smem:[#allocation3 + $0xa]] }
  0x49   :  { %s2330_s13 = sld [smem:[#allocation3 + $0x1]]  ;;  %s2334_s17 = sld [smem:[#allocation3 + $0x13]] }
  0x4a   :  { %177 = vrot.lane.b32.xlu1 %v2124_v6, %s4671_s4  ;;  %174 = vrot.lane.b32.xlu0 %v2120_v3, %s4671_s4  ;;  %s2336_s18 = sld [smem:[#allocation3 + $0x1c]]  ;;  %s2338_s15 = sld [smem:[#allocation3 + $0x2]] }
  0x4b   :  { %s2340_s16 = sld [smem:[#allocation3 + $0xb]]  ;;  %s2348_s5 = sld [smem:[#allocation3 + $0x11]] }
  0x4c   :  { %s2356_s3 = sld [smem:[#allocation3 + $0x1a]] }
  0x4e   :  { %183 = vrot.lane.b32.xlu1 %v2118_v1, %s4671_s4  ;;  %180 = vrot.lane.b32.xlu0 %v2116_v0, %s4671_s4 }
  0x51   :  { %4750 = sst [smem:[#allocation20_spill]] %s2340_s16  ;;  %s2358_s16 = sld [smem:[#allocation3 + $0x23]] }
  0x52   :  { %234 = vrot.lane.b32.xlu0 %v2182_v22, %s4671_s4  ;;  %237 = vrot.lane.b32.xlu1 %v2186_v23, %s4671_s4 }
  0x56   :  { %240 = vrot.lane.b32.xlu0 %v2196_v25, %s4671_s4  ;;  %243 = vrot.lane.b32.xlu1 %v2200_v26, %s4671_s4 }
  0x57   :  { %4751 = sst [smem:[#allocation21_spill]] %s2358_s16  ;;  %s2378_s16 = sld [smem:[#allocation3 + $0xd]] }
  0xb4   :  { %v124_v27 = vpop.permute.xlu1 %123  ;;  %v118_v28 = vpop.permute.xlu0 %117 }
  0xb5   :  { %v119_v40 = vsel %vm113_vm4, %v118_v28, %v2139_v11  ;;  %v125_v44 = vsel %vm113_vm4, %v124_v27, %v2135_v10  ;;  %v2354_v27 = vstv %s2290_s21  ;;  %v2361_v28 = vstv %s2292_s22  ;;  %s2376_s21 = sld [smem:[#allocation3 + $0x4]]  ;;  %s2392_s22 = sld [smem:[#allocation3 + $0x16]] }
  0xb8   :  { %v121_v29 = vpop.permute.xlu1 %120  ;;  %v115_v30 = vpop.permute.xlu0 %114 }
  0xb9   :  { %v116_v48 = vsel %vm113_vm4, %v115_v30, %v2155_v15  ;;  %v122_v50 = vsel %vm113_vm4, %v121_v29, %v2151_v14  ;;  %v2364_v29 = vstv %s2294_s23  ;;  %v2367_v30 = vstv %s2296_s24  ;;  %s2394_s23 = sld [smem:[#allocation3 + $0x1f]] }
  0xba   :  { %4752 = vst [vmem:[#allocation22_spill] sm:$0xff] %v2367_v30  ;;  %s2408_s24 = sld [smem:[#allocation3 + $0x7]] }
  0xbc   :  { %v178_v31 = vpop.permute.xlu1 %177  ;;  %v175_v32 = vpop.permute.xlu0 %174 }
  0xbd   :  { %v179_v33 = vsel %vm113_vm4, %v178_v31, %v2124_v6  ;;  %v176_v34 = vsel %vm113_vm4, %v175_v32, %v2120_v3  ;;  %v2374_v32 = vstv %s2298_s25  ;;  %s2410_s25 = sld [smem:[#allocation3 + $0x10]] }
  0xbe   :  { %188 = vrot.lane.b32.xlu1 %v179_v33, %s4671_s4  ;;  %186 = vrot.lane.b32.xlu0 %v176_v34, %s4671_s4  ;;  %v2381_v33 = vstv %s2300_s26  ;;  %v2384_v34 = vstv %s2302_s1  ;;  %s4755_s26 = sld [smem:[#allocation20_spill]]  ;;  %s2424_s1 = sld [smem:[#allocation3 + $0x19]] }
  0xbf   :  { %4753 = vst [vmem:[#allocation23_spill] sm:$0xff] %v2384_v34 }
  0xc0   :  { %v184_v35 = vpop.permute.xlu1 %183  ;;  %v181_v36 = vpop.permute.xlu0 %180  ;;  %v369_v16 = vstv %s2408_s24  ;;  %s3972_s24 = sld [smem:[#allocation9 + $0x17]] }
  0xc1   :  { %v185_v37 = vsel %vm113_vm4, %v184_v35, %v2118_v1  ;;  %v182_v38 = vsel %vm113_vm4, %v181_v36, %v2116_v0  ;;  %v2387_v35 = vstv %s2304_s0  ;;  %v2390_v36 = vstv %s2306_s27  ;;  %s2426_s0 = sld [smem:[#allocation3 + $0x22]]  ;;  %s1890_s27 = sld [smem:[#allocation9 + $0x3]] }
  0xc2   :  { %192 = vrot.lane.b32.xlu1 %v185_v37, %s4671_s4  ;;  %190 = vrot.lane.b32.xlu0 %v182_v38, %s4671_s4  ;;  %4754 = vst [vmem:[#allocation24_spill] sm:$0xff] %v2387_v35  ;;  %v2397_v37 = vstv %s2314_s6  ;;  %v2400_v38 = vstv %s2308_s28  ;;  %s1891_s28 = sld [smem:[#allocation9 + $0x4]]  ;;  %s4929_s6 = sld [smem:[#allocation93_spill]] }
  0xc4   :  { %v235_v39 = vpop.permute.xlu0 %234  ;;  %v238_v42 = vpop.permute.xlu1 %237 }
  0xc5   :  { %v236_v41 = vsel %vm113_vm4, %v235_v39, %v2182_v22  ;;  %v239_v46 = vsel %vm113_vm4, %v238_v42, %v2186_v23  ;;  %v2403_v39 = vstv %s2310_s29  ;;  %v2416_v42 = vstv %s2318_s8  ;;  %s1907_s8 = sld [smem:[#allocation9 + $0xa]]  ;;  %s4105_s29 = sld [smem:[#allocation9 + $0x1d]] }
  0xc6   :  { %128 = vrot.lane.b32.xlu1 %v119_v40, %s4671_s4  ;;  %246 = vrot.lane.b32.xlu0 %v236_v41, %s4671_s4  ;;  %v2406_v40 = vstv %s2312_s30  ;;  %v2413_v41 = vstv %s2316_s7  ;;  %s1892_s7 = sld [smem:[#allocation9 + $0x5]]  ;;  %s4507_s30 = sld [smem:[#allocation9 + $0x21]] }
  0xc8   :  { %v241_v43 = vpop.permute.xlu0 %240  ;;  %v244_v47 = vpop.permute.xlu1 %243 }
  0xc9   :  { %v242_v45 = vsel %vm113_vm4, %v241_v43, %v2196_v25  ;;  %v245_v49 = vsel %vm113_vm4, %v244_v47, %v2200_v26  ;;  %v2419_v43 = vstv %s2330_s13  ;;  %v2433_v47 = vstv %s2320_s9  ;;  %s1894_s9 = sld [smem:[#allocation9 + $0x7]]  ;;  %s1932_s13 = sld [smem:[#allocation9 + $0x19]] }
  0xca   :  { %132 = vrot.lane.b32.xlu1 %v125_v44, %s4671_s4  ;;  %250 = vrot.lane.b32.xlu0 %v242_v45, %s4671_s4  ;;  %v2422_v44 = vstv %s2332_s14  ;;  %s1929_s14 = sld [smem:[#allocation9 + $0x16]] }
  0xce   :  { %126 = vrot.lane.b32.xlu0 %v116_v48, %s4671_s4  ;;  %248 = vrot.lane.b32.xlu1 %v239_v46, %s4671_s4  ;;  %v2436_v48 = vstv %s2322_s10  ;;  %s1926_s10 = sld [smem:[#allocation9 + $0x13]] }
  0xcf   :  { %4756 = vst [vmem:[#allocation25_spill] sm:$0xff] %v2436_v48 }
  0xd2   :  { %130 = vrot.lane.b32.xlu0 %v122_v50, %s4671_s4  ;;  %252 = vrot.lane.b32.xlu1 %v245_v49, %s4671_s4  ;;  %s2346_s4 = sld [smem:[#allocation3 + $0x8]]  ;;  %v2439_v49 = vstv %s2334_s17  ;;  %v2442_v50 = vstv %s2336_s18  ;;  %s1948_s17 = sld [smem:[#allocation9 + $0x1f]] }
  0xd3   :  { %s1951_s18 = sld [smem:[#allocation9 + $0x22]] }
 0x130   :  { %v189_v51 = vpop.permute.xlu1 %188  ;;  %v187_v52 = vpop.permute.xlu0 %186 }
 0x131   :  { %v195_v53 = vsel %vm113_vm4, %v189_v51, %v2124_v6  ;;  %v194_v54 = vsel %vm113_vm4, %v187_v52, %v2120_v3  ;;  %v2445_v51 = vstv %s2324_s11  ;;  %v2448_v52 = vstv %s2326_s12  ;;  %s1913_s11 = sld [smem:[#allocation9 + $0x10]]  ;;  %s1945_s12 = sld [smem:[#allocation9 + $0x1c]] }
 0x132   :  { %204 = vrot.lane.b32.xlu1 %v195_v53, %s4669_s19  ;;  %202 = vrot.lane.b32.xlu0 %v194_v54, %s4669_s19  ;;  %4757 = vst [vmem:[#allocation26_spill] sm:$0xff] %v2445_v51  ;;  %4758 = vst [vmem:[#allocation27_spill] sm:$0xff] %v2448_v52  ;;  %v2529_v52 = vstv %s2426_s0  ;;  %s4011_s0 = sld [smem:[#allocation9 + $0x9]] }
 0x133   :  { %4771 = vst [vmem:[#allocation39_spill] sm:$0xff] %v2529_v52 }
 0x134   :  { %v193_v55 = vpop.permute.xlu1 %192  ;;  %v191_v56 = vpop.permute.xlu0 %190 }
 0x135   :  { %v197_v57 = vsel %vm113_vm4, %v193_v55, %v2118_v1  ;;  %v196_v58 = vsel %vm113_vm4, %v191_v56, %v2116_v0  ;;  %v2457_v55 = vstv %s4755_s26  ;;  %s3993_s26 = sld [smem:[#allocation9 + $0x20]] }
 0x136   :  { %208 = vrot.lane.b32.xlu1 %v197_v57, %s4669_s19  ;;  %206 = vrot.lane.b32.xlu0 %v196_v58, %s4669_s19 }
 0x138   :  { %v129_v59 = vpop.permute.xlu1 %128  ;;  %v247_v60 = vpop.permute.xlu0 %246 }
 0x139   :  { %v254_v61 = vsel %vm113_vm4, %v247_v60, %v2182_v22  ;;  %v135_v62 = vsel %vm113_vm4, %v129_v59, %v2139_v11  ;;  %v2475_v60 = vmul.f32 %v2439_v49, %v2139_v11 }
 0x13a   :  { %220 = vrot.lane.b32.xlu1 %v195_v53, %s4667_s20  ;;  %218 = vrot.lane.b32.xlu0 %v194_v54, %s4667_s20  ;;  %v2451_v53 = vstv %s2328_s2  ;;  %v2454_v54 = vstv %s2338_s15  ;;  %s4761_s15 = sld [smem:[#allocation21_spill]]  ;;  %s1910_s2 = sld [smem:[#allocation9 + $0xd]] }
 0x13b   :  { %4759 = vst [vmem:[#allocation28_spill] sm:$0xff] %v2451_v53  ;;  %v759_v53 = vstv %s2410_s25  ;;  %s3991_s25 = sld [smem:[#allocation9 + $0x1e]] }
 0x13c   :  { %v133_v63 = vpop.permute.xlu1 %132  ;;  %v251_v4 = vpop.permute.xlu0 %250 }
 0x13d   :  { %v256_v5 = vsel %vm113_vm4, %v251_v4, %v2196_v25  ;;  %v137_v7 = vsel %vm113_vm4, %v133_v63, %v2135_v10 }
 0x13e   :  { %224 = vrot.lane.b32.xlu1 %v197_v57, %s4667_s20  ;;  %222 = vrot.lane.b32.xlu0 %v196_v58, %s4667_s20  ;;  %v2464_v57 = vmul.f32 %v2419_v43, %v2139_v11  ;;  %v2468_v58 = vmul.f32 %v2422_v44, %v2139_v11 }
 0x140   :  { %v249_v9 = vpop.permute.xlu1 %248  ;;  %v127_v12 = vpop.permute.xlu0 %126 }
 0x141   :  { %v255_v13 = vsel %vm113_vm4, %v249_v9, %v2186_v23  ;;  %v134_v18 = vsel %vm113_vm4, %v127_v12, %v2155_v15  ;;  %v339_v9 = vstv %s2376_s21  ;;  %v2504_v12 = vstv %s2346_s4  ;;  %s416_s4 = sld [smem:[#allocation9]]  ;;  %s3960_s21 = sld [smem:[#allocation9 + $0xc]] }
 0x142   :  { %144 = vrot.lane.b32.xlu1 %v135_v62, %s4669_s19  ;;  %262 = vrot.lane.b32.xlu0 %v254_v61, %s4669_s19  ;;  %4765 = vst [vmem:[#allocation33_spill] sm:$0xff] %v2504_v12  ;;  %v2522_v8 = vmul.f32 %v339_v9, %v2124_v6 }
 0x144   :  { %v253_v17 = vpop.permute.xlu1 %252  ;;  %v131_v19 = vpop.permute.xlu0 %130 }
 0x145   :  { %v257_v20 = vsel %vm113_vm4, %v253_v17, %v2200_v26  ;;  %v136_v21 = vsel %vm113_vm4, %v131_v19, %v2151_v14  ;;  %v1119_v17 = vstv %s2392_s22  ;;  %v2512_v19 = vstv %s2348_s5  ;;  %s4910_s5 = smov 113   ;;  %s3962_s22 = sld [smem:[#allocation9 + $0xe]] }
 0x146   :  { %148 = vrot.lane.b32.xlu1 %v137_v7, %s4669_s19  ;;  %266 = vrot.lane.b32.xlu0 %v256_v5, %s4669_s19  ;;  %4767 = vst [vmem:[#allocation35_spill] sm:$0xff] %v2512_v19  ;;  %v2546_v19 = vmul.f32 %v339_v9, %v2118_v1 }
 0x14a   :  { %160 = vrot.lane.b32.xlu1 %v135_v62, %s4667_s20  ;;  %278 = vrot.lane.b32.xlu0 %v254_v61, %s4667_s20  ;;  %v2479_v61 = vmul.f32 %v2442_v50, %v2139_v11  ;;  %v2483_v62 = vmul.f32 %v2419_v43, %v2135_v10  ;;  %v2496_v11 = vmul.f32 %v2439_v49, %v2135_v10 }
 0x14c   :  { %4763 = vst [vmem:[#allocation31_spill] sm:$0xff] %v2496_v11  ;;  %v2552_v11 = vmul.f32 %v1119_v17, %v2118_v1 }
 0x14e   :  { %164 = vrot.lane.b32.xlu1 %v137_v7, %s4667_s20  ;;  %282 = vrot.lane.b32.xlu0 %v256_v5, %s4667_s20  ;;  %v2492_v5 = vmul.f32 %v2422_v44, %v2135_v10  ;;  %v2500_v7 = vmul.f32 %v2442_v50, %v2135_v10  ;;  %v2526_v10 = vstv %s2424_s1  ;;  %4775 = vst [vmem:[#allocation43_spill] sm:$0xff] %v2552_v11  ;;  %s4009_s1 = sld [smem:[#allocation9 + $0x6]] }
 0x14f   :  { %4770 = vst [vmem:[#allocation38_spill] sm:$0xff] %v2526_v10  ;;  %v2574_v11 = vmul.f32 %v2419_v43, %v2155_v15 }
 0x150   :  { %4762 = vst [vmem:[#allocation30_spill] sm:$0xff] %v2492_v5  ;;  %4764 = vst [vmem:[#allocation32_spill] sm:$0xff] %v2500_v7 }
 0x151   :  { %4781 = vst [vmem:[#allocation49_spill] sm:$0xff] %v2574_v11  ;;  %v2595_v11 = vmul.f32 %v339_v9, %v2120_v3 }
 0x152   :  { %264 = vrot.lane.b32.xlu1 %v255_v13, %s4669_s19  ;;  %142 = vrot.lane.b32.xlu0 %v134_v18, %s4669_s19 }
 0x153   :  { %4786 = vst [vmem:[#allocation54_spill] sm:$0xff] %v2595_v11  ;;  %v2616_v11 = vmul.f32 %v1119_v17, %v2120_v3 }
 0x155   :  { %4792 = vst [vmem:[#allocation60_spill] sm:$0xff] %v2616_v11 }
 0x156   :  { %268 = vrot.lane.b32.xlu1 %v257_v20, %s4669_s19  ;;  %146 = vrot.lane.b32.xlu0 %v136_v21, %s4669_s19  ;;  %s2344_s19 = sld [smem:[#allocation3 + $0x1d]] }
 0x15a   :  { %280 = vrot.lane.b32.xlu1 %v255_v13, %s4667_s20  ;;  %158 = vrot.lane.b32.xlu0 %v134_v18, %s4667_s20  ;;  %v729_v13 = vstv %s2378_s16  ;;  %v2509_v18 = vstv %s2394_s23  ;;  %s4911_s16 = smov 127   ;;  %s3970_s23 = sld [smem:[#allocation9 + $0x15]] }
 0x15b   :  { %4766 = vst [vmem:[#allocation34_spill] sm:$0xff] %v2509_v18  ;;  %v2536_v7 = vmul.f32 %v729_v13, %v2124_v6  ;;  %v2549_v48 = vmul.f32 %v729_v13, %v2118_v1  ;;  %v2556_v5 = vmul.f32 %v2509_v18, %v2118_v1  ;;  %v2578_v1 = vmul.f32 %v2422_v44, %v2155_v15 }
 0x15c   :  { %v2471_v59 = vstv %s2344_s19  ;;  %s1888_s19 = sld [smem:[#allocation9 + $0x1]] }
 0x15d   :  { %4772 = vst [vmem:[#allocation40_spill] sm:$0xff] %v2536_v7  ;;  %4774 = vst [vmem:[#allocation42_spill] sm:$0xff] %v2549_v48  ;;  %v2559_v7 = vmul.f32 %v369_v16, %v2186_v23  ;;  %v2570_v48 = vmul.f32 %v2529_v52, %v2186_v23 }
 0x15e   :  { %284 = vrot.lane.b32.xlu1 %v257_v20, %s4667_s20  ;;  %162 = vrot.lane.b32.xlu0 %v136_v21, %s4667_s20  ;;  %s2342_s20 = sld [smem:[#allocation3 + $0x14]]  ;;  %v2515_v20 = vstv %s2356_s3  ;;  %v2518_v21 = vstv %s4761_s15  ;;  %4776 = vst [vmem:[#allocation44_spill] sm:$0xff] %v2556_v5  ;;  %4782 = vst [vmem:[#allocation50_spill] sm:$0xff] %v2578_v1  ;;  %v2582_v5 = vmul.f32 %v2439_v49, %v2155_v15  ;;  %s4835_s3 = smov 16  }
 0x15f   :  { %4768 = vst [vmem:[#allocation36_spill] sm:$0xff] %v2515_v20  ;;  %4769 = vst [vmem:[#allocation37_spill] sm:$0xff] %v2518_v21  ;;  %v2539_v20 = vmul.f32 %v1119_v17, %v2124_v6  ;;  %v2543_v21 = vmul.f32 %v2509_v18, %v2124_v6  ;;  %v2566_v6 = vmul.f32 %v2526_v10, %v2186_v23  ;;  %s4024_s15 = sld [smem:[#allocation9 + $0x8]] }
 0x160   :  { %4777 = vst [vmem:[#allocation45_spill] sm:$0xff] %v2559_v7  ;;  %4780 = vst [vmem:[#allocation48_spill] sm:$0xff] %v2570_v48  ;;  %v2598_v1 = vmul.f32 %v369_v16, %v2182_v22  ;;  %v2613_v7 = vmul.f32 %v759_v53, %v2182_v22 }
 0x161   :  { %4773 = vst [vmem:[#allocation41_spill] sm:$0xff] %v2539_v20  ;;  %v2562_v20 = vmul.f32 %v759_v53, %v2186_v23  ;;  %4779 = vst [vmem:[#allocation47_spill] sm:$0xff] %v2566_v6  ;;  %v2589_v6 = vmul.f32 %v369_v16, %v2200_v26 }
 0x162   :  { %4783 = vst [vmem:[#allocation51_spill] sm:$0xff] %v2582_v5  ;;  %4787 = vst [vmem:[#allocation55_spill] sm:$0xff] %v2598_v1  ;;  %v2601_v5 = vmul.f32 %v759_v53, %v2200_v26  ;;  %v2620_v1 = vmul.f32 %v2526_v10, %v2182_v22  ;;  %v2640_v22 = vmul.f32 %v2422_v44, %v2151_v14 }
 0x163   :  { %4778 = vst [vmem:[#allocation46_spill] sm:$0xff] %v2562_v20  ;;  %v2586_v20 = vmul.f32 %v2442_v50, %v2155_v15  ;;  %4785 = vst [vmem:[#allocation53_spill] sm:$0xff] %v2589_v6  ;;  %v2605_v15 = vmul.f32 %v2526_v10, %v2200_v26  ;;  %v2610_v6 = vmul.f32 %v729_v13, %v2120_v3 }
 0x164   :  { %v2460_v56 = vstv %s2342_s20  ;;  %4788 = vst [vmem:[#allocation56_spill] sm:$0xff] %v2601_v5  ;;  %4791 = vst [vmem:[#allocation59_spill] sm:$0xff] %v2613_v7  ;;  %v2624_v5 = vmul.f32 %v2509_v18, %v2120_v3  ;;  %v2644_v3 = vmul.f32 %v2439_v49, %v2151_v14  ;;  %v2652_v10 = vmul.f32 %v339_v9, %v2116_v0  ;;  %s1889_s20 = sld [smem:[#allocation9 + $0x2]] }
 0x165   :  { %4760 = vst [vmem:[#allocation29_spill] sm:$0xff] %v2460_v56  ;;  %4784 = vst [vmem:[#allocation52_spill] sm:$0xff] %v2586_v20  ;;  %v2659_v44 = vmul.f32 %v2442_v50, %v2151_v14  ;;  %v2671_v9 = vmul.f32 %v1119_v17, %v2116_v0 }
 0x166   :  { %4789 = vst [vmem:[#allocation57_spill] sm:$0xff] %v2605_v15  ;;  %4790 = vst [vmem:[#allocation58_spill] sm:$0xff] %v2610_v6  ;;  %v2632_v15 = vmul.f32 %v2419_v43, %v2151_v14 }
 0x167   :  { %4793 = vst [vmem:[#allocation61_spill] sm:$0xff] %v2620_v1  ;;  %4794 = vst [vmem:[#allocation62_spill] sm:$0xff] %v2624_v5  ;;  %v2665_v1 = vmul.f32 %v729_v13, %v2116_v0 }
 0x168   :  { %4796 = vst [vmem:[#allocation64_spill] sm:$0xff] %v2632_v15  ;;  %4797 = vst [vmem:[#allocation65_spill] sm:$0xff] %v2640_v22 }
 0x169   :  { %4798 = vst [vmem:[#allocation66_spill] sm:$0xff] %v2644_v3  ;;  %4799 = vst [vmem:[#allocation67_spill] sm:$0xff] %v2652_v10 }
 0x16a   :  { %4801 = vst [vmem:[#allocation69_spill] sm:$0xff] %v2659_v44  ;;  %4802 = vst [vmem:[#allocation70_spill] sm:$0xff] %v2665_v1 }
 0x16b   :  { %4804 = vst [vmem:[#allocation72_spill] sm:$0xff] %v2671_v9 }
 0x1a4   :  { %v2369_v31 = vpop.permute.xlu1 %204  ;;  %v2371_v2 = vpop.permute.xlu0 %202 }
 0x1a5   :  { %v215_v7 = vsel %vm86_vm5, 0.0, %v2369_v31  ;;  %v2655_v31 = vmul.f32 %v369_v16, %v2196_v25 }
 0x1a6   :  { %v331_v16 = vmul.f32 %v2354_v27, %v215_v7  ;;  %v2675_v5 = vmul.f32 %v2361_v28, %v215_v7  ;;  %v2678_v14 = vmul.f32 %v2364_v29, %v215_v7  ;;  %v2681_v50 = vmul.f32 %v2367_v30, %v215_v7 }
 0x1a7   :  { %4800 = vst [vmem:[#allocation68_spill] sm:$0xff] %v2655_v31 }
 0x1a8   :  { %v2428_v45 = vpop.permute.xlu1 %208  ;;  %v2430_v46 = vpop.permute.xlu0 %206 }
 0x1a9   :  { %v217_v49 = vsel %vm86_vm5, 0.0, %v2428_v45  ;;  %v2702_v7 = vsel %vm86_vm5, 0.0, %v2430_v46 }
 0x1aa   :  { %4808 = vst [vmem:[#allocation76_spill] sm:$0xff] %v2702_v7  ;;  %v2714_v31 = vmul.f32 %v2364_v29, %v217_v49  ;;  %v2724_v10 = vmul.f32 %v2367_v30, %v217_v49 }
 0x1ac   :  { %v2486_v63 = vpop.permute.xlu1 %220  ;;  %v2488_v4 = vpop.permute.xlu0 %218 }
 0x1ad   :  { %v231_v46 = vsel %vm85_vm6, 0.0, %v2486_v63  ;;  %v2737_v63 = vmul.f32 %v2364_v29, %v2702_v7 }
 0x1af   :  { %4811 = vst [vmem:[#allocation79_spill] sm:$0xff] %v2737_v63 }
 0x1b0   :  { %v2531_v12 = vpop.permute.xlu1 %224  ;;  %v2533_v51 = vpop.permute.xlu0 %222 }
 0x1b4   :  { %v145_v23 = vpop.permute.xlu1 %144  ;;  %v2592_v48 = vpop.permute.xlu0 %262 }
 0x1b5   :  { %v155_v20 = vsel %vm86_vm5, 0.0, %v145_v23  ;;  %v2628_v23 = vmul.f32 %v2529_v52, %v2200_v26  ;;  %v214_v26 = vsel %vm86_vm5, 0.0, %v2371_v2  ;;  %v2668_v2 = vmul.f32 %v759_v53, %v2196_v25 }
 0x1b6   :  { %v301_v11 = vmul.f32 %v2390_v36, %v155_v20  ;;  %v2684_v45 = vmul.f32 %v2354_v27, %v214_v26  ;;  %v2687_v53 = vmul.f32 %v2361_v28, %v214_v26  ;;  %v2690_v0 = vmul.f32 %v2364_v29, %v214_v26 }
 0x1b7   :  { %4795 = vst [vmem:[#allocation63_spill] sm:$0xff] %v2628_v23  ;;  %4803 = vst [vmem:[#allocation71_spill] sm:$0xff] %v2668_v2  ;;  %v2694_v17 = vmul.f32 %v2367_v30, %v214_v26  ;;  %v2697_v25 = vmul.f32 %v2354_v27, %v217_v49  ;;  %v691_v2 = vmul.f32 %v2400_v38, %v155_v20 }
 0x1b8   :  { %v149_v43 = vpop.permute.xlu1 %148  ;;  %v2649_v52 = vpop.permute.xlu0 %266  ;;  %4805 = vst [vmem:[#allocation73_spill] sm:$0xff] %v2687_v53  ;;  %4806 = vst [vmem:[#allocation74_spill] sm:$0xff] %v2690_v0  ;;  %v305_v13 = vadd.f32 %v301_v11, %v2397_v37  ;;  %v2706_v23 = vmul.f32 %v2361_v28, %v217_v49  ;;  %v1081_v9 = vmul.f32 %v2403_v39, %v155_v20 }
 0x1b9   :  { %4807 = vst [vmem:[#allocation75_spill] sm:$0xff] %v2694_v17  ;;  %v157_v11 = vsel %vm86_vm5, 0.0, %v149_v43  ;;  %v1471_v44 = vmul.f32 %v2406_v40, %v155_v20  ;;  %v2728_v43 = vmul.f32 %v2354_v27, %v2702_v7  ;;  %v2742_v20 = vsel %vm85_vm6, 0.0, %v2488_v4 }
 0x1ba   :  { %v315_v0 = vadd.f32 %v2464_v57, %v305_v13  ;;  %4812 = vst [vmem:[#allocation80_spill] sm:$0xff] %v2742_v20  ;;  %v695_v49 = vadd.f32 %v691_v2, %v2413_v41  ;;  %v303_v27 = vmul.f32 %v2390_v36, %v157_v11  ;;  %v1085_v57 = vadd.f32 %v1081_v9, %v2416_v42 }
 0x1bb   :  { %4809 = vst [vmem:[#allocation77_spill] sm:$0xff] %v2728_v43  ;;  %v351_v43 = vmul.f32 %v2374_v32, %v231_v46  ;;  %v2752_v29 = vmul.f32 %v2384_v34, %v231_v46  ;;  %v1475_v4 = vadd.f32 %v1471_v44, %v2433_v47  ;;  %v693_v63 = vmul.f32 %v2400_v38, %v157_v11 }
 0x1bc   :  { %v161_v18 = vpop.permute.xlu1 %160  ;;  %v2721_v1 = vpop.permute.xlu0 %278  ;;  %v2775_v6 = vmul.f32 %v2381_v33, %v2742_v20 }
 0x1bd   :  { %v171_v26 = vsel %vm85_vm6, 0.0, %v161_v18  ;;  %v2732_v18 = vmul.f32 %v2361_v28, %v2702_v7  ;;  %v2748_v28 = vmul.f32 %v2381_v33, %v231_v46  ;;  %v2755_v7 = vmul.f32 %v2387_v35, %v231_v46 }
 0x1be   :  { %v321_v17 = vmul.f32 %v2454_v54, %v171_v26  ;;  %v711_v2 = vmul.f32 %v2457_v55, %v171_v26  ;;  %v1101_v3 = vmul.f32 %v2460_v56, %v171_v26  ;;  %v705_v46 = vadd.f32 %v2468_v58, %v695_v49  ;;  %4815 = vst [vmem:[#allocation83_spill] sm:$0xff] %v2775_v6 }
 0x1bf   :  { %4810 = vst [vmem:[#allocation78_spill] sm:$0xff] %v2732_v18  ;;  %v1083_v18 = vmul.f32 %v2403_v39, %v157_v11  ;;  %v1491_v44 = vmul.f32 %v2471_v59, %v171_v26  ;;  %v2784_v58 = vsel %vm85_vm6, 0.0, %v2533_v51  ;;  %v1485_v49 = vadd.f32 %v2479_v61, %v1475_v4 }
 0x1c0   :  { %v165_v30 = vpop.permute.xlu1 %164  ;;  %v325_v13 = vadd.f32 %v321_v17, %v315_v0  ;;  %v2766_v0 = vmul.f32 %v2374_v32, %v2742_v20  ;;  %v307_v17 = vadd.f32 %v303_v27, %v2397_v37  ;;  %v2771_v22 = vpop.permute.xlu0 %282  ;;  %4816 = vst [vmem:[#allocation84_spill] sm:$0xff] %v2784_v58  ;;  %v715_v26 = vadd.f32 %v711_v2, %v705_v46 }
 0x1c1   :  { %v173_v9 = vsel %vm85_vm6, 0.0, %v165_v30  ;;  %4814 = vst [vmem:[#allocation82_spill] sm:$0xff] %v2771_v22  ;;  %v233_v30 = vsel %vm85_vm6, 0.0, %v2531_v12  ;;  %v697_v20 = vadd.f32 %v693_v63, %v2413_v41  ;;  %v1087_v22 = vadd.f32 %v1083_v18, %v2416_v42 }
 0x1c2   :  { %4813 = vst [vmem:[#allocation81_spill] sm:$0xff] %v2766_v0  ;;  %v335_v53 = vadd.f32 %v331_v16, %v325_v13  ;;  %v1095_v0 = vadd.f32 %v2475_v60, %v1085_v57  ;;  %v323_v27 = vmul.f32 %v2454_v54, %v173_v9  ;;  %v1473_v6 = vmul.f32 %v2406_v40, %v157_v11 }
 0x1c3   :  { %v353_v16 = vmul.f32 %v2374_v32, %v233_v30  ;;  %v2793_v60 = vmul.f32 %v2381_v33, %v233_v30  ;;  %v1495_v57 = vadd.f32 %v1491_v44, %v1485_v49  ;;  %v317_v51 = vadd.f32 %v2483_v62, %v307_v17  ;;  %v4817_v44 = vld [vmem:[#allocation30_spill] sm:$0xff] }
 0x1c4   :  { %v265_v15 = vpop.permute.xlu1 %264  ;;  %v1105_v12 = vadd.f32 %v1101_v3, %v1095_v0  ;;  %v2797_v13 = vmul.f32 %v2384_v34, %v233_v30  ;;  %v713_v61 = vmul.f32 %v2457_v55, %v173_v9  ;;  %v1103_v63 = vmul.f32 %v2460_v56, %v173_v9  ;;  %v143_v62 = vpop.permute.xlu0 %142  ;;  %v4818_v34 = vld [vmem:[#allocation31_spill] sm:$0xff] }
 0x1c5   :  { %v345_v18 = vadd.f32 %v2522_v8, %v335_v53  ;;  %v2803_v3 = vmul.f32 %v2387_v35, %v233_v30  ;;  %v725_v11 = vadd.f32 %v2675_v5, %v715_v26  ;;  %v327_v2 = vadd.f32 %v323_v27, %v317_v51  ;;  %v4824_v51 = vld [vmem:[#allocation26_spill] sm:$0xff] }
 0x1c6   :  { %v275_v0 = vsel %vm86_vm5, 0.0, %v265_v15  ;;  %v1477_v17 = vadd.f32 %v1473_v6, %v2433_v47  ;;  %v1115_v46 = vadd.f32 %v2678_v14, %v1105_v12  ;;  %v707_v49 = vadd.f32 %v4817_v44, %v697_v20  ;;  %v4820_v20 = vld [vmem:[#allocation25_spill] sm:$0xff] }
 0x1c7   :  { %v1097_v56 = vadd.f32 %v4818_v34, %v1087_v22  ;;  %v2815_v8 = vsel %vm86_vm5, 0.0, %v2592_v48  ;;  %v2820_v5 = vsel %vm86_vm5, 0.0, %v2649_v52  ;;  %v1505_v15 = vadd.f32 %v2681_v50, %v1495_v57  ;;  %v4821_v52 = vld [vmem:[#allocation40_spill] sm:$0xff] }
 0x1c8   :  { %v269_v4 = vpop.permute.xlu1 %268  ;;  %4819 = vst [vmem:[#allocation30_spill] sm:$0xff] %v2815_v8  ;;  %v1493_v6 = vmul.f32 %v2471_v59, %v173_v9  ;;  %v717_v53 = vadd.f32 %v713_v61, %v707_v49  ;;  %v355_v30 = vadd.f32 %v351_v43, %v345_v18  ;;  %v361_v26 = vmul.f32 %v4820_v20, %v275_v0  ;;  %v4823_v9 = vld [vmem:[#allocation41_spill] sm:$0xff]  ;;  %v147_v18 = vpop.permute.xlu0 %146 }
 0x1c9   :  { %v1107_v14 = vadd.f32 %v1103_v63, %v1097_v56  ;;  %v2827_v22 = vmul.f32 %v2374_v32, %v2784_v58  ;;  %v2831_v34 = vmul.f32 %v2381_v33, %v2784_v58  ;;  %v337_v48 = vadd.f32 %v2697_v25, %v327_v2  ;;  %v4822_v56 = vld [vmem:[#allocation32_spill] sm:$0xff] }
 0x1ca   :  { %v735_v27 = vadd.f32 %v4821_v52, %v725_v11  ;;  %v2837_v50 = vmul.f32 %v4820_v20, %v2815_v8  ;;  %v1487_v43 = vadd.f32 %v4822_v56, %v1477_v17  ;;  %v1125_v12 = vadd.f32 %v4823_v9, %v1115_v46 }
 0x1cb   :  { %v154_v32 = vsel %vm86_vm5, 0.0, %v143_v62  ;;  %v2845_v33 = vmul.f32 %v4824_v51, %v2815_v8  ;;  %v2849_v25 = vmul.f32 %v4820_v20, %v2820_v5  ;;  %v2854_v61 = vsel %vm85_vm6, 0.0, %v2721_v1 }
 0x1cc   :  { %v281_v57 = vpop.permute.xlu1 %280  ;;  %4825 = vst [vmem:[#allocation31_spill] sm:$0xff] %v2854_v61  ;;  %v1515_v63 = vadd.f32 %v2543_v21, %v1505_v15  ;;  %v727_v11 = vadd.f32 %v2706_v23, %v717_v53  ;;  %v1117_v2 = vadd.f32 %v2714_v31, %v1107_v14  ;;  %v1497_v62 = vadd.f32 %v1493_v6, %v1487_v43  ;;  %v4826_v15 = vld [vmem:[#allocation27_spill] sm:$0xff]  ;;  %v4827_v53 = vld [vmem:[#allocation28_spill] sm:$0xff]  ;;  %v159_v9 = vpop.permute.xlu0 %158 }
 0x1cd   :  { %v365_v17 = vadd.f32 %v361_v26, %v355_v30  ;;  %v745_v46 = vadd.f32 %v2748_v28, %v735_v27  ;;  %v300_v44 = vmul.f32 %v2390_v36, %v154_v32  ;;  %v347_v49 = vadd.f32 %v2546_v19, %v337_v48  ;;  %v4828_v30 = vld [vmem:[#allocation33_spill] sm:$0xff] }
 0x1ce   :  { %v2864_v52 = vsel %vm85_vm6, 0.0, %v281_v57  ;;  %v751_v1 = vmul.f32 %v4824_v51, %v275_v0  ;;  %v1135_v21 = vadd.f32 %v2752_v29, %v1125_v12  ;;  %v690_v23 = vmul.f32 %v2400_v38, %v154_v32  ;;  %v4829_v29 = vld [vmem:[#allocation45_spill] sm:$0xff] }
 0x1cf   :  { %v277_v31 = vsel %vm86_vm5, 0.0, %v269_v4  ;;  %v1141_v6 = vmul.f32 %v4826_v15, %v275_v0  ;;  %v1525_v28 = vadd.f32 %v2755_v7, %v1515_v63  ;;  %v1531_v14 = vmul.f32 %v4827_v53, %v275_v0  ;;  %v4830_v63 = vld [vmem:[#allocation42_spill] sm:$0xff] }
 0x1d0   :  { %v1080_v19 = vmul.f32 %v2403_v39, %v154_v32  ;;  %v2877_v26 = vmul.f32 %v4828_v30, %v2854_v61  ;;  %v1470_v48 = vmul.f32 %v2406_v40, %v154_v32  ;;  %v375_v27 = vadd.f32 %v4829_v29, %v365_v17  ;;  %v4831_v29 = vld [vmem:[#allocation43_spill] sm:$0xff] }
 0x1d1   :  { %v381_v56 = vmul.f32 %v4828_v30, %v2864_v52  ;;  %v1507_v4 = vadd.f32 %v2724_v10, %v1497_v62  ;;  %v304_v43 = vadd.f32 %v300_v44, %v2397_v37  ;;  %v357_v7 = vadd.f32 %v353_v16, %v347_v49 }
 0x1d2   :  { %v363_v0 = vmul.f32 %v4820_v20, %v277_v31  ;;  %v755_v12 = vadd.f32 %v751_v1, %v745_v46  ;;  %v694_v57 = vadd.f32 %v690_v23, %v2413_v41  ;;  %v737_v35 = vadd.f32 %v4830_v63, %v727_v11  ;;  %v4832_v11 = vld [vmem:[#allocation49_spill] sm:$0xff]  ;;  %v4833_v23 = vld [vmem:[#allocation44_spill] sm:$0xff] }
 0x1d3   :  { %v385_v58 = vadd.f32 %v381_v56, %v375_v27  ;;  %v1145_v32 = vadd.f32 %v1141_v6, %v1135_v21  ;;  %v2888_v61 = vadd.f32 %v1531_v14, %v1525_v28  ;;  %v1084_v17 = vadd.f32 %v1080_v19, %v2416_v42  ;;  %v285_v21 = vpop.permute.xlu1 %284 }
 0x1d4   :  { %v1127_v8 = vadd.f32 %v4831_v29, %v1117_v2  ;;  %v1474_v10 = vadd.f32 %v1470_v48, %v2433_v47  ;;  %v156_v16 = vsel %vm86_vm5, 0.0, %v147_v18  ;;  %v170_v62 = vsel %vm85_vm6, 0.0, %v159_v9  ;;  %v4834_v18 = vld [vmem:[#allocation50_spill] sm:$0xff]  ;;  %v4836_v48 = vld [vmem:[#allocation35_spill] sm:$0xff] }
 0x1d5   :  { %v2895_v20 = vmax.f32 %v385_v58, 0.0  ;;  %v367_v46 = vadd.f32 %v363_v0, %v357_v7  ;;  %v314_v44 = vadd.f32 %v4832_v11, %v304_v43  ;;  %v320_v49 = vmul.f32 %v2454_v54, %v170_v62  ;;  %v4837_v7 = vld [vmem:[#allocation46_spill] sm:$0xff] }
 0x1d6   :  { %v710_v1 = vmul.f32 %v2457_v55, %v170_v62  ;;  %v747_v2 = vadd.f32 %v2793_v60, %v737_v35  ;;  %v1517_v6 = vadd.f32 %v4833_v23, %v1507_v4  ;;  %v753_v28 = vmul.f32 %v4824_v51, %v277_v31  ;;  %v4841_v23 = vld [vmem:[#allocation73_spill] sm:$0xff] }
 0x1d7   :  { %v704_v58 = vadd.f32 %v4834_v18, %v694_v57  ;;  %510 = vrot.lane.b32.xlu1 %v2895_v20, %s4835_s3  ;;  %v1137_v14 = vadd.f32 %v2797_v13, %v1127_v8  ;;  %v1143_v19 = vmul.f32 %v4826_v15, %v277_v31  ;;  %v771_v27 = vmul.f32 %v4836_v48, %v2864_v52  ;;  %v4838_v13 = vld [vmem:[#allocation53_spill] sm:$0xff] }
 0x1d8   :  { %v324_v56 = vadd.f32 %v320_v49, %v314_v44  ;;  %v302_v43 = vmul.f32 %v2390_v36, %v156_v16  ;;  %v692_v35 = vmul.f32 %v2400_v38, %v156_v16  ;;  %v2916_v4 = vsel %vm85_vm6, 0.0, %v285_v21  ;;  %v4839_v44 = vld [vmem:[#allocation54_spill] sm:$0xff] }
 0x1d9   :  { %v714_v60 = vadd.f32 %v710_v1, %v704_v58  ;;  %v765_v0 = vadd.f32 %v4837_v7, %v755_v12  ;;  %v377_v8 = vadd.f32 %v4838_v13, %v367_v46  ;;  %v383_v57 = vmul.f32 %v4828_v30, %v2916_v4  ;;  %v4840_v12 = vld [vmem:[#allocation29_spill] sm:$0xff] }
 0x1da   :  { %v334_v9 = vadd.f32 %v2684_v45, %v324_v56  ;;  %v2924_v63 = vadd.f32 %v2803_v3, %v1517_v6  ;;  %v757_v36 = vadd.f32 %v753_v28, %v747_v2  ;;  %v2927_v38 = vmul.f32 %v4827_v53, %v277_v31  ;;  %v4842_v31 = vld [vmem:[#allocation51_spill] sm:$0xff]  ;;  %v4843_v28 = vld [vmem:[#allocation81_spill] sm:$0xff] }
 0x1db   :  { %v1082_v29 = vmul.f32 %v2403_v39, %v156_v16  ;;  %v775_v11 = vadd.f32 %v771_v27, %v765_v0  ;;  %v1100_v1 = vmul.f32 %v4840_v12, %v170_v62  ;;  %v387_v45 = vadd.f32 %v383_v57, %v377_v8  ;;  %v163_v27 = vpop.permute.xlu0 %162  ;;  %v4847_v0 = vld [vmem:[#allocation47_spill] sm:$0xff]  ;;  %v4849_v8 = vld [vmem:[#allocation64_spill] sm:$0xff] }
 0x1dc   :  { %v344_v49 = vadd.f32 %v4839_v44, %v334_v9  ;;  %v1147_v21 = vadd.f32 %v1143_v19, %v1137_v14  ;;  %v306_v46 = vadd.f32 %v302_v43, %v2397_v37  ;;  %v724_v18 = vadd.f32 %v4841_v23, %v714_v60  ;;  %v4844_v37 = vld [vmem:[#allocation36_spill] sm:$0xff]  ;;  %v4848_v9 = vld [vmem:[#allocation58_spill] sm:$0xff]  ;;  %v4850_v57 = vld [vmem:[#allocation55_spill] sm:$0xff] }
 0x1dd   :  { %v773_v3 = vmul.f32 %v4836_v48, %v2916_v4  ;;  %v696_v2 = vadd.f32 %v692_v35, %v2413_v41  ;;  %v1094_v6 = vadd.f32 %v4842_v31, %v1084_v17  ;;  %v2939_v58 = vmax.f32 %v387_v45, 0.0  ;;  %v4845_v43 = vld [vmem:[#allocation56_spill] sm:$0xff] }
 0x1de   :  { %v354_v39 = vadd.f32 %v4843_v28, %v344_v49  ;;  %v1086_v56 = vadd.f32 %v1082_v29, %v2416_v42  ;;  %v1472_v14 = vmul.f32 %v2406_v40, %v156_v16  ;;  %v1161_v19 = vmul.f32 %v4844_v37, %v2864_v52  ;;  %v4851_v29 = vld [vmem:[#allocation65_spill] sm:$0xff]  ;;  %v4852_v49 = vld [vmem:[#allocation52_spill] sm:$0xff]  ;;  %v4855_v28 = vld [vmem:[#allocation74_spill] sm:$0xff] }
 0x1df   :  { %v767_v60 = vadd.f32 %v4845_v43, %v757_v36  ;;  %v2946_v7 = vmax.f32 %v775_v11, 0.0  ;;  %v1155_v41 = vadd.f32 %v4847_v0, %v1145_v32  ;;  %v1104_v35 = vadd.f32 %v1100_v1, %v1094_v6  ;;  %516 = vrot.lane.b32.xlu1 %v2939_v58, %s4835_s3  ;;  %v4854_v6 = vld [vmem:[#allocation83_spill] sm:$0xff] }
 0x1e0   :  { %v364_v17 = vadd.f32 %v2837_v50, %v354_v39  ;;  %v734_v13 = vadd.f32 %v4848_v9, %v724_v18  ;;  %v316_v40 = vadd.f32 %v4849_v8, %v306_v46  ;;  %v172_v16 = vsel %vm85_vm6, 0.0, %v163_v27  ;;  %v4853_v18 = vld [vmem:[#allocation66_spill] sm:$0xff] }
 0x1e1   :  { %4846 = vst [vmem:[#allocation25_spill] sm:$0xff] %v2946_v7  ;;  %v777_v42 = vadd.f32 %v773_v3, %v767_v60  ;;  %v706_v11 = vadd.f32 %v4851_v29, %v696_v2  ;;  %v322_v32 = vmul.f32 %v2454_v54, %v172_v16  ;;  %v712_v50 = vmul.f32 %v2457_v55, %v172_v16  ;;  %v4858_v27 = vld [vmem:[#allocation78_spill] sm:$0xff] }
 0x1e2   :  { %v374_v36 = vadd.f32 %v4850_v57, %v364_v17  ;;  %v1165_v44 = vadd.f32 %v1161_v19, %v1155_v41  ;;  %v1484_v1 = vadd.f32 %v4852_v49, %v1474_v10  ;;  %v1490_v45 = vmul.f32 %v2471_v59, %v170_v62  ;;  %v4857_v62 = vld [vmem:[#allocation77_spill] sm:$0xff] }
 0x1e3   :  { %v1102_v23 = vmul.f32 %v4840_v12, %v172_v16  ;;  %v1096_v46 = vadd.f32 %v4853_v18, %v1086_v56  ;;  %v326_v3 = vadd.f32 %v322_v32, %v316_v40  ;;  %v716_v31 = vadd.f32 %v712_v50, %v706_v11  ;;  %900 = vrot.lane.b32.xlu1 %v2946_v7, %s4835_s3  ;;  %v4860_v41 = vld [vmem:[#allocation37_spill] sm:$0xff]  ;;  %v4863_v40 = vld [vmem:[#allocation67_spill] sm:$0xff] }
 0x1e4   :  { %v384_v2 = vadd.f32 %v2877_v26, %v374_v36  ;;  %v744_v54 = vadd.f32 %v4854_v6, %v734_v13  ;;  %v1114_v55 = vadd.f32 %v4855_v28, %v1104_v35  ;;  %v2969_v39 = vmax.f32 %v777_v42, 0.0  ;;  %v4859_v26 = vld [vmem:[#allocation48_spill] sm:$0xff]  ;;  %v4861_v35 = vld [vmem:[#allocation57_spill] sm:$0xff]  ;;  %v4862_v13 = vld [vmem:[#allocation82_spill] sm:$0xff] }
 0x1e5   :  { %v1163_v10 = vmul.f32 %v4844_v37, %v2916_v4  ;;  %v336_v12 = vadd.f32 %v4857_v62, %v326_v3  ;;  %v726_v56 = vadd.f32 %v4858_v27, %v716_v31  ;;  %v1106_v19 = vadd.f32 %v1102_v23, %v1096_v46  ;;  %v4864_v36 = vld [vmem:[#allocation70_spill] sm:$0xff]  ;;  %v4867_v50 = vld [vmem:[#allocation79_spill] sm:$0xff]  ;;  %v4874_v28 = vld [vmem:[#allocation68_spill] sm:$0xff] }
 0x1e6   :  { %4856 = vst [vmem:[#allocation40_spill] sm:$0xff] %v2969_v39  ;;  %v2975_v43 = vmax.f32 %v384_v2, 0.0  ;;  %v1476_v60 = vadd.f32 %v1472_v14, %v2433_v47  ;;  %v1545_v0 = vadd.f32 %v4859_v26, %v2888_v61  ;;  %v1551_v17 = vmul.f32 %v4860_v41, %v2864_v52  ;;  %v4866_v52 = vld [vmem:[#allocation60_spill] sm:$0xff]  ;;  %v4869_v23 = vld [vmem:[#allocation23_spill] sm:$0xff] }
 0x1e7   :  { %v1157_v9 = vadd.f32 %v4861_v35, %v1147_v21  ;;  %v2986_v42 = vsel %vm85_vm6, 0.0, %v4862_v13  ;;  %v1494_v8 = vadd.f32 %v1490_v45, %v1484_v1  ;;  %v346_v57 = vadd.f32 %v4863_v40, %v336_v12  ;;  %906 = vrot.lane.b32.xlu1 %v2969_v39, %s4835_s3  ;;  %v4868_v45 = vld [vmem:[#allocation80_spill] sm:$0xff]  ;;  %v4876_v12 = vld [vmem:[#allocation30_spill] sm:$0xff]  ;;  %v4877_v27 = vld [vmem:[#allocation31_spill] sm:$0xff] }
 0x1e8   :  { %v736_v29 = vadd.f32 %v4864_v36, %v726_v56  ;;  %507 = vrot.lane.b32.xlu0 %v2975_v43, %s4835_s3  ;;  %v2994_v47 = vmax.f32 %v1165_v44, 0.0  ;;  %v754_v61 = vadd.f32 %v2845_v33, %v744_v54  ;;  %v1124_v21 = vadd.f32 %v4866_v52, %v1114_v55  ;;  %v4875_v55 = vld [vmem:[#allocation72_spill] sm:$0xff] }
 0x1e9   :  { %v1167_v14 = vadd.f32 %v1163_v10, %v1157_v9  ;;  %v356_v11 = vadd.f32 %v2827_v22, %v346_v57  ;;  %v1116_v49 = vadd.f32 %v4867_v50, %v1106_v19  ;;  %v1492_v1 = vmul.f32 %v2471_v59, %v172_v16  ;;  %v4870_v22 = vld [vmem:[#allocation75_spill] sm:$0xff]  ;;  %v1963_v26 = vld [vmem:[#allocation10 + $0x10] sm:$0xff]  ;;  %v4881_v9 = vld [vmem:[#allocation22_spill] sm:$0xff] }
 0x1ea   :  { %4865 = vst [vmem:[#allocation32_spill] sm:$0xff] %v2994_v47  ;;  %v746_v32 = vadd.f32 %v2831_v34, %v736_v29  ;;  %v1130_v18 = vmul.f32 %v4869_v23, %v4868_v45  ;;  %v752_v44 = vmul.f32 %v4824_v51, %v2820_v5  ;;  %v382_v33 = vmul.f32 %v4828_v30, %v2986_v42  ;;  %v4871_v34 = vld [vmem:[#allocation69_spill] sm:$0xff]  ;;  %v4872_v59 = vld [vmem:[#allocation59_spill] sm:$0xff]  ;;  %v4880_v35 = vld [vmem:[#allocation76_spill] sm:$0xff] }
 0x1eb   :  { %v1537_v46 = vadd.f32 %v2927_v38, %v2924_v63  ;;  %v1555_v3 = vadd.f32 %v1551_v17, %v1545_v0  ;;  %v1504_v31 = vadd.f32 %v4870_v22, %v1494_v8  ;;  %v1486_v2 = vadd.f32 %v4871_v34, %v1476_v60  ;;  %1290 = vrot.lane.b32.xlu1 %v2994_v47, %s4835_s3  ;;  %v4878_v19 = vld [vmem:[#allocation63_spill] sm:$0xff]  ;;  %v4879_v0 = vld [vmem:[#allocation34_spill] sm:$0xff]  ;;  %v4882_v13 = vld [vmem:[#allocation84_spill] sm:$0xff] }
 0x1ec   :  { %v366_v6 = vadd.f32 %v2849_v25, %v356_v11  ;;  %v764_v16 = vadd.f32 %v4872_v59, %v754_v61  ;;  %v1134_v54 = vadd.f32 %v1130_v18, %v1124_v21  ;;  %v3016_v51 = vmax.f32 %v1167_v14, 0.0  ;;  %v4884_v29 = vld [vmem:[#allocation62_spill] sm:$0xff]  ;;  %v4885_v14 = vld [vmem:[#allocation71_spill] sm:$0xff] }
 0x1ed   :  { %v1553_v30 = vmul.f32 %v4860_v41, %v2916_v4  ;;  %v756_v38 = vadd.f32 %v752_v44, %v746_v32  ;;  %v1126_v10 = vadd.f32 %v4875_v55, %v1116_v49  ;;  %v1496_v62 = vadd.f32 %v1492_v1, %v1486_v2  ;;  %v4887_v1 = vld [vmem:[#allocation24_spill] sm:$0xff]  ;;  %v4891_v34 = vld [vmem:[#allocation38_spill] sm:$0xff] }
 0x1ee   :  { %4873 = vst [vmem:[#allocation41_spill] sm:$0xff] %v3016_v51  ;;  %v376_v63 = vadd.f32 %v4874_v28, %v366_v6  ;;  %v1140_v25 = vmul.f32 %v4826_v15, %v4876_v12  ;;  %v770_v56 = vmul.f32 %v4836_v48, %v4877_v27  ;;  %v1547_v60 = vadd.f32 %v4878_v19, %v1537_v46  ;;  %v4893_v28 = vld [vmem:[#allocation18_spill] sm:$0xff] }
 0x1ef   :  { %v1512_v17 = vmul.f32 %v1963_v26, %v4879_v0  ;;  %v1502_v4 = vmul.f32 %v4881_v9, %v4880_v35  ;;  %v1132_v8 = vmul.f32 %v4869_v23, %v4882_v13  ;;  %v3032_v40 = vmax.f32 %v1555_v3, 0.0  ;;  %1296 = vrot.lane.b32.xlu1 %v3016_v51, %s4835_s3 }
 0x1f0   :  { %v386_v57 = vadd.f32 %v382_v33, %v376_v63  ;;  %v1144_v36 = vadd.f32 %v1140_v25, %v1134_v54  ;;  %v1514_v61 = vadd.f32 %v4884_v29, %v1504_v31  ;;  %v1557_v52 = vadd.f32 %v1553_v30, %v1547_v60  ;;  %v4888_v33 = vld [vmem:[#allocation61_spill] sm:$0xff]  ;;  %v4894_v63 = vld [vmem:[#allocation39_spill] sm:$0xff] }
 0x1f1   :  { %4883 = vst [vmem:[#allocation26_spill] sm:$0xff] %v3032_v40  ;;  %v774_v21 = vadd.f32 %v770_v56, %v764_v16  ;;  %v766_v11 = vadd.f32 %v4885_v14, %v756_v38  ;;  %v1136_v32 = vadd.f32 %v1132_v8, %v1126_v10  ;;  %v1506_v50 = vadd.f32 %v1502_v4, %v1496_v62  ;;  %v4890_v31 = vld [vmem:[#allocation19_spill] sm:$0xff] }
 0x1f2   :  { %v3038_v49 = vmax.f32 %v386_v57, 0.0  ;;  %v1520_v23 = vmul.f32 %v4887_v1, %v4868_v45  ;;  %v1142_v18 = vmul.f32 %v4826_v15, %v2820_v5  ;;  %v772_v44 = vmul.f32 %v4836_v48, %v2986_v42 }
 0x1f3   :  { %1680 = vrot.lane.b32.xlu1 %v3032_v40, %s4835_s3  ;;  %v1154_v46 = vadd.f32 %v4888_v33, %v1144_v36  ;;  %v3051_v22 = vmax.f32 %v1557_v52, 0.0  ;;  %v1152_v45 = vmul.f32 %v4891_v34, %v4890_v31  ;;  %v1516_v6 = vadd.f32 %v1512_v17, %v1506_v50 }
 0x1f4   :  { %4886 = vst [vmem:[#allocation27_spill] sm:$0xff] %v3038_v49  ;;  %513 = vrot.lane.b32.xlu0 %v3038_v49, %s4835_s3  ;;  %v1524_v3 = vadd.f32 %v1520_v23, %v1514_v61  ;;  %v1146_v2 = vadd.f32 %v1142_v18, %v1136_v32  ;;  %v3055_v15 = vmax.f32 %v774_v21, 0.0  ;;  %v776_v59 = vadd.f32 %v772_v44, %v766_v11 }
 0x1f5   :  { %4889 = vst [vmem:[#allocation28_spill] sm:$0xff] %v3051_v22  ;;  %v1530_v48 = vmul.f32 %v4827_v53, %v4876_v12  ;;  %v392_v16 = vrot.slane %v2975_v43, 7  ;;  %v1522_v54 = vmul.f32 %v4887_v1, %v4882_v13  ;;  %v1160_v30 = vmul.f32 %v4844_v37, %v4877_v27 }
 0x1f6   :  { %4892 = vst [vmem:[#allocation33_spill] sm:$0xff] %v3055_v15  ;;  %v1540_v38 = vmul.f32 %v4894_v63, %v4893_v28  ;;  %v394_v10 = vrot.slane %v2895_v20, 7  ;;  %v1156_v62 = vadd.f32 %v1152_v45, %v1146_v2  ;;  %v3071_v25 = vmax.f32 %v776_v59, 0.0 }
 0x1f7   :  { %1686 = vrot.lane.b32.xlu1 %v3051_v22, %s4835_s3  ;;  %v1534_v55 = vadd.f32 %v1530_v48, %v1524_v3  ;;  %v1526_v12 = vadd.f32 %v1522_v54, %v1516_v6  ;;  %v1164_v56 = vadd.f32 %v1160_v30, %v1154_v46  ;;  %v393_v26 = vrot.slane %v3038_v49, 7 }
 0x1f8   :  { %897 = vrot.lane.b32.xlu0 %v3055_v15, %s4835_s3  ;;  %4895 = vst [vmem:[#allocation45_spill] sm:$0xff] %v3071_v25  ;;  %v3079_v60 = vsel %vm91_vm0, %v392_v16, %v394_v10  ;;  %v1532_v0 = vmul.f32 %v4827_v53, %v2820_v5  ;;  %v1162_v17 = vmul.f32 %v4844_v37, %v2986_v42  ;;  %v395_v9 = vrot.slane %v2939_v58, 7 }
 0x1f9   :  { %v1542_v35 = vmul.f32 %v4894_v63, %v4890_v31  ;;  %v1544_v4 = vadd.f32 %v1540_v38, %v1534_v55  ;;  %v3093_v8 = vmax.f32 %v1164_v56, 0.0  ;;  %v782_v53 = vrot.slane %v3055_v15, 7 }
 0x1fa   :  { %v1536_v13 = vadd.f32 %v1532_v0, %v1526_v12  ;;  %v1166_v57 = vadd.f32 %v1162_v17, %v1156_v62  ;;  %v3101_v5 = vsel %vm91_vm0, %v393_v26, %v395_v9  ;;  %v1550_v37 = vmul.f32 %v4860_v41, %v4877_v27 }
 0x1fb   :  { %420 = vrot.lane.b32.xlu1 %v3079_v60, %s4835_s3  ;;  %4897 = vst [vmem:[#allocation42_spill] sm:$0xff] %v3093_v8  ;;  %v784_v36 = vrot.slane %v2946_v7, 7  ;;  %v783_v27 = vrot.slane %v3071_v25, 7  ;;  %v1552_v14 = vmul.f32 %v4860_v41, %v2986_v42  ;;  %v785_v11 = vrot.slane %v2969_v39, 7 }
 0x1fc   :  { %903 = vrot.lane.b32.xlu0 %v3071_v25, %s4835_s3  ;;  %v1546_v29 = vadd.f32 %v1542_v35, %v1536_v13  ;;  %v3111_v61 = vmax.f32 %v1166_v57, 0.0  ;;  %v1554_v52 = vadd.f32 %v1550_v37, %v1544_v4  ;;  %v1172_v41 = vrot.slane %v3093_v8, 7 }
 0x1fd   :  { %v3119_v21 = vsel %vm91_vm0, %v782_v53, %v784_v36  ;;  %v3137_v1 = vsel %vm91_vm0, %v783_v27, %v785_v11  ;;  %v1174_v42 = vrot.slane %v2994_v47, 7  ;;  %v404_v18 = vrot.slane %v2975_v43, 1 }
 0x1fe   :  { %4898 = vst [vmem:[#allocation43_spill] sm:$0xff] %v3111_v61  ;;  %v3129_v32 = vmax.f32 %v1554_v52, 0.0  ;;  %v1556_v50 = vadd.f32 %v1552_v14, %v1546_v29  ;;  %v1173_v33 = vrot.slane %v3111_v61, 7  ;;  %v406_v46 = vrot.slane %v2895_v20, 1 }
 0x1ff   :  { %426 = vrot.lane.b32.xlu1 %v3101_v5, %s4835_s3  ;;  %v3154_v44 = vsel %vm91_vm0, %v1172_v41, %v1174_v42  ;;  %v1175_v3 = vrot.slane %v3016_v51, 7  ;;  %v405_v34 = vrot.slane %v3038_v49, 1  ;;  %v407_v6 = vrot.slane %v2939_v58, 1 }
 0x200   :  { %1287 = vrot.lane.b32.xlu0 %v3093_v8, %s4835_s3  ;;  %4899 = vst [vmem:[#allocation49_spill] sm:$0xff] %v3129_v32  ;;  %v3145_v23 = vmax.f32 %v1556_v50, 0.0  ;;  %v3165_v31 = vsel %vm104_vm2, %v404_v18, %v406_v46  ;;  %v1562_v2 = vrot.slane %v3129_v32, 7  ;;  %v1564_v59 = vrot.slane %v3032_v40, 7 }
 0x201   :  { %v3174_v45 = vsel %vm91_vm0, %v1173_v33, %v1175_v3  ;;  %v3185_v48 = vsel %vm104_vm2, %v405_v34, %v407_v6  ;;  %v794_v54 = vrot.slane %v3055_v15, 1  ;;  %v796_v63 = vrot.slane %v2946_v7, 1 }
 0x202   :  { %4900 = vst [vmem:[#allocation44_spill] sm:$0xff] %v3145_v23  ;;  %v3194_v30 = vsel %vm91_vm0, %v1562_v2, %v1564_v59  ;;  %v4710_v28 = vrot.slane %v3145_v23, 7  ;;  %v4709_v38 = vrot.slane %v3051_v22, 7  ;;  %v795_v62 = vrot.slane %v3071_v25, 1 }
 0x203   :  { %810 = vrot.lane.b32.xlu1 %v3119_v21, %s4835_s3  ;;  %v3205_v55 = vsel %vm104_vm2, %v794_v54, %v796_v63  ;;  %v410_v56 = vsel %vm104_vm2, %v406_v46, %v404_v18  ;;  %v797_v0 = vrot.slane %v2969_v39, 1  ;;  %v1184_v35 = vrot.slane %v3093_v8, 1 }
 0x204   :  { %1293 = vrot.lane.b32.xlu0 %v3111_v61, %s4835_s3  ;;  %v3214_v12 = vsel %vm91_vm0, %v4710_v28, %v4709_v38  ;;  %v3230_v13 = vsel %vm82_vm3, 0.0, %v410_v56  ;;  %v411_v57 = vsel %vm104_vm2, %v407_v6, %v405_v34  ;;  %v1186_v37 = vrot.slane %v2994_v47, 1 }
 0x205   :  { %v3225_v17 = vsel %vm104_vm2, %v795_v62, %v797_v0  ;;  %4902 = vst [vmem:[#allocation50_spill] sm:$0xff] %v3230_v13  ;;  %v1185_v52 = vrot.slane %v3111_v61, 1  ;;  %v3246_v14 = vsel %vm82_vm3, 0.0, %v411_v57  ;;  %v800_v50 = vsel %vm104_vm2, %v796_v63, %v794_v54 }
 0x206   :  { %v3241_v29 = vsel %vm104_vm2, %v1184_v35, %v1186_v37  ;;  %4903 = vst [vmem:[#allocation35_spill] sm:$0xff] %v3246_v14  ;;  %v1187_v18 = vrot.slane %v3016_v51, 1  ;;  %v1574_v34 = vrot.slane %v3129_v32, 1  ;;  %v3262_v6 = vsel %vm82_vm3, 0.0, %v800_v50 }
 0x207   :  { %816 = vrot.lane.b32.xlu1 %v3137_v1, %s4835_s3  ;;  %v801_v54 = vsel %vm104_vm2, %v797_v0, %v795_v62  ;;  %v1576_v63 = vrot.slane %v3032_v40, 1  ;;  %v1575_v57 = vrot.slane %v3145_v23, 1  ;;  %v1190_v62 = vsel %vm104_vm2, %v1186_v37, %v1184_v35 }
 0x208   :  { %1677 = vrot.lane.b32.xlu0 %v3129_v32, %s4835_s3  ;;  %v3257_v46 = vsel %vm104_vm2, %v1185_v52, %v1187_v18  ;;  %v3278_v50 = vsel %vm82_vm3, 0.0, %v801_v54  ;;  %v1577_v0 = vrot.slane %v3051_v22, 1  ;;  %v3293_v28 = vsel %vm82_vm3, 0.0, %v1190_v62 }
 0x209   :  { %v3273_v56 = vsel %vm104_vm2, %v1574_v34, %v1576_v63  ;;  %v398_v35 = vsel %vm91_vm0, %v394_v10, %v392_v16  ;;  %v1191_v37 = vsel %vm104_vm2, %v1187_v18, %v1185_v52  ;;  %v399_v16 = vsel %vm91_vm0, %v395_v9, %v393_v26 }
 0x20a   :  { %4904 = vst [vmem:[#allocation46_spill] sm:$0xff] %v3273_v56  ;;  %v3289_v38 = vsel %vm104_vm2, %v1575_v57, %v1577_v0  ;;  %v3309_v54 = vsel %vm83_vm1, 0.0, %v398_v35  ;;  %v3313_v62 = vsel %vm82_vm3, 0.0, %v1191_v37  ;;  %v1580_v10 = vsel %vm104_vm2, %v1576_v63, %v1574_v34 }
 0x20b   :  { %1200 = vrot.lane.b32.xlu1 %v3154_v44, %s4835_s3  ;;  %4905 = vst [vmem:[#allocation53_spill] sm:$0xff] %v3289_v38  ;;  %v3329_v52 = vsel %vm83_vm1, 0.0, %v399_v16  ;;  %v3333_v18 = vsel %vm82_vm3, 0.0, %v1580_v10  ;;  %v788_v26 = vsel %vm91_vm0, %v784_v36, %v782_v53  ;;  %v1581_v9 = vsel %vm104_vm2, %v1577_v0, %v1575_v57 }
 0x20c   :  { %1683 = vrot.lane.b32.xlu0 %v3145_v23, %s4835_s3  ;;  %v3349_v34 = vsel %vm83_vm1, 0.0, %v788_v26  ;;  %v3353_v63 = vsel %vm82_vm3, 0.0, %v1581_v9  ;;  %v789_v53 = vsel %vm91_vm0, %v785_v11, %v783_v27  ;;  %v1178_v4 = vsel %vm91_vm0, %v1174_v42, %v1172_v41 }
 0x20d   :  { %v3367_v36 = vsel %vm83_vm1, 0.0, %v789_v53  ;;  %v3379_v27 = vsel %vm83_vm1, 0.0, %v1178_v4  ;;  %v1179_v11 = vsel %vm91_vm0, %v1175_v3, %v1173_v33  ;;  %v1568_v41 = vsel %vm91_vm0, %v1564_v59, %v1562_v2 }
 0x20e   :  { %v3391_v57 = vsel %vm83_vm1, 0.0, %v1179_v11  ;;  %v3403_v42 = vsel %vm83_vm1, 0.0, %v1568_v41  ;;  %v4907_v33 = vrot.slane %v3145_v23, 7  ;;  %v4908_v3 = vrot.slane %v3051_v22, 7 }
 0x20f   :  { %1206 = vrot.lane.b32.xlu1 %v3174_v45, %s4835_s3  ;;  %4906 = vst [vmem:[#allocation54_spill] sm:$0xff] %v3403_v42 }
 0x210   :  { %597 = vrot.lane.b32.xlu0 %v3165_v31, %s4835_s3  ;;  %v1569_v0 = vsel %vm91_vm0, %v4908_v3, %v4907_v33 }
 0x211   :  { %v3417_v2 = vsel %vm83_vm1, 0.0, %v1569_v0 }
 0x212   :  { %4909 = vst [vmem:[#allocation29_spill] sm:$0xff] %v3417_v2 }
 0x213   :  { %1590 = vrot.lane.b32.xlu1 %v3194_v30, %s4835_s3 }
 0x214   :  { %603 = vrot.lane.b32.xlu0 %v3185_v48, %s4835_s3 }
 0x217   :  { %1596 = vrot.lane.b32.xlu1 %v3214_v12, %s4835_s3 }
 0x218   :  { %987 = vrot.lane.b32.xlu0 %v3205_v55, %s4835_s3 }
 0x21b   :  { %600 = vrot.lane.b32.xlu1 %v3230_v13, %s4835_s3 }
 0x21c   :  { %993 = vrot.lane.b32.xlu0 %v3225_v17, %s4835_s3 }
 0x21f   :  { %606 = vrot.lane.b32.xlu1 %v3246_v14, %s4835_s3 }
 0x220   :  { %1377 = vrot.lane.b32.xlu0 %v3241_v29, %s4835_s3 }
 0x223   :  { %990 = vrot.lane.b32.xlu1 %v3262_v6, %s4835_s3 }
 0x224   :  { %1383 = vrot.lane.b32.xlu0 %v3257_v46, %s4835_s3 }
 0x227   :  { %996 = vrot.lane.b32.xlu1 %v3278_v50, %s4835_s3 }
 0x228   :  { %1767 = vrot.lane.b32.xlu0 %v3273_v56, %s4835_s3 }
 0x22b   :  { %1380 = vrot.lane.b32.xlu1 %v3293_v28, %s4835_s3 }
 0x22c   :  { %1773 = vrot.lane.b32.xlu0 %v3289_v38, %s4835_s3 }
 0x22f   :  { %1386 = vrot.lane.b32.xlu1 %v3313_v62, %s4835_s3 }
 0x230   :  { %417 = vrot.lane.b32.xlu0 %v3309_v54, %s4835_s3 }
 0x233   :  { %1770 = vrot.lane.b32.xlu1 %v3333_v18, %s4835_s3 }
 0x234   :  { %423 = vrot.lane.b32.xlu0 %v3329_v52, %s4835_s3 }
 0x237   :  { %1776 = vrot.lane.b32.xlu1 %v3353_v63, %s4835_s3 }
 0x238   :  { %807 = vrot.lane.b32.xlu0 %v3349_v34, %s4835_s3 }
 0x23c   :  { %813 = vrot.lane.b32.xlu0 %v3367_v36, %s4835_s3 }
 0x240   :  { %1197 = vrot.lane.b32.xlu0 %v3379_v27, %s4835_s3 }
 0x244   :  { %1203 = vrot.lane.b32.xlu0 %v3391_v57, %s4835_s3 }
 0x248   :  { %1587 = vrot.lane.b32.xlu0 %v3403_v42, %s4835_s3 }
 0x249   :  { %v511_v35 = vpop.permute.xlu1 %510 }
 0x24a   :  { %v512_v37 = vsel %vm113_vm4, %v511_v35, %v2895_v20 }
 0x24b   :  { %521 = vrot.lane.b32.xlu1 %v512_v37, %s4835_s3 }
 0x24c   :  { %1593 = vrot.lane.b32.xlu0 %v3417_v2, %s4835_s3 }
 0x251   :  { %v517_v59 = vpop.permute.xlu1 %516 }
 0x252   :  { %v518_v16 = vsel %vm113_vm4, %v517_v59, %v2939_v58 }
 0x253   :  { %525 = vrot.lane.b32.xlu1 %v518_v16, %s4835_s3 }
 0x255   :  { %v901_v10 = vpop.permute.xlu1 %900 }
 0x256   :  { %v902_v26 = vsel %vm113_vm4, %v901_v10, %v2946_v7 }
 0x257   :  { %911 = vrot.lane.b32.xlu1 %v902_v26, %s4835_s3 }
 0x259   :  { %v907_v9 = vpop.permute.xlu1 %906 }
 0x25a   :  { %v508_v19 = vpop.permute.xlu0 %507  ;;  %v908_v53 = vsel %vm113_vm4, %v907_v9, %v2969_v39 }
 0x25b   :  { %v509_v4 = vsel %vm113_vm4, %v508_v19, %v2975_v43  ;;  %915 = vrot.lane.b32.xlu1 %v908_v53, %s4835_s3 }
 0x25c   :  { %519 = vrot.lane.b32.xlu0 %v509_v4, %s4835_s3 }
 0x25d   :  { %v1291_v11 = vpop.permute.xlu1 %1290 }
 0x25e   :  { %v1292_v41 = vsel %vm113_vm4, %v1291_v11, %v2994_v47 }
 0x25f   :  { %1301 = vrot.lane.b32.xlu1 %v1292_v41, %s4835_s3 }
 0x261   :  { %v1297_v33 = vpop.permute.xlu1 %1296 }
 0x262   :  { %v1298_v3 = vsel %vm113_vm4, %v1297_v33, %v3016_v51 }
 0x263   :  { %1305 = vrot.lane.b32.xlu1 %v1298_v3, %s4835_s3 }
 0x265   :  { %v1681_v35 = vpop.permute.xlu1 %1680 }
 0x266   :  { %v514_v0 = vpop.permute.xlu0 %513  ;;  %v1682_v59 = vsel %vm113_vm4, %v1681_v35, %v3032_v40 }
 0x267   :  { %v515_v37 = vsel %vm113_vm4, %v514_v0, %v3038_v49  ;;  %1691 = vrot.lane.b32.xlu1 %v1682_v59, %s4835_s3 }
 0x268   :  { %523 = vrot.lane.b32.xlu0 %v515_v37, %s4835_s3 }
 0x269   :  { %v1687_v10 = vpop.permute.xlu1 %1686 }
 0x26a   :  { %v898_v16 = vpop.permute.xlu0 %897  ;;  %v1688_v19 = vsel %vm113_vm4, %v1687_v10, %v3051_v22 }
 0x26b   :  { %v899_v26 = vsel %vm113_vm4, %v898_v16, %v3055_v15  ;;  %1695 = vrot.lane.b32.xlu1 %v1688_v19, %s4835_s3 }
 0x26c   :  { %909 = vrot.lane.b32.xlu0 %v899_v26, %s4835_s3 }
 0x26d   :  { %v421_v53 = vpop.permute.xlu1 %420 }
 0x26e   :  { %v904_v9 = vpop.permute.xlu0 %903  ;;  %v422_v11 = vsel %vm113_vm4, %v421_v53, %v3079_v60 }
 0x26f   :  { %v905_v4 = vsel %vm113_vm4, %v904_v9, %v3071_v25  ;;  %431 = vrot.lane.b32.xlu1 %v422_v11, %s4835_s3 }
 0x270   :  { %913 = vrot.lane.b32.xlu0 %v905_v4, %s4835_s3 }
 0x271   :  { %v427_v33 = vpop.permute.xlu1 %426 }
 0x272   :  { %v1288_v41 = vpop.permute.xlu0 %1287  ;;  %v428_v0 = vsel %vm113_vm4, %v427_v33, %v3101_v5 }
 0x273   :  { %v1289_v3 = vsel %vm113_vm4, %v1288_v41, %v3093_v8  ;;  %435 = vrot.lane.b32.xlu1 %v428_v0, %s4835_s3 }
 0x274   :  { %1299 = vrot.lane.b32.xlu0 %v1289_v3, %s4835_s3 }
 0x275   :  { %v811_v37 = vpop.permute.xlu1 %810 }
 0x276   :  { %v1294_v35 = vpop.permute.xlu0 %1293  ;;  %v812_v16 = vsel %vm113_vm4, %v811_v37, %v3119_v21 }
 0x277   :  { %v1295_v59 = vsel %vm113_vm4, %v1294_v35, %v3111_v61  ;;  %821 = vrot.lane.b32.xlu1 %v812_v16, %s4835_s3 }
 0x278   :  { %1303 = vrot.lane.b32.xlu0 %v1295_v59, %s4835_s3 }
 0x279   :  { %v817_v26 = vpop.permute.xlu1 %816 }
 0x27a   :  { %v1678_v10 = vpop.permute.xlu0 %1677  ;;  %v818_v9 = vsel %vm113_vm4, %v817_v26, %v3137_v1 }
 0x27b   :  { %v1679_v19 = vsel %vm113_vm4, %v1678_v10, %v3129_v32  ;;  %825 = vrot.lane.b32.xlu1 %v818_v9, %s4835_s3 }
 0x27c   :  { %1689 = vrot.lane.b32.xlu0 %v1679_v19, %s4835_s3 }
 0x27d   :  { %v1201_v4 = vpop.permute.xlu1 %1200 }
 0x27e   :  { %v1684_v53 = vpop.permute.xlu0 %1683  ;;  %v1202_v41 = vsel %vm113_vm4, %v1201_v4, %v3154_v44 }
 0x27f   :  { %v1685_v11 = vsel %vm113_vm4, %v1684_v53, %v3145_v23  ;;  %1211 = vrot.lane.b32.xlu1 %v1202_v41, %s4835_s3 }
 0x280   :  { %1693 = vrot.lane.b32.xlu0 %v1685_v11, %s4835_s3 }
 0x281   :  { %v1207_v3 = vpop.permute.xlu1 %1206 }
 0x282   :  { %v598_v33 = vpop.permute.xlu0 %597  ;;  %v1208_v35 = vsel %vm113_vm4, %v1207_v3, %v3174_v45 }
 0x283   :  { %v599_v0 = vsel %vm113_vm4, %v598_v33, %v3165_v31  ;;  %1215 = vrot.lane.b32.xlu1 %v1208_v35, %s4835_s3 }
 0x284   :  { %609 = vrot.lane.b32.xlu0 %v599_v0, %s4835_s3 }
 0x285   :  { %v1591_v59 = vpop.permute.xlu1 %1590 }
 0x286   :  { %v604_v37 = vpop.permute.xlu0 %603  ;;  %v1592_v10 = vsel %vm113_vm4, %v1591_v59, %v3194_v30 }
 0x287   :  { %v605_v16 = vsel %vm113_vm4, %v604_v37, %v3185_v48  ;;  %1601 = vrot.lane.b32.xlu1 %v1592_v10, %s4835_s3 }
 0x288   :  { %613 = vrot.lane.b32.xlu0 %v605_v16, %s4835_s3 }
 0x289   :  { %v1597_v19 = vpop.permute.xlu1 %1596 }
 0x28a   :  { %v988_v26 = vpop.permute.xlu0 %987  ;;  %v1598_v53 = vsel %vm113_vm4, %v1597_v19, %v3214_v12 }
 0x28b   :  { %v989_v9 = vsel %vm113_vm4, %v988_v26, %v3205_v55  ;;  %1605 = vrot.lane.b32.xlu1 %v1598_v53, %s4835_s3 }
 0x28c   :  { %999 = vrot.lane.b32.xlu0 %v989_v9, %s4835_s3 }
 0x28d   :  { %v601_v11 = vpop.permute.xlu1 %600 }
 0x28e   :  { %v994_v4 = vpop.permute.xlu0 %993  ;;  %v602_v33 = vsel %vm113_vm4, %v601_v11, %v3230_v13 }
 0x28f   :  { %v995_v41 = vsel %vm113_vm4, %v994_v4, %v3225_v17  ;;  %611 = vrot.lane.b32.xlu1 %v602_v33, %s4835_s3 }
 0x290   :  { %1003 = vrot.lane.b32.xlu0 %v995_v41, %s4835_s3 }
 0x291   :  { %v607_v0 = vpop.permute.xlu1 %606 }
 0x292   :  { %v1378_v3 = vpop.permute.xlu0 %1377  ;;  %v608_v37 = vsel %vm113_vm4, %v607_v0, %v3246_v14 }
 0x293   :  { %v1379_v35 = vsel %vm113_vm4, %v1378_v3, %v3241_v29  ;;  %615 = vrot.lane.b32.xlu1 %v608_v37, %s4835_s3 }
 0x294   :  { %1389 = vrot.lane.b32.xlu0 %v1379_v35, %s4835_s3 }
 0x295   :  { %v991_v16 = vpop.permute.xlu1 %990 }
 0x296   :  { %v1384_v59 = vpop.permute.xlu0 %1383  ;;  %v992_v26 = vsel %vm113_vm4, %v991_v16, %v3262_v6 }
 0x297   :  { %v1385_v10 = vsel %vm113_vm4, %v1384_v59, %v3257_v46  ;;  %1001 = vrot.lane.b32.xlu1 %v992_v26, %s4835_s3 }
 0x298   :  { %1393 = vrot.lane.b32.xlu0 %v1385_v10, %s4835_s3 }
 0x299   :  { %v997_v9 = vpop.permute.xlu1 %996 }
 0x29a   :  { %v1768_v19 = vpop.permute.xlu0 %1767  ;;  %v998_v4 = vsel %vm113_vm4, %v997_v9, %v3278_v50 }
 0x29b   :  { %v1769_v53 = vsel %vm113_vm4, %v1768_v19, %v3273_v56  ;;  %1005 = vrot.lane.b32.xlu1 %v998_v4, %s4835_s3 }
 0x29c   :  { %1779 = vrot.lane.b32.xlu0 %v1769_v53, %s4835_s3 }
 0x29d   :  { %v1381_v41 = vpop.permute.xlu1 %1380 }
 0x29e   :  { %v1774_v11 = vpop.permute.xlu0 %1773  ;;  %v1382_v3 = vsel %vm113_vm4, %v1381_v41, %v3293_v28 }
 0x29f   :  { %v1775_v33 = vsel %vm113_vm4, %v1774_v11, %v3289_v38  ;;  %1391 = vrot.lane.b32.xlu1 %v1382_v3, %s4835_s3 }
 0x2a0   :  { %1783 = vrot.lane.b32.xlu0 %v1775_v33, %s4835_s3 }
 0x2a1   :  { %v1387_v35 = vpop.permute.xlu1 %1386 }
 0x2a2   :  { %v418_v0 = vpop.permute.xlu0 %417  ;;  %v1388_v59 = vsel %vm113_vm4, %v1387_v35, %v3313_v62 }
 0x2a3   :  { %v419_v37 = vsel %vm113_vm4, %v418_v0, %v3309_v54  ;;  %1395 = vrot.lane.b32.xlu1 %v1388_v59, %s4835_s3 }
 0x2a4   :  { %429 = vrot.lane.b32.xlu0 %v419_v37, %s4835_s3 }
 0x2a5   :  { %v1771_v10 = vpop.permute.xlu1 %1770 }
 0x2a6   :  { %v424_v16 = vpop.permute.xlu0 %423  ;;  %v1772_v19 = vsel %vm113_vm4, %v1771_v10, %v3333_v18 }
 0x2a7   :  { %v425_v26 = vsel %vm113_vm4, %v424_v16, %v3329_v52  ;;  %1781 = vrot.lane.b32.xlu1 %v1772_v19, %s4835_s3 }
 0x2a8   :  { %433 = vrot.lane.b32.xlu0 %v425_v26, %s4835_s3 }
 0x2a9   :  { %v1777_v53 = vpop.permute.xlu1 %1776 }
 0x2aa   :  { %v808_v9 = vpop.permute.xlu0 %807  ;;  %v1778_v11 = vsel %vm113_vm4, %v1777_v53, %v3353_v63 }
 0x2ab   :  { %v809_v4 = vsel %vm113_vm4, %v808_v9, %v3349_v34  ;;  %1785 = vrot.lane.b32.xlu1 %v1778_v11, %s4835_s3 }
 0x2ac   :  { %819 = vrot.lane.b32.xlu0 %v809_v4, %s4835_s3 }
 0x2ae   :  { %v814_v41 = vpop.permute.xlu0 %813 }
 0x2af   :  { %v815_v33 = vsel %vm113_vm4, %v814_v41, %v3367_v36 }
 0x2b0   :  { %823 = vrot.lane.b32.xlu0 %v815_v33, %s4835_s3 }
 0x2b2   :  { %v1198_v3 = vpop.permute.xlu0 %1197 }
 0x2b3   :  { %v1199_v0 = vsel %vm113_vm4, %v1198_v3, %v3379_v27 }
 0x2b4   :  { %1209 = vrot.lane.b32.xlu0 %v1199_v0, %s4835_s3 }
 0x2b6   :  { %v1204_v35 = vpop.permute.xlu0 %1203 }
 0x2b7   :  { %v1205_v37 = vsel %vm113_vm4, %v1204_v35, %v3391_v57 }
 0x2b8   :  { %1213 = vrot.lane.b32.xlu0 %v1205_v37, %s4835_s3 }
 0x2ba   :  { %v1588_v59 = vpop.permute.xlu0 %1587 }
 0x2bb   :  { %v1589_v16 = vsel %vm113_vm4, %v1588_v59, %v3403_v42 }
 0x2bc   :  { %1599 = vrot.lane.b32.xlu0 %v1589_v16, %s4835_s3 }
 0x2bd   :  { %v522_v10 = vpop.permute.xlu1 %521 }
 0x2be   :  { %v1594_v26 = vpop.permute.xlu0 %1593  ;;  %v528_v19 = vsel %vm113_vm4, %v522_v10, %v2895_v20 }
 0x2bf   :  { %v1595_v9 = vsel %vm113_vm4, %v1594_v26, %v3417_v2  ;;  %537 = vrot.lane.b32.xlu1 %v528_v19, %s4910_s5 }
 0x2c0   :  { %1603 = vrot.lane.b32.xlu0 %v1595_v9, %s4835_s3  ;;  %s4026_s3 = sld [smem:[#allocation9 + $0xb]] }
 0x2c5   :  { %v526_v53 = vpop.permute.xlu1 %525 }
 0x2c6   :  { %v530_v4 = vsel %vm113_vm4, %v526_v53, %v2939_v58 }
 0x2c7   :  { %541 = vrot.lane.b32.xlu1 %v530_v4, %s4910_s5 }
 0x2c9   :  { %v912_v11 = vpop.permute.xlu1 %911 }
 0x2ca   :  { %v918_v35 = vsel %vm113_vm4, %v912_v11, %v2946_v7 }
 0x2cb   :  { %573 = vrot.lane.b32.xlu1 %v528_v19, %s4911_s16 }
 0x2cd   :  { %v916_v33 = vpop.permute.xlu1 %915 }
 0x2ce   :  { %v520_v41 = vpop.permute.xlu0 %519  ;;  %v920_v59 = vsel %vm113_vm4, %v916_v33, %v2969_v39 }
 0x2cf   :  { %v527_v3 = vsel %vm113_vm4, %v520_v41, %v2975_v43  ;;  %577 = vrot.lane.b32.xlu1 %v530_v4, %s4911_s16 }
 0x2d0   :  { %535 = vrot.lane.b32.xlu0 %v527_v3, %s4910_s5 }
 0x2d1   :  { %v1302_v0 = vpop.permute.xlu1 %1301 }
 0x2d2   :  { %v1308_v11 = vsel %vm113_vm4, %v1302_v0, %v2994_v47 }
 0x2d3   :  { %927 = vrot.lane.b32.xlu1 %v918_v35, %s4910_s5 }
 0x2d5   :  { %v1306_v37 = vpop.permute.xlu1 %1305 }
 0x2d7   :  { %931 = vrot.lane.b32.xlu1 %v920_v59, %s4910_s5 }
 0x2d9   :  { %v1692_v10 = vpop.permute.xlu1 %1691 }
 0x2da   :  { %v524_v16 = vpop.permute.xlu0 %523 }
 0x2db   :  { %v529_v26 = vsel %vm113_vm4, %v524_v16, %v3038_v49  ;;  %963 = vrot.lane.b32.xlu1 %v918_v35, %s4911_s16  ;;  %v1310_v16 = vsel %vm113_vm4, %v1306_v37, %v3016_v51  ;;  %v3604_v51 = vsel %vm113_vm4, %v1692_v10, %v3032_v40 }
 0x2dc   :  { %539 = vrot.lane.b32.xlu0 %v529_v26, %s4910_s5 }
 0x2dd   :  { %v1696_v9 = vpop.permute.xlu1 %1695 }
 0x2de   :  { %v910_v19 = vpop.permute.xlu0 %909 }
 0x2df   :  { %967 = vrot.lane.b32.xlu1 %v920_v59, %s4911_s16  ;;  %v917_v35 = vsel %vm113_vm4, %v910_v19, %v3055_v15 }
 0x2e0   :  { %571 = vrot.lane.b32.xlu0 %v527_v3, %s4911_s16 }
 0x2e1   :  { %v432_v4 = vpop.permute.xlu1 %431 }
 0x2e2   :  { %v914_v53 = vpop.permute.xlu0 %913  ;;  %v438_v40 = vsel %vm113_vm4, %v432_v4, %v3079_v60 }
 0x2e3   :  { %1317 = vrot.lane.b32.xlu1 %v1308_v11, %s4910_s5  ;;  %v919_v0 = vsel %vm113_vm4, %v914_v53, %v3071_v25 }
 0x2e4   :  { %575 = vrot.lane.b32.xlu0 %v529_v26, %s4911_s16 }
 0x2e5   :  { %v436_v33 = vpop.permute.xlu1 %435 }
 0x2e6   :  { %v1300_v41 = vpop.permute.xlu0 %1299 }
 0x2e7   :  { %1321 = vrot.lane.b32.xlu1 %v1310_v16, %s4910_s5 }
 0x2e8   :  { %925 = vrot.lane.b32.xlu0 %v917_v35, %s4910_s5 }
 0x2e9   :  { %v822_v59 = vpop.permute.xlu1 %821 }
 0x2ea   :  { %v1304_v3 = vpop.permute.xlu0 %1303  ;;  %v828_v15 = vsel %vm113_vm4, %v822_v59, %v3119_v21 }
 0x2eb   :  { %1353 = vrot.lane.b32.xlu1 %v1308_v11, %s4911_s16  ;;  %v1307_v11 = vsel %vm113_vm4, %v1300_v41, %v3093_v8 }
 0x2ec   :  { %929 = vrot.lane.b32.xlu0 %v919_v0, %s4910_s5 }
 0x2ed   :  { %v826_v47 = vpop.permute.xlu1 %825 }
 0x2ee   :  { %v1690_v26 = vpop.permute.xlu0 %1689 }
 0x2ef   :  { %1357 = vrot.lane.b32.xlu1 %v1310_v16, %s4911_s16 }
 0x2f0   :  { %961 = vrot.lane.b32.xlu0 %v917_v35, %s4911_s16  ;;  %v3613_v35 = vsel %vm113_vm4, %v1696_v9, %v3051_v22  ;;  %v440_v9 = vsel %vm113_vm4, %v436_v33, %v3101_v5 }
 0x2f1   :  { %v1212_v19 = vpop.permute.xlu1 %1211 }
 0x2f2   :  { %v1694_v37 = vpop.permute.xlu0 %1693 }
 0x2f3   :  { %1707 = vrot.lane.b32.xlu1 %v3604_v51, %s4910_s5 }
 0x2f4   :  { %965 = vrot.lane.b32.xlu0 %v919_v0, %s4911_s16  ;;  %v1309_v0 = vsel %vm113_vm4, %v1304_v3, %v3111_v61  ;;  %v1697_v61 = vsel %vm113_vm4, %v1690_v26, %v3129_v32  ;;  %v830_v26 = vsel %vm113_vm4, %v826_v47, %v3137_v1 }
 0x2f5   :  { %v1216_v25 = vpop.permute.xlu1 %1215 }
 0x2f6   :  { %v610_v53 = vpop.permute.xlu0 %609 }
 0x2f7   :  { %1711 = vrot.lane.b32.xlu1 %v3613_v35, %s4910_s5  ;;  %v617_v59 = vsel %vm113_vm4, %v610_v53, %v3165_v31 }
 0x2f8   :  { %1315 = vrot.lane.b32.xlu0 %v1307_v11, %s4910_s5 }
 0x2f9   :  { %v1602_v16 = vpop.permute.xlu1 %1601 }
 0x2fa   :  { %v614_v10 = vpop.permute.xlu0 %613 }
 0x2fb   :  { %447 = vrot.lane.b32.xlu1 %v438_v40, %s4910_s5 }
 0x2fc   :  { %1319 = vrot.lane.b32.xlu0 %v1309_v0, %s4910_s5 }
 0x2fd   :  { %v1606_v22 = vpop.permute.xlu1 %1605 }
 0x2fe   :  { %v1000_v41 = vpop.permute.xlu0 %999 }
 0x2ff   :  { %451 = vrot.lane.b32.xlu1 %v440_v9, %s4910_s5 }
 0x300   :  { %1351 = vrot.lane.b32.xlu0 %v1307_v11, %s4911_s16  ;;  %v3636_v11 = vsel %vm113_vm4, %v1694_v37, %v3145_v23  ;;  %v619_v23 = vsel %vm113_vm4, %v614_v10, %v3185_v48 }
 0x301   :  { %v612_v4 = vpop.permute.xlu1 %611 }
 0x302   :  { %v1004_v8 = vpop.permute.xlu0 %1003 }
 0x303   :  { %483 = vrot.lane.b32.xlu1 %v438_v40, %s4911_s16 }
 0x304   :  { %1355 = vrot.lane.b32.xlu0 %v1309_v0, %s4911_s16 }
 0x305   :  { %v616_v40 = vpop.permute.xlu1 %615 }
 0x306   :  { %v1390_v3 = vpop.permute.xlu0 %1389 }
 0x307   :  { %487 = vrot.lane.b32.xlu1 %v440_v9, %s4911_s16 }
 0x308   :  { %1705 = vrot.lane.b32.xlu0 %v1697_v61, %s4910_s5 }
 0x309   :  { %v3649_v37 = vpop.permute.xlu1 %1001 }
 0x30a   :  { %v1394_v33 = vpop.permute.xlu0 %1393 }
 0x30b   :  { %837 = vrot.lane.b32.xlu1 %v828_v15, %s4910_s5 }
 0x30c   :  { %1709 = vrot.lane.b32.xlu0 %v3636_v11, %s4910_s5 }
 0x30d   :  { %v3659_v32 = vpop.permute.xlu1 %1005 }
 0x30e   :  { %v3643_v0 = vpop.permute.xlu0 %1779 }
 0x30f   :  { %841 = vrot.lane.b32.xlu1 %v830_v26, %s4910_s5 }
 0x310   :  { %1741 = vrot.lane.b32.xlu0 %v1697_v61, %s4911_s16  ;;  %v1218_v61 = vsel %vm113_vm4, %v1212_v19, %v3154_v44 }
 0x311   :  { %v3667_v53 = vpop.permute.xlu1 %1391 }
 0x312   :  { %v3653_v9 = vpop.permute.xlu0 %1783 }
 0x313   :  { %873 = vrot.lane.b32.xlu1 %v828_v15, %s4911_s16  ;;  %v1220_v15 = vsel %vm113_vm4, %v1216_v25, %v3174_v45 }
 0x314   :  { %625 = vrot.lane.b32.xlu0 %v617_v59, %s4910_s5 }
 0x315   :  { %v3675_v39 = vpop.permute.xlu1 %1395 }
 0x316   :  { %v430_v47 = vpop.permute.xlu0 %429 }
 0x317   :  { %877 = vrot.lane.b32.xlu1 %v830_v26, %s4911_s16  ;;  %v1007_v26 = vsel %vm113_vm4, %v1000_v41, %v3205_v55 }
 0x318   :  { %629 = vrot.lane.b32.xlu0 %v619_v23, %s4910_s5 }
 0x319   :  { %v3683_v25 = vpop.permute.xlu1 %1781 }
 0x31a   :  { %v434_v10 = vpop.permute.xlu0 %433 }
 0x31b   :  { %1227 = vrot.lane.b32.xlu1 %v1218_v61, %s4910_s5 }
 0x31c   :  { %661 = vrot.lane.b32.xlu0 %v617_v59, %s4911_s16  ;;  %v1009_v59 = vsel %vm113_vm4, %v1004_v8, %v3225_v17 }
 0x31d   :  { %v3691_v7 = vpop.permute.xlu1 %1785 }
 0x31e   :  { %v820_v19 = vpop.permute.xlu0 %819 }
 0x31f   :  { %1231 = vrot.lane.b32.xlu1 %v1220_v15, %s4910_s5 }
 0x320   :  { %665 = vrot.lane.b32.xlu0 %v619_v23, %s4911_s16  ;;  %v1608_v23 = vsel %vm113_vm4, %v1602_v16, %v3194_v30 }
 0x322   :  { %v824_v41 = vpop.permute.xlu0 %823 }
 0x323   :  { %1263 = vrot.lane.b32.xlu1 %v1218_v61, %s4911_s16  ;;  %v1610_v61 = vsel %vm113_vm4, %v1606_v22, %v3214_v12  ;;  %v1399_v22 = vsel %vm113_vm4, %v1394_v33, %v3257_v46  ;;  %v620_v33 = vsel %vm113_vm4, %v616_v40, %v3246_v14  ;;  %v439_v40 = vsel %vm113_vm4, %v434_v10, %v3329_v52 }
 0x324   :  { %1015 = vrot.lane.b32.xlu0 %v1007_v26, %s4910_s5  ;;  %v1008_v10 = vsel %vm113_vm4, %v3649_v37, %v3262_v6 }
 0x326   :  { %v3695_v8 = vpop.permute.xlu0 %1209 }
 0x327   :  { %1267 = vrot.lane.b32.xlu1 %v1220_v15, %s4911_s16  ;;  %v1397_v15 = vsel %vm113_vm4, %v1390_v3, %v3241_v29  ;;  %v618_v3 = vsel %vm113_vm4, %v612_v4, %v3230_v13  ;;  %v437_v4 = vsel %vm113_vm4, %v430_v47, %v3309_v54 }
 0x328   :  { %1019 = vrot.lane.b32.xlu0 %v1009_v59, %s4910_s5 }
 0x32b   :  { %1617 = vrot.lane.b32.xlu1 %v1608_v23, %s4910_s5 }
 0x32c   :  { %1051 = vrot.lane.b32.xlu0 %v1007_v26, %s4911_s16  ;;  %v3705_v26 = vpop.permute.xlu0 %1213 }
 0x32f   :  { %1621 = vrot.lane.b32.xlu1 %v1610_v61, %s4910_s5 }
 0x330   :  { %1055 = vrot.lane.b32.xlu0 %v1009_v59, %s4911_s16 }
 0x331   :  { %v3701_v16 = vpop.permute.xlu1 %537 }
 0x333   :  { %1653 = vrot.lane.b32.xlu1 %v1608_v23, %s4911_s16  ;;  %v3715_v23 = vpop.permute.xlu0 %1599 }
 0x334   :  { %1405 = vrot.lane.b32.xlu0 %v1397_v15, %s4910_s5 }
 0x337   :  { %1657 = vrot.lane.b32.xlu1 %v1610_v61, %s4911_s16  ;;  %v3727_v13 = vpop.permute.xlu0 %1603 }
 0x338   :  { %1409 = vrot.lane.b32.xlu0 %v1399_v22, %s4910_s5 }
 0x339   :  { %v3709_v59 = vpop.permute.xlu1 %541 }
 0x33b   :  { %627 = vrot.lane.b32.xlu1 %v618_v3, %s4910_s5 }
 0x33c   :  { %1441 = vrot.lane.b32.xlu0 %v1397_v15, %s4911_s16 }
 0x33d   :  { %v3717_v49 = vpop.permute.xlu1 %573 }
 0x33f   :  { %631 = vrot.lane.b32.xlu1 %v620_v33, %s4910_s5 }
 0x340   :  { %1445 = vrot.lane.b32.xlu0 %v1399_v22, %s4911_s16 }
 0x341   :  { %v3723_v61 = vpop.permute.xlu1 %577 }
 0x342   :  { %v3736_v22 = vpop.permute.xlu0 %535 }
 0x343   :  { %663 = vrot.lane.b32.xlu1 %v618_v3, %s4911_s16 }
 0x344   :  { %445 = vrot.lane.b32.xlu0 %v437_v4, %s4910_s5 }
 0x345   :  { %v3731_v15 = vpop.permute.xlu1 %927 }
 0x347   :  { %667 = vrot.lane.b32.xlu1 %v620_v33, %s4911_s16 }
 0x348   :  { %449 = vrot.lane.b32.xlu0 %v439_v40, %s4910_s5 }
 0x349   :  { %v3739_v14 = vpop.permute.xlu1 %931 }
 0x34a   :  { %4912 = vst [vmem:[#allocation73_spill] sm:$0xff] %v3739_v14 }
 0x34b   :  { %1743 = vrot.lane.b32.xlu1 %v3604_v51, %s4911_s16  ;;  %v1010_v51 = vsel %vm113_vm4, %v3659_v32, %v3278_v50  ;;  %v829_v32 = vsel %vm113_vm4, %v824_v41, %v3367_v36  ;;  %v1400_v41 = vsel %vm113_vm4, %v3675_v39, %v3313_v62 }
 0x34c   :  { %481 = vrot.lane.b32.xlu0 %v437_v4, %s4911_s16 }
 0x34d   :  { %v3746_v3 = vpop.permute.xlu1 %963 }
 0x34e   :  { %v3744_v47 = vpop.permute.xlu0 %539 }
 0x34f   :  { %1017 = vrot.lane.b32.xlu1 %v1008_v10, %s4910_s5 }
 0x350   :  { %485 = vrot.lane.b32.xlu0 %v439_v40, %s4911_s16  ;;  %v827_v40 = vsel %vm113_vm4, %v820_v19, %v3349_v34  ;;  %v1398_v19 = vsel %vm113_vm4, %v3667_v53, %v3293_v28 }
 0x351   :  { %v3755_v14 = vpop.permute.xlu1 %967 }
 0x352   :  { %v3753_v33 = vpop.permute.xlu0 %571  ;;  %4914 = vst [vmem:[#allocation81_spill] sm:$0xff] %v3755_v14 }
 0x353   :  { %4913 = vst [vmem:[#allocation51_spill] sm:$0xff] %v3753_v33  ;;  %1021 = vrot.lane.b32.xlu1 %v1010_v51, %s4910_s5 }
 0x354   :  { %1745 = vrot.lane.b32.xlu0 %v3636_v11, %s4911_s16 }
 0x355   :  { %v3765_v37 = vpop.permute.xlu1 %1317 }
 0x356   :  { %v3763_v4 = vpop.permute.xlu0 %575  ;;  %4916 = vst [vmem:[#allocation56_spill] sm:$0xff] %v3765_v37 }
 0x357   :  { %4915 = vst [vmem:[#allocation36_spill] sm:$0xff] %v3763_v4  ;;  %1053 = vrot.lane.b32.xlu1 %v1008_v10, %s4911_s16 }
 0x358   :  { %835 = vrot.lane.b32.xlu0 %v827_v40, %s4910_s5 }
 0x359   :  { %v3773_v33 = vpop.permute.xlu1 %1321 }
 0x35a   :  { %v3771_v14 = vpop.permute.xlu0 %925  ;;  %4918 = vst [vmem:[#allocation58_spill] sm:$0xff] %v3773_v33 }
 0x35b   :  { %4917 = vst [vmem:[#allocation47_spill] sm:$0xff] %v3771_v14  ;;  %1057 = vrot.lane.b32.xlu1 %v1010_v51, %s4911_s16 }
 0x35c   :  { %839 = vrot.lane.b32.xlu0 %v829_v32, %s4910_s5 }
 0x35d   :  { %v3781_v37 = vpop.permute.xlu1 %1353 }
 0x35e   :  { %v3779_v11 = vpop.permute.xlu0 %929  ;;  %4920 = vst [vmem:[#allocation55_spill] sm:$0xff] %v3781_v37 }
 0x35f   :  { %4919 = vst [vmem:[#allocation64_spill] sm:$0xff] %v3779_v11  ;;  %1407 = vrot.lane.b32.xlu1 %v1398_v19, %s4910_s5  ;;  %v3851_v11 = vstv %s1891_s28  ;;  %s4103_s28 = sld [smem:[#allocation9 + $0x1a]] }
 0x360   :  { %871 = vrot.lane.b32.xlu0 %v827_v40, %s4911_s16  ;;  %v1217_v40 = vsel %vm113_vm4, %v3695_v8, %v3379_v27 }
 0x361   :  { %v3790_v33 = vpop.permute.xlu1 %1357 }
 0x362   :  { %v3788_v10 = vpop.permute.xlu0 %961  ;;  %4922 = vst [vmem:[#allocation52_spill] sm:$0xff] %v3790_v33 }
 0x363   :  { %4921 = vst [vmem:[#allocation65_spill] sm:$0xff] %v3788_v10  ;;  %1411 = vrot.lane.b32.xlu1 %v1400_v41, %s4910_s5  ;;  %v3845_v10 = vstv %s1890_s27  ;;  %s4088_s27 = sld [smem:[#allocation9 + $0x1b]] }
 0x364   :  { %875 = vrot.lane.b32.xlu0 %v829_v32, %s4911_s16  ;;  %v1219_v32 = vsel %vm113_vm4, %v3705_v26, %v3391_v57 }
 0x365   :  { %v3799_v53 = vpop.permute.xlu1 %1707 }
 0x366   :  { %v3797_v51 = vpop.permute.xlu0 %965  ;;  %4924 = vst [vmem:[#allocation83_spill] sm:$0xff] %v3799_v53  ;;  %v3815_v53 = vstv %s416_s4  ;;  %s4054_s4 = sld [smem:[#allocation9 + $0x11]] }
 0x367   :  { %4923 = vst [vmem:[#allocation66_spill] sm:$0xff] %v3797_v51  ;;  %1443 = vrot.lane.b32.xlu1 %v1398_v19, %s4911_s16  ;;  %4927 = vst [vmem:[#allocation78_spill] sm:$0xff] %v3815_v53  ;;  %v1788_v51 = vsel %vm113_vm4, %v3683_v25, %v3333_v18 }
 0x368   :  { %1225 = vrot.lane.b32.xlu0 %v1217_v40, %s4910_s5 }
 0x369   :  { %v3808_v39 = vpop.permute.xlu1 %1711 }
 0x36a   :  { %v3806_v33 = vpop.permute.xlu0 %1315  ;;  %4926 = vst [vmem:[#allocation77_spill] sm:$0xff] %v3808_v39 }
 0x36b   :  { %4925 = vst [vmem:[#allocation74_spill] sm:$0xff] %v3806_v33  ;;  %1447 = vrot.lane.b32.xlu1 %v1400_v41, %s4911_s16  ;;  %v3828_v41 = vstv %s4929_s6  ;;  %s4519_s6 = sld [smem:[#allocation9 + $0x23]] }
 0x36c   :  { %1229 = vrot.lane.b32.xlu0 %v1219_v32, %s4910_s5 }
 0x36d   :  { %v448_v19 = vpop.permute.xlu1 %447 }
 0x36e   :  { %v3817_v8 = vpop.permute.xlu0 %1319  ;;  %v458_v39 = vsel %vm86_vm5, 0.0, %v448_v19 }
 0x36f   :  { %4928 = vst [vmem:[#allocation48_spill] sm:$0xff] %v3817_v8  ;;  %v463_v26 = vmul.f32 %v3815_v53, %v458_v39  ;;  %1747 = vrot.lane.b32.xlu1 %v3613_v35, %s4911_s16  ;;  %v3837_v39 = vstv %s1888_s19  ;;  %s4056_s19 = sld [smem:[#allocation9 + $0x14]] }
 0x370   :  { %1261 = vrot.lane.b32.xlu0 %v1217_v40, %s4911_s16 }
 0x371   :  { %v452_v8 = vpop.permute.xlu1 %451  ;;  %v467_v35 = vadd.f32 %v463_v26, %v3828_v41  ;;  %v1790_v26 = vsel %vm113_vm4, %v3691_v7, %v3353_v63 }
 0x372   :  { %v3830_v33 = vpop.permute.xlu0 %1351  ;;  %v460_v40 = vsel %vm86_vm5, 0.0, %v452_v8  ;;  %v473_v8 = vmul.f32 %v3837_v39, %v3079_v60 }
 0x373   :  { %4930 = vst [vmem:[#allocation37_spill] sm:$0xff] %v3830_v33  ;;  %v465_v19 = vmul.f32 %v3815_v53, %v460_v40  ;;  %1797 = vrot.lane.b32.xlu1 %v1788_v51, %s4910_s5  ;;  %v3843_v33 = vstv %s1889_s20  ;;  %v548_v40 = vsel %vm86_vm5, 0.0, %v3701_v16  ;;  %v475_v16 = vmul.f32 %v3837_v39, %v3101_v5  ;;  %s4070_s20 = sld [smem:[#allocation9 + $0x18]] }
 0x374   :  { %1265 = vrot.lane.b32.xlu0 %v1219_v32, %s4911_s16  ;;  %v1787_v32 = vsel %vm113_vm4, %v3643_v0, %v3273_v56  ;;  %v477_v14 = vadd.f32 %v473_v8, %v467_v35  ;;  %v553_v0 = vmul.f32 %v3845_v10, %v548_v40  ;;  %v1607_v35 = vsel %vm113_vm4, %v3715_v23, %v3403_v42 }
 0x375   :  { %v484_v25 = vpop.permute.xlu1 %483  ;;  %v469_v60 = vadd.f32 %v465_v19, %v3828_v41  ;;  %v3881_v19 = vstv %s1892_s7  ;;  %v584_v5 = vsel %vm85_vm6, 0.0, %v3717_v49  ;;  %v1609_v49 = vsel %vm113_vm4, %v3727_v13, %v3417_v2  ;;  %s2061_s7 = smov [#allocation11]  }
 0x376   :  { %v3847_v37 = vpop.permute.xlu0 %1355  ;;  %v589_v42 = vmul.f32 %v3881_v19, %v584_v5  ;;  %v1341_v2 = vstv %s1929_s14 }
 0x377   :  { %4931 = vst [vmem:[#allocation57_spill] sm:$0xff] %v3847_v37  ;;  %v494_v37 = vsel %vm85_vm6, 0.0, %v484_v25  ;;  %1801 = vrot.lane.b32.xlu1 %v1790_v26, %s4910_s5  ;;  %v563_v25 = vmul.f32 %v3851_v11, %v2895_v20 }
 0x378   :  { %1795 = vrot.lane.b32.xlu0 %v1787_v32, %s4910_s5  ;;  %v499_v53 = vmul.f32 %v3843_v33, %v494_v37  ;;  %v550_v37 = vsel %vm86_vm5, 0.0, %v3709_v59 }
 0x379   :  { %v488_v4 = vpop.permute.xlu1 %487  ;;  %v555_v23 = vmul.f32 %v3845_v10, %v550_v37 }
 0x37a   :  { %v3869_v56 = vpop.permute.xlu0 %1705  ;;  %v503_v7 = vadd.f32 %v499_v53, %v477_v14  ;;  %v496_v14 = vsel %vm85_vm6, 0.0, %v488_v4  ;;  %v479_v53 = vadd.f32 %v475_v16, %v469_v60  ;;  %v586_v60 = vsel %vm85_vm6, 0.0, %v3723_v61 }
 0x37b   :  { %4932 = vst [vmem:[#allocation82_spill] sm:$0xff] %v3869_v56  ;;  %v501_v8 = vmul.f32 %v3843_v33, %v496_v14  ;;  %1833 = vrot.lane.b32.xlu1 %v1788_v51, %s4911_s16  ;;  %v591_v16 = vmul.f32 %v3881_v19, %v586_v60  ;;  %v861_v60 = vstv %s1907_s8  ;;  %s1866_s8 = sshll.u32 %s2061_s7, 4  ;;  %s1867_s8 = int_to_ptr.vmem [resolvable:$true] %s1866_s8 }
 0x37c   :  { %1615 = vrot.lane.b32.xlu0 %v1607_v35, %s4910_s5  ;;  %v557_v20 = vadd.f32 %v553_v0, %v503_v7  ;;  %v565_v0 = vmul.f32 %v3851_v11, %v2939_v58  ;;  %p2027_p10 = scmp.lt.s32.totalorder %s1867_s8, %s1867_s8 }
 0x37d   :  { %v505_v40 = vadd.f32 %v501_v8, %v479_v53  ;;  %v3894_v56 = vpop.permute.xlu1 %837 }
 0x37e   :  { %v3892_v59 = vpop.permute.xlu0 %1709  ;;  %v567_v4 = vadd.f32 %v563_v25, %v557_v20 }
 0x37f   :  { %4933 = vst [vmem:[#allocation67_spill] sm:$0xff] %v3892_v59  ;;  %v559_v51 = vadd.f32 %v555_v23, %v505_v40  ;;  %1837 = vrot.lane.b32.xlu1 %v1790_v26, %s4911_s16  ;;  %v1789_v26 = vsel %vm113_vm4, %v3653_v9, %v3289_v38  ;;  %v3958_v38 = vstv %s1945_s12  ;;  %v951_v59 = vstv %s1910_s2 }
 0x380   :  { %1619 = vrot.lane.b32.xlu0 %v1609_v49, %s4910_s5  ;;  %v3907_v7 = vadd.f32 %v589_v42, %v567_v4  ;;  %4942 = vst [vmem:[#allocation68_spill] sm:$0xff] %v3958_v38 }
 0x381   :  { %v3912_v13 = vpop.permute.xlu1 %841  ;;  %v569_v37 = vadd.f32 %v565_v0, %v559_v51  ;;  %v651_v51 = vstv %s1894_s9  ;;  %v3952_v0 = vstv %s1926_s10  ;;  %s2022_s9 = scalar_lea.vmem %s1867_s8, 512 }
 0x382   :  { %v3910_v25 = vpop.permute.xlu0 %1741  ;;  %p2023_p9 = scmp.ne.s32.totalorder %s1867_s8, %s2022_s9  ;;  %p2028_p11 = scmp.lt.s32.totalorder %s2022_s9, %s2022_s9 }
 0x383   :  { %4934 = vst [vmem:[#allocation70_spill] sm:$0xff] %v3910_v25  ;;  %v3915_v61 = vadd.f32 %v591_v16, %v569_v37  ;;  %v1041_v16 = vstv %s1913_s11  ;;  %v1431_v25 = vstv %s1932_s13 }
 0x384   :  { %1651 = vrot.lane.b32.xlu0 %v1607_v35, %s4911_s16  ;;  %p2029_p12 = por %p2028_p11, %p2027_p10 }
 0x385   :  { %v3919_v5 = vpop.permute.xlu1 %873 }
 0x386   :  { %v3917_v14 = vpop.permute.xlu0 %625  ;;  %p2030_p13 = pnand %p2029_p12, %p2023_p9 }
 0x388   :  { %1655 = vrot.lane.b32.xlu0 %v1609_v49, %s4911_s16 }
 0x389   :  { %v3924_v42 = vpop.permute.xlu1 %877 }
 0x38a   :  { %v3922_v58 = vpop.permute.xlu0 %629 }
 0x38c   :  { %1799 = vrot.lane.b32.xlu0 %v1789_v26, %s4910_s5  ;;  %s4036_s5 = sld [smem:[#allocation9 + $0xf]] }
 0x38d   :  { %v3932_v35 = vpop.permute.xlu1 %1227 }
 0x38e   :  { %v3930_v20 = vpop.permute.xlu0 %661 }
 0x390   :  { %1831 = vrot.lane.b32.xlu0 %v1787_v32, %s4911_s16 }
 0x391   :  { %v3937_v8 = vpop.permute.xlu1 %1231 }
 0x392   :  { %v3935_v53 = vpop.permute.xlu0 %665 }
 0x394   :  { %1835 = vrot.lane.b32.xlu0 %v1789_v26, %s4911_s16  ;;  %s4038_s16 = sld [smem:[#allocation9 + $0x12]] }
 0x395   :  { %v3942_v40 = vpop.permute.xlu1 %1263 }
 0x396   :  { %v3940_v23 = vpop.permute.xlu0 %1015 }
 0x397   :  { %4935 = vst [vmem:[#allocation60_spill] sm:$0xff] %v3940_v23  ;;  %v3982_v23 = vmul.f32 %v651_v51, %v3185_v48  ;;  %v4004_v48 = vmul.f32 %v3958_v38, %v3194_v30  ;;  %v4030_v30 = vmul.f32 %v3851_v11, %v2975_v43  ;;  %v4958_v43 = vld [vmem:[#allocation35_spill] sm:$0xff] }
 0x399   :  { %v3946_v4 = vpop.permute.xlu1 %1267  ;;  %4945 = vst [vmem:[#allocation31_spill] sm:$0xff] %v3982_v23  ;;  %4950 = vst [vmem:[#allocation84_spill] sm:$0xff] %v4004_v48  ;;  %v5004_v23 = vld [vmem:[#allocation64_spill] sm:$0xff] }
 0x39a   :  { %v3944_v9 = vpop.permute.xlu0 %1019  ;;  %4937 = vst [vmem:[#allocation80_spill] sm:$0xff] %v3946_v4  ;;  %v3997_v4 = vmul.f32 %v3952_v0, %v3174_v45  ;;  %v4019_v45 = vmul.f32 %v3958_v38, %v3214_v12  ;;  %v4956_v12 = vld [vmem:[#allocation50_spill] sm:$0xff] }
 0x39b   :  { %4936 = vst [vmem:[#allocation79_spill] sm:$0xff] %v3944_v9  ;;  %v3979_v9 = vmul.f32 %v861_v60, %v3137_v1  ;;  %v4000_v1 = vmul.f32 %v1041_v16, %v3225_v17  ;;  %v4022_v17 = vmul.f32 %v1431_v25, %v3257_v46  ;;  %v4041_v38 = vmul.f32 %v651_v51, %v4956_v12  ;;  %v4960_v12 = vld [vmem:[#allocation40_spill] sm:$0xff] }
 0x39c   :  { %4948 = vst [vmem:[#allocation76_spill] sm:$0xff] %v3997_v4  ;;  %4954 = vst [vmem:[#allocation61_spill] sm:$0xff] %v4019_v45  ;;  %v4045_v46 = vmul.f32 %v3837_v39, %v3329_v52  ;;  %v4052_v45 = vmul.f32 %v651_v51, %v4958_v43  ;;  %v4062_v48 = vmul.f32 %v951_v59, %v4960_v12  ;;  %v4997_v4 = vld [vmem:[#allocation51_spill] sm:$0xff] }
 0x39d   :  { %v3950_v49 = vpop.permute.xlu1 %1617  ;;  %4949 = vst [vmem:[#allocation22_spill] sm:$0xff] %v4000_v1  ;;  %4955 = vst [vmem:[#allocation19_spill] sm:$0xff] %v4022_v17  ;;  %v4957_v17 = vld [vmem:[#allocation27_spill] sm:$0xff]  ;;  %v4065_v52 = vmul.f32 %v861_v60, %v3349_v34  ;;  %v4080_v43 = vmul.f32 %v861_v60, %v3367_v36  ;;  %v4086_v34 = vmul.f32 %v1041_v16, %v3278_v50 }
 0x39e   :  { %v3948_v32 = vpop.permute.xlu0 %1051  ;;  %4939 = vst [vmem:[#allocation75_spill] sm:$0xff] %v3950_v49  ;;  %v3965_v49 = vmul.f32 %v861_v60, %v3119_v21  ;;  %v3986_v21 = vmul.f32 %v3952_v0, %v3154_v44  ;;  %v4007_v44 = vmul.f32 %v1431_v25, %v3241_v29  ;;  %v4034_v29 = vmul.f32 %v3837_v39, %v3309_v54  ;;  %v4959_v54 = vld [vmem:[#allocation25_spill] sm:$0xff] }
 0x39f   :  { %4938 = vst [vmem:[#allocation23_spill] sm:$0xff] %v3948_v32  ;;  %v3968_v32 = vmul.f32 %v651_v51, %v3165_v31  ;;  %v3989_v31 = vmul.f32 %v1041_v16, %v3205_v55  ;;  %4961 = vst [vmem:[#allocation38_spill] sm:$0xff] %v4065_v52  ;;  %v4962_v39 = vld [vmem:[#allocation33_spill] sm:$0xff]  ;;  %v4098_v36 = vmul.f32 %v3952_v0, %v3379_v27 }
 0x3a0   :  { %4946 = vst [vmem:[#allocation63_spill] sm:$0xff] %v3986_v21  ;;  %4951 = vst [vmem:[#allocation62_spill] sm:$0xff] %v4007_v44  ;;  %v4049_v44 = vmul.f32 %v3851_v11, %v4957_v17  ;;  %v4068_v1 = vmul.f32 %v951_v59, %v4962_v39  ;;  %v4077_v17 = vmul.f32 %v1041_v16, %v3262_v6  ;;  %v4970_v39 = vld [vmem:[#allocation32_spill] sm:$0xff] }
 0x3a1   :  { %v3956_v26 = vpop.permute.xlu1 %1621  ;;  %4947 = vst [vmem:[#allocation34_spill] sm:$0xff] %v3989_v31  ;;  %4966 = vst [vmem:[#allocation17_spill] sm:$0xff] %v4080_v43  ;;  %v4108_v50 = vmul.f32 %v1431_v25, %v3293_v28  ;;  %v4112_v16 = vmul.f32 %v3952_v0, %v3391_v57  ;;  %v4143_v0 = vstv %s3970_s23 }
 0x3a2   :  { %v3954_v37 = vpop.permute.xlu0 %1055  ;;  %4941 = vst [vmem:[#allocation59_spill] sm:$0xff] %v3956_v26  ;;  %v3974_v26 = vstv %s1948_s17  ;;  %4963 = vst [vmem:[#allocation18_spill] sm:$0xff] %v4068_v1  ;;  %v4204_v1 = vstv %s4088_s27 }
 0x3a3   :  { %4940 = vst [vmem:[#allocation69_spill] sm:$0xff] %v3954_v37  ;;  %4943 = vst [vmem:[#allocation72_spill] sm:$0xff] %v3974_v26  ;;  %v3976_v37 = vstv %s1951_s18 }
 0x3a4   :  { %4944 = vst [vmem:[#allocation30_spill] sm:$0xff] %v3976_v37  ;;  %4969 = vst [vmem:[#allocation27_spill] sm:$0xff] %v4086_v34  ;;  %v4130_v57 = vmul.f32 %v3976_v37, %v3333_v18 }
 0x3a5   :  { %v4015_v31 = vpop.permute.xlu1 %1653  ;;  %4974 = vst [vmem:[#allocation40_spill] sm:$0xff] %v4098_v36  ;;  %4978 = vst [vmem:[#allocation32_spill] sm:$0xff] %v4112_v16  ;;  %v4178_v16 = vstv %s4054_s4  ;;  %v938_v36 = vsel %vm86_vm5, 0.0, %v3731_v15 }
 0x3a6   :  { %v4013_v55 = vpop.permute.xlu0 %1405  ;;  %4953 = vst [vmem:[#allocation24_spill] sm:$0xff] %v4015_v31  ;;  %v4193_v31 = vstv %s4070_s20  ;;  %4994 = vst [vmem:[#allocation90_spill] sm:$0xff] %v4204_v1 }
 0x3a7   :  { %4952 = vst [vmem:[#allocation71_spill] sm:$0xff] %v4013_v55  ;;  %v4059_v55 = vmul.f32 %v951_v59, %v4959_v54  ;;  %v4967_v54 = vld [vmem:[#allocation45_spill] sm:$0xff] }
 0x3a8   :  { %v4083_v12 = vmul.f32 %v951_v59, %v4967_v54  ;;  %v4975_v59 = vld [vmem:[#allocation42_spill] sm:$0xff]  ;;  %4977 = vst [vmem:[#allocation45_spill] sm:$0xff] %v4108_v50  ;;  %v4118_v54 = vmul.f32 %v1431_v25, %v3313_v62  ;;  %v4137_v62 = vstv %s3960_s21  ;;  %v4140_v25 = vstv %s3962_s22 }
 0x3a9   :  { %v4074_v51 = vpop.permute.xlu1 %1657  ;;  %v4101_v60 = vmul.f32 %v1341_v2, %v4975_v59 }
 0x3aa   :  { %v4072_v11 = vpop.permute.xlu0 %1409  ;;  %4965 = vst [vmem:[#allocation16_spill] sm:$0xff] %v4074_v51  ;;  %4968 = vst [vmem:[#allocation50_spill] sm:$0xff] %v4083_v12  ;;  %v4972_v51 = vld [vmem:[#allocation41_spill] sm:$0xff] }
 0x3ab   :  { %4964 = vst [vmem:[#allocation39_spill] sm:$0xff] %v4072_v11  ;;  %v4091_v11 = vmul.f32 %v1341_v2, %v4970_v39  ;;  %v4094_v6 = vmul.f32 %v1341_v2, %v4972_v51  ;;  %4976 = vst [vmem:[#allocation33_spill] sm:$0xff] %v4101_v60  ;;  %v4979_v51 = vld [vmem:[#allocation43_spill] sm:$0xff]  ;;  %v4982_v39 = vld [vmem:[#allocation28_spill] sm:$0xff] }
 0x3ac   :  { %v4115_v27 = vmul.f32 %v1341_v2, %v4979_v51  ;;  %4981 = vst [vmem:[#allocation42_spill] sm:$0xff] %v4118_v54  ;;  %v4122_v59 = vmul.f32 %v3974_v26, %v4982_v39  ;;  %v4984_v60 = vld [vmem:[#allocation26_spill] sm:$0xff]  ;;  %v4134_v2 = vmul.f32 %v3976_v37, %v3353_v63  ;;  %v4151_v39 = vstv %s3991_s25  ;;  %v4991_v54 = vld [vmem:[#allocation73_spill] sm:$0xff] }
 0x3ad   :  { %4971 = vst [vmem:[#allocation35_spill] sm:$0xff] %v4091_v11  ;;  %4973 = vst [vmem:[#allocation25_spill] sm:$0xff] %v4094_v6  ;;  %v4126_v28 = vmul.f32 %v3974_v26, %v4984_v60  ;;  %v4146_v60 = vstv %s3972_s24  ;;  %v628_v18 = vpop.permute.xlu1 %627  ;;  %v4154_v26 = vstv %s3993_s26  ;;  %v4157_v63 = vstv %s4009_s1 }
 0x3ae   :  { %4980 = vst [vmem:[#allocation41_spill] sm:$0xff] %v4115_v27  ;;  %4983 = vst [vmem:[#allocation43_spill] sm:$0xff] %v4122_v59  ;;  %v4148_v51 = vpop.permute.xlu0 %1441  ;;  %v638_v37 = vsel %vm86_vm5, 0.0, %v628_v18  ;;  %v4168_v27 = vstv %s4026_s3  ;;  %v547_v18 = vsel %vm86_vm5, 0.0, %v3736_v22  ;;  %v549_v6 = vsel %vm86_vm5, 0.0, %v3744_v47 }
 0x3af   :  { %4985 = vst [vmem:[#allocation28_spill] sm:$0xff] %v4126_v28  ;;  %4986 = vst [vmem:[#allocation26_spill] sm:$0xff] %v4130_v57  ;;  %v4165_v57 = vstv %s4024_s15  ;;  %v643_v59 = vmul.f32 %v4157_v63, %v638_v37  ;;  %v4175_v28 = vstv %s4038_s16  ;;  %v940_v37 = vsel %vm86_vm5, 0.0, %v4991_v54 }
 0x3b0   :  { %4987 = vst [vmem:[#allocation85_spill] sm:$0xff] %v4134_v2  ;;  %4988 = vst [vmem:[#allocation86_spill] sm:$0xff] %v4148_v51  ;;  %v4162_v2 = vstv %s4011_s0  ;;  %v4172_v51 = vstv %s4036_s5  ;;  %v974_v22 = vsel %vm85_vm6, 0.0, %v3746_v3  ;;  %v4209_v11 = vstv %s4103_s28 }
 0x3b1   :  { %4989 = vst [vmem:[#allocation87_spill] sm:$0xff] %v4154_v26  ;;  %v4181_v26 = vstv %s4056_s19  ;;  %4992 = vst [vmem:[#allocation73_spill] sm:$0xff] %v4193_v31  ;;  %v632_v12 = vpop.permute.xlu1 %631  ;;  %v4212_v54 = vstv %s4105_s29  ;;  %v4217_v43 = vmul.f32 %v3845_v10, %v547_v18  ;;  %v943_v47 = vmul.f32 %v4137_v62, %v938_v36  ;;  %v4999_v18 = vld [vmem:[#allocation81_spill] sm:$0xff] }
 0x3b2   :  { %4990 = vst [vmem:[#allocation88_spill] sm:$0xff] %v4181_v26  ;;  %v4195_v50 = vpop.permute.xlu0 %1445  ;;  %v640_v15 = vsel %vm86_vm5, 0.0, %v632_v12  ;;  %4995 = vst [vmem:[#allocation91_spill] sm:$0xff] %v4209_v11  ;;  %v583_v3 = vsel %vm85_vm6, 0.0, %v4997_v4  ;;  %v4224_v1 = vmul.f32 %v4137_v62, %v940_v37  ;;  %v4227_v12 = vmul.f32 %v3845_v10, %v549_v6 }
 0x3b3   :  { %4993 = vst [vmem:[#allocation89_spill] sm:$0xff] %v4195_v50  ;;  %4996 = vst [vmem:[#allocation92_spill] sm:$0xff] %v4212_v54  ;;  %v647_v50 = vadd.f32 %v643_v59, %v3907_v7  ;;  %v645_v31 = vmul.f32 %v4157_v63, %v640_v15  ;;  %v4998_v54 = vld [vmem:[#allocation36_spill] sm:$0xff]  ;;  %v4233_v59 = vmul.f32 %v4140_v25, %v974_v22  ;;  %v976_v36 = vsel %vm85_vm6, 0.0, %v4999_v18 }
 0x3b4   :  { %v585_v7 = vsel %vm85_vm6, 0.0, %v4998_v54  ;;  %v848_v4 = vsel %vm86_vm5, 0.0, %v3894_v56  ;;  %v4247_v22 = vmul.f32 %v3881_v19, %v583_v3  ;;  %v5000_v54 = vld [vmem:[#allocation78_spill] sm:$0xff]  ;;  %v5001_v56 = vld [vmem:[#allocation47_spill] sm:$0xff] }
 0x3b5   :  { %v664_v11 = vpop.permute.xlu1 %663  ;;  %v649_v6 = vadd.f32 %v645_v31, %v3915_v61  ;;  %v657_v18 = vadd.f32 %v4041_v38, %v647_v50  ;;  %v4253_v26 = vmul.f32 %v3881_v19, %v585_v7  ;;  %v4259_v61 = vmul.f32 %v4140_v25, %v976_v36  ;;  %v5002_v31 = vld [vmem:[#allocation56_spill] sm:$0xff]  ;;  %v5003_v3 = vld [vmem:[#allocation58_spill] sm:$0xff] }
 0x3b6   :  { %v446_v15 = vpop.permute.xlu0 %445  ;;  %v674_v37 = vsel %vm85_vm6, 0.0, %v664_v11  ;;  %v1328_v11 = vsel %vm86_vm5, 0.0, %v5002_v31  ;;  %v1330_v38 = vsel %vm86_vm5, 0.0, %v5003_v3  ;;  %v853_v50 = vmul.f32 %v4162_v2, %v848_v4 }
 0x3b7   :  { %v457_v10 = vsel %vm86_vm5, 0.0, %v446_v15  ;;  %v679_v21 = vmul.f32 %v4165_v57, %v674_v37  ;;  %v937_v15 = vsel %vm86_vm5, 0.0, %v5001_v56  ;;  %v850_v19 = vsel %vm86_vm5, 0.0, %v3912_v13 }
 0x3b8   :  { %v462_v52 = vmul.f32 %v5000_v54, %v457_v10  ;;  %v884_v36 = vsel %vm85_vm6, 0.0, %v3919_v5  ;;  %v659_v31 = vadd.f32 %v4052_v45, %v649_v6  ;;  %v939_v5 = vsel %vm86_vm5, 0.0, %v5004_v23  ;;  %v5005_v45 = vld [vmem:[#allocation55_spill] sm:$0xff] }
 0x3b9   :  { %v683_v10 = vadd.f32 %v679_v21, %v657_v18  ;;  %v668_v37 = vpop.permute.xlu1 %667  ;;  %v4283_v18 = vmul.f32 %v4137_v62, %v937_v15  ;;  %v1364_v6 = vsel %vm85_vm6, 0.0, %v5005_v45  ;;  %v886_v23 = vsel %vm85_vm6, 0.0, %v3924_v42 }
 0x3ba   :  { %v450_v7 = vpop.permute.xlu0 %449  ;;  %v676_v3 = vsel %vm85_vm6, 0.0, %v668_v37  ;;  %v466_v4 = vadd.f32 %v462_v52, %v3828_v41  ;;  %v855_v52 = vmul.f32 %v4162_v2, %v850_v19  ;;  %v4317_v42 = vmul.f32 %v4146_v60, %v1364_v6 }
 0x3bb   :  { %v459_v56 = vsel %vm86_vm5, 0.0, %v450_v7  ;;  %v857_v13 = vadd.f32 %v853_v50, %v683_v10  ;;  %v681_v21 = vmul.f32 %v4165_v57, %v676_v3  ;;  %v4289_v7 = vmul.f32 %v4143_v0, %v1328_v11 }
 0x3bc   :  { %v464_v34 = vmul.f32 %v5000_v54, %v459_v56  ;;  %v889_v54 = vmul.f32 %v4168_v27, %v884_v36  ;;  %v4300_v56 = vmul.f32 %v4143_v0, %v1330_v38  ;;  %v476_v36 = vadd.f32 %v4034_v29, %v466_v4  ;;  %v5006_v38 = vld [vmem:[#allocation65_spill] sm:$0xff] }
 0x3bd   :  { %v867_v10 = vadd.f32 %v3965_v49, %v857_v13  ;;  %v685_v15 = vadd.f32 %v681_v21, %v659_v31  ;;  %v4297_v37 = vpop.permute.xlu1 %1743  ;;  %v4311_v13 = vmul.f32 %v4137_v62, %v939_v5  ;;  %v973_v21 = vsel %vm85_vm6, 0.0, %v5006_v38 }
 0x3be   :  { %v482_v50 = vpop.permute.xlu0 %481  ;;  %v468_v11 = vadd.f32 %v464_v34, %v3828_v41  ;;  %v5007_v41 = vld [vmem:[#allocation52_spill] sm:$0xff]  ;;  %v891_v29 = vmul.f32 %v4168_v27, %v886_v23  ;;  %v637_v5 = vsel %vm86_vm5, 0.0, %v3917_v14  ;;  %v5009_v14 = vld [vmem:[#allocation83_spill] sm:$0xff] }
 0x3bf   :  { %v493_v19 = vsel %vm85_vm6, 0.0, %v482_v50  ;;  %v893_v49 = vadd.f32 %v889_v54, %v867_v10  ;;  %v859_v31 = vadd.f32 %v855_v52, %v685_v15  ;;  %v1366_v34 = vsel %vm85_vm6, 0.0, %v5007_v41 }
 0x3c0   :  { %v498_v3 = vmul.f32 %v3843_v33, %v493_v19  ;;  %v478_v50 = vadd.f32 %v4045_v46, %v468_v11  ;;  %v1718_v46 = vsel %vm86_vm5, 0.0, %v5009_v14  ;;  %v639_v11 = vsel %vm86_vm5, 0.0, %v3922_v58 }
 0x3c1   :  { %v869_v52 = vadd.f32 %v3979_v9, %v859_v31  ;;  %v1018_v54 = vpop.permute.xlu1 %1017  ;;  %v947_v62 = vadd.f32 %v943_v47, %v893_v49  ;;  %v5008_v47 = vld [vmem:[#allocation66_spill] sm:$0xff]  ;;  %v4351_v41 = vmul.f32 %v4140_v25, %v973_v21  ;;  %v642_v58 = vmul.f32 %v4157_v63, %v637_v5 }
 0x3c2   :  { %v502_v4 = vadd.f32 %v498_v3, %v476_v36  ;;  %v486_v45 = vpop.permute.xlu0 %485  ;;  %v1028_v10 = vsel %vm86_vm5, 0.0, %v1018_v54  ;;  %v975_v36 = vsel %vm85_vm6, 0.0, %v5008_v47 }
 0x3c3   :  { %v495_v6 = vsel %vm85_vm6, 0.0, %v486_v45  ;;  %v895_v19 = vadd.f32 %v891_v29, %v869_v52  ;;  %v957_v9 = vadd.f32 %v4059_v55, %v947_v62  ;;  %v1033_v3 = vmul.f32 %v4172_v51, %v1028_v10 }
 0x3c4   :  { %v556_v15 = vadd.f32 %v4217_v43, %v502_v4  ;;  %v500_v23 = vmul.f32 %v3843_v33, %v495_v6  ;;  %v4354_v29 = vmul.f32 %v4146_v60, %v1366_v34  ;;  %v4365_v21 = vmul.f32 %v4140_v25, %v975_v36 }
 0x3c5   :  { %v983_v55 = vadd.f32 %v4233_v59, %v957_v9  ;;  %v949_v31 = vadd.f32 %v4224_v1, %v895_v19  ;;  %v1022_v38 = vpop.permute.xlu1 %1021  ;;  %v4368_v34 = vmul.f32 %v4151_v39, %v1718_v46  ;;  %v644_v52 = vmul.f32 %v4157_v63, %v639_v11 }
 0x3c6   :  { %v566_v43 = vadd.f32 %v4030_v30, %v556_v15  ;;  %v504_v33 = vadd.f32 %v500_v23, %v478_v50  ;;  %v4346_v49 = vpop.permute.xlu0 %1745  ;;  %v673_v30 = vsel %vm85_vm6, 0.0, %v3930_v20  ;;  %v1030_v1 = vsel %vm86_vm5, 0.0, %v1022_v38  ;;  %v5010_v23 = vld [vmem:[#allocation74_spill] sm:$0xff] }
 0x3c7   :  { %v1037_v59 = vadd.f32 %v1033_v3, %v983_v55  ;;  %v959_v54 = vadd.f32 %v4062_v48, %v949_v31  ;;  %v678_v20 = vmul.f32 %v4165_v57, %v673_v30  ;;  %v1035_v63 = vmul.f32 %v4172_v51, %v1030_v1  ;;  %v5011_v31 = vld [vmem:[#allocation31_spill] sm:$0xff]  ;;  %v5012_v30 = vld [vmem:[#allocation48_spill] sm:$0xff] }
 0x3c8   :  { %v592_v4 = vadd.f32 %v4247_v22, %v566_v43  ;;  %v558_v45 = vadd.f32 %v4227_v12, %v504_v33  ;;  %v1238_v12 = vsel %vm86_vm5, 0.0, %v3932_v35  ;;  %v1327_v19 = vsel %vm86_vm5, 0.0, %v5010_v23 }
 0x3c9   :  { %v1054_v50 = vpop.permute.xlu1 %1053  ;;  %v985_v6 = vadd.f32 %v4259_v61, %v959_v54  ;;  %v1047_v35 = vadd.f32 %v4077_v17, %v1037_v59  ;;  %v675_v61 = vsel %vm85_vm6, 0.0, %v3935_v53  ;;  %v1243_v9 = vmul.f32 %v4175_v28, %v1238_v12 }
 0x3ca   :  { %v568_v22 = vadd.f32 %v4049_v44, %v558_v45  ;;  %v836_v62 = vpop.permute.xlu0 %835  ;;  %v646_v5 = vadd.f32 %v642_v58, %v592_v4  ;;  %v1064_v48 = vsel %vm85_vm6, 0.0, %v1054_v50  ;;  %v1240_v11 = vsel %vm86_vm5, 0.0, %v3937_v8  ;;  %v5013_v4 = vld [vmem:[#allocation77_spill] sm:$0xff]  ;;  %v5014_v45 = vld [vmem:[#allocation27_spill] sm:$0xff] }
 0x3cb   :  { %v847_v25 = vsel %vm86_vm5, 0.0, %v836_v62  ;;  %v1069_v44 = vmul.f32 %v4178_v16, %v1064_v48  ;;  %v1039_v47 = vadd.f32 %v1035_v63, %v985_v6  ;;  %v1274_v3 = vsel %vm85_vm6, 0.0, %v3942_v40 }
 0x3cc   :  { %v594_v10 = vadd.f32 %v4253_v26, %v568_v22  ;;  %v656_v15 = vadd.f32 %v3968_v32, %v646_v5  ;;  %v852_v26 = vmul.f32 %v4162_v2, %v847_v25  ;;  %v680_v33 = vmul.f32 %v4165_v57, %v675_v61  ;;  %v5016_v22 = vld [vmem:[#allocation63_spill] sm:$0xff]  ;;  %v5017_v25 = vld [vmem:[#allocation80_spill] sm:$0xff] }
 0x3cd   :  { %v1073_v46 = vadd.f32 %v1069_v44, %v1047_v35  ;;  %v1058_v17 = vpop.permute.xlu1 %1057  ;;  %v1329_v8 = vsel %vm86_vm5, 0.0, %v5012_v30  ;;  %v1720_v40 = vsel %vm86_vm5, 0.0, %v5013_v4  ;;  %v1049_v59 = vadd.f32 %v5014_v45, %v1039_v47  ;;  %v5023_v30 = vld [vmem:[#allocation35_spill] sm:$0xff] }
 0x3ce   :  { %v682_v36 = vadd.f32 %v678_v20, %v656_v15  ;;  %v648_v14 = vadd.f32 %v644_v52, %v594_v10  ;;  %v840_v32 = vpop.permute.xlu0 %839  ;;  %v1066_v43 = vsel %vm85_vm6, 0.0, %v1058_v17  ;;  %v5015_v52 = vld [vmem:[#allocation88_spill] sm:$0xff]  ;;  %v1245_v50 = vmul.f32 %v4175_v28, %v1240_v11  ;;  %v5018_v15 = vld [vmem:[#allocation38_spill] sm:$0xff]  ;;  %v5025_v45 = vld [vmem:[#allocation23_spill] sm:$0xff] }
 0x3cf   :  { %v849_v53 = vsel %vm86_vm5, 0.0, %v840_v32  ;;  %v1247_v58 = vadd.f32 %v1243_v9, %v1073_v46  ;;  %v1071_v1 = vmul.f32 %v4178_v16, %v1066_v43  ;;  %v1279_v54 = vmul.f32 %v5015_v52, %v1274_v3 }
 0x3d0   :  { %v856_v55 = vadd.f32 %v852_v26, %v682_v36  ;;  %v658_v38 = vadd.f32 %v5011_v31, %v648_v14  ;;  %v854_v57 = vmul.f32 %v4162_v2, %v849_v53  ;;  %v1276_v6 = vsel %vm85_vm6, 0.0, %v5017_v25  ;;  %v5019_v36 = vld [vmem:[#allocation60_spill] sm:$0xff]  ;;  %v5020_v14 = vld [vmem:[#allocation79_spill] sm:$0xff] }
 0x3d1   :  { %v1257_v62 = vadd.f32 %v5016_v22, %v1247_v58  ;;  %v1408_v5 = vpop.permute.xlu1 %1407  ;;  %v1075_v48 = vadd.f32 %v1071_v1, %v1049_v59  ;;  %v4427_v23 = vmul.f32 %v4143_v0, %v1327_v19  ;;  %v4430_v61 = vmul.f32 %v4143_v0, %v1329_v8  ;;  %v5021_v53 = vld [vmem:[#allocation76_spill] sm:$0xff]  ;;  %v5022_v31 = vld [vmem:[#allocation17_spill] sm:$0xff] }
 0x3d2   :  { %v684_v20 = vadd.f32 %v680_v33, %v658_v38  ;;  %v872_v12 = vpop.permute.xlu0 %871  ;;  %v866_v35 = vadd.f32 %v5018_v15, %v856_v55  ;;  %v4433_v9 = vmul.f32 %v4151_v39, %v1720_v40  ;;  %v1027_v26 = vsel %vm86_vm5, 0.0, %v5019_v36  ;;  %v5031_v36 = vld [vmem:[#allocation50_spill] sm:$0xff] }
 0x3d3   :  { %v883_v63 = vsel %vm85_vm6, 0.0, %v872_v12  ;;  %v1283_v2 = vadd.f32 %v1279_v54, %v1257_v62  ;;  %v1249_v47 = vadd.f32 %v1245_v50, %v1075_v48  ;;  %v1029_v32 = vsel %vm86_vm5, 0.0, %v5020_v14  ;;  %v5026_v54 = vld [vmem:[#allocation18_spill] sm:$0xff]  ;;  %v5027_v12 = vld [vmem:[#allocation73_spill] sm:$0xff]  ;;  %v5028_v50 = vld [vmem:[#allocation75_spill] sm:$0xff] }
 0x3d4   :  { %v858_v10 = vadd.f32 %v854_v57, %v684_v20  ;;  %v888_v44 = vmul.f32 %v4168_v27, %v883_v63  ;;  %v1281_v0 = vmul.f32 %v5015_v52, %v1276_v6  ;;  %v1418_v33 = vsel %vm86_vm5, 0.0, %v1408_v5 }
 0x3d5   :  { %v1337_v19 = vadd.f32 %v4289_v7, %v1283_v2  ;;  %v1412_v11 = vpop.permute.xlu1 %1411  ;;  %v1259_v43 = vadd.f32 %v5021_v53, %v1249_v47  ;;  %v5024_v7 = vld [vmem:[#allocation37_spill] sm:$0xff]  ;;  %v1032_v40 = vmul.f32 %v4172_v51, %v1027_v26  ;;  %v1063_v59 = vsel %vm85_vm6, 0.0, %v5025_v45 }
 0x3d6   :  { %v892_v46 = vadd.f32 %v888_v44, %v866_v35  ;;  %v876_v17 = vpop.permute.xlu0 %875  ;;  %v868_v38 = vadd.f32 %v5022_v31, %v858_v10  ;;  %v4455_v4 = vsel %vm85_vm6, 0.0, %v5024_v7  ;;  %v1423_v22 = vmul.f32 %v5027_v12, %v1418_v33  ;;  %v5030_v2 = vld [vmem:[#allocation25_spill] sm:$0xff]  ;;  %v5036_v31 = vld [vmem:[#allocation34_spill] sm:$0xff]  ;;  %v5037_v7 = vld [vmem:[#allocation24_spill] sm:$0xff] }
 0x3d7   :  { %v885_v3 = vsel %vm85_vm6, 0.0, %v876_v17  ;;  %v1347_v8 = vadd.f32 %v5023_v30, %v1337_v19  ;;  %v1285_v1 = vadd.f32 %v1281_v0, %v1259_v43  ;;  %v1034_v5 = vmul.f32 %v4172_v51, %v1029_v32  ;;  %v5029_v51 = vld [vmem:[#allocation69_spill] sm:$0xff] }
 0x3d8   :  { %v946_v55 = vadd.f32 %v4283_v18, %v892_v46  ;;  %v890_v58 = vmul.f32 %v4168_v27, %v885_v3  ;;  %v1628_v25 = vsel %vm86_vm5, 0.0, %v5028_v50  ;;  %v1068_v35 = vmul.f32 %v4178_v16, %v1063_v59  ;;  %v5033_v46 = vld [vmem:[#allocation91_spill] sm:$0xff]  ;;  %v5039_v50 = vld [vmem:[#allocation92_spill] sm:$0xff] }
 0x3d9   :  { %v1373_v27 = vadd.f32 %v4317_v42, %v1347_v8  ;;  %v1444_v62 = vpop.permute.xlu1 %1443  ;;  %v1339_v6 = vadd.f32 %v4300_v56, %v1285_v1  ;;  %v1420_v42 = vsel %vm86_vm5, 0.0, %v1412_v11  ;;  %v1065_v44 = vsel %vm85_vm6, 0.0, %v5029_v51  ;;  %v5034_v11 = vld [vmem:[#allocation90_spill] sm:$0xff]  ;;  %v5035_v3 = vld [vmem:[#allocation59_spill] sm:$0xff] }
 0x3da   :  { %v956_v18 = vadd.f32 %v5026_v54, %v946_v55  ;;  %v894_v20 = vadd.f32 %v890_v58, %v868_v38  ;;  %v1226_v57 = vpop.permute.xlu0 %1225  ;;  %v1454_v63 = vsel %vm85_vm6, 0.0, %v1444_v62  ;;  %v1633_v0 = vmul.f32 %v5034_v11, %v1628_v25 }
 0x3db   :  { %v1427_v15 = vadd.f32 %v1423_v22, %v1373_v27  ;;  %v1237_v56 = vsel %vm86_vm5, 0.0, %v1226_v57  ;;  %v1349_v47 = vadd.f32 %v5030_v2, %v1339_v6  ;;  %v1459_v17 = vmul.f32 %v5033_v46, %v1454_v63  ;;  %v5038_v27 = vld [vmem:[#allocation42_spill] sm:$0xff]  ;;  %v5043_v2 = vld [vmem:[#allocation40_spill] sm:$0xff] }
 0x3dc   :  { %v982_v48 = vadd.f32 %v4351_v41, %v956_v18  ;;  %v948_v10 = vadd.f32 %v4311_v13, %v894_v20  ;;  %v5032_v13 = vld [vmem:[#allocation45_spill] sm:$0xff]  ;;  %v1630_v53 = vsel %vm86_vm5, 0.0, %v5035_v3  ;;  %v1425_v33 = vmul.f32 %v5027_v12, %v1420_v42  ;;  %v5040_v6 = vld [vmem:[#allocation22_spill] sm:$0xff] }
 0x3dd   :  { %v1437_v32 = vadd.f32 %v5032_v13, %v1427_v15  ;;  %v1448_v19 = vpop.permute.xlu1 %1447  ;;  %v1375_v43 = vadd.f32 %v4354_v29, %v1349_v47  ;;  %v1070_v8 = vmul.f32 %v4178_v16, %v1065_v44  ;;  %v1242_v45 = vmul.f32 %v4175_v28, %v1237_v56  ;;  %v5042_v15 = vld [vmem:[#allocation16_spill] sm:$0xff] }
 0x3de   :  { %v958_v26 = vadd.f32 %v5031_v36, %v948_v10  ;;  %v1036_v41 = vadd.f32 %v1032_v40, %v982_v48  ;;  %v1230_v14 = vpop.permute.xlu0 %1229  ;;  %v1456_v30 = vsel %vm85_vm6, 0.0, %v1448_v19  ;;  %v1664_v40 = vsel %vm85_vm6, 0.0, %v5037_v7  ;;  %v5041_v48 = vld [vmem:[#allocation84_spill] sm:$0xff]  ;;  %v5045_v19 = vld [vmem:[#allocation71_spill] sm:$0xff] }
 0x3df   :  { %v1463_v58 = vadd.f32 %v1459_v17, %v1437_v32  ;;  %v1429_v59 = vadd.f32 %v1425_v33, %v1375_v43  ;;  %v1635_v57 = vmul.f32 %v5034_v11, %v1630_v53  ;;  %v1461_v62 = vmul.f32 %v5033_v46, %v1456_v30  ;;  %v5044_v32 = vld [vmem:[#allocation57_spill] sm:$0xff] }
 0x3e0   :  { %v984_v55 = vadd.f32 %v4365_v21, %v958_v26  ;;  %v1046_v38 = vadd.f32 %v5036_v31, %v1036_v41  ;;  %v1239_v21 = vsel %vm86_vm5, 0.0, %v1230_v14  ;;  %v1669_v25 = vmul.f32 %v5039_v50, %v1664_v40  ;;  %v5047_v31 = vld [vmem:[#allocation61_spill] sm:$0xff] }
 0x3e1   :  { %v1637_v18 = vadd.f32 %v1633_v0, %v1463_v58  ;;  %v1748_v20 = vpop.permute.xlu1 %1747  ;;  %v1439_v22 = vadd.f32 %v5038_v27, %v1429_v59  ;;  %v1666_v42 = vsel %vm85_vm6, 0.0, %v5042_v15  ;;  %v1244_v51 = vmul.f32 %v4175_v28, %v1239_v21  ;;  %v5049_v59 = vld [vmem:[#allocation28_spill] sm:$0xff] }
 0x3e2   :  { %v1072_v29 = vadd.f32 %v1068_v35, %v1046_v38  ;;  %v1038_v1 = vadd.f32 %v1034_v5, %v984_v55  ;;  %v1262_v54 = vpop.permute.xlu0 %1261  ;;  %v1754_v35 = vsel %vm85_vm6, 0.0, %v4297_v37  ;;  %v1368_v13 = vmul.f32 %v4146_v60, %v4455_v4  ;;  %v5046_v4 = vld [vmem:[#allocation87_spill] sm:$0xff] }
 0x3e3   :  { %v1273_v16 = vsel %vm85_vm6, 0.0, %v1262_v54  ;;  %v1647_v10 = vadd.f32 %v5041_v48, %v1637_v18  ;;  %v1465_v44 = vadd.f32 %v1461_v62, %v1439_v22  ;;  %v1365_v37 = vsel %vm85_vm6, 0.0, %v5044_v32  ;;  %v5051_v62 = vld [vmem:[#allocation39_spill] sm:$0xff] }
 0x3e4   :  { %v1246_v5 = vadd.f32 %v1242_v45, %v1072_v29  ;;  %v1048_v63 = vadd.f32 %v5040_v6, %v1038_v1  ;;  %v1278_v36 = vmul.f32 %v5015_v52, %v1273_v16  ;;  %v1417_v0 = vsel %vm86_vm5, 0.0, %v5045_v19  ;;  %v5056_v19 = vld [vmem:[#allocation62_spill] sm:$0xff] }
 0x3e5   :  { %v1673_v26 = vadd.f32 %v1669_v25, %v1647_v10  ;;  %v1798_v14 = vpop.permute.xlu1 %1797  ;;  %v1639_v17 = vadd.f32 %v1635_v57, %v1465_v44  ;;  %v1671_v33 = vmul.f32 %v5039_v50, %v1666_v42  ;;  %v1759_v55 = vmul.f32 %v5046_v4, %v1754_v35  ;;  %v5050_v57 = vld [vmem:[#allocation33_spill] sm:$0xff]  ;;  %v5052_v42 = vld [vmem:[#allocation86_spill] sm:$0xff] }
 0x3e6   :  { %v1074_v56 = vadd.f32 %v1070_v8, %v1048_v63  ;;  %v1256_v47 = vadd.f32 %v5043_v2, %v1246_v5  ;;  %v1266_v41 = vpop.permute.xlu0 %1265  ;;  %v1808_v58 = vsel %vm86_vm5, 0.0, %v1798_v14  ;;  %v5048_v8 = vld [vmem:[#allocation32_spill] sm:$0xff]  ;;  %v1370_v1 = vmul.f32 %v4146_v60, %v1365_v37  ;;  %v5054_v2 = vld [vmem:[#allocation41_spill] sm:$0xff] }
 0x3e7   :  { %v1275_v28 = vsel %vm85_vm6, 0.0, %v1266_v41  ;;  %v1727_v43 = vadd.f32 %v4368_v34, %v1673_v26  ;;  %v1649_v38 = vadd.f32 %v5047_v31, %v1639_v17  ;;  %v4547_v21 = vstv %s4507_s30 }
 0x3e8   :  { %v1248_v3 = vadd.f32 %v1244_v51, %v1074_v56  ;;  %v1282_v53 = vadd.f32 %v1278_v36, %v1256_v47  ;;  %v1280_v40 = vmul.f32 %v5015_v52, %v1275_v28  ;;  %v1756_v18 = vsel %vm85_vm6, 0.0, %v1748_v20  ;;  %v5053_v51 = vld [vmem:[#allocation43_spill] sm:$0xff]  ;;  %v5055_v36 = vld [vmem:[#allocation26_spill] sm:$0xff] }
 0x3e9   :  { %v1737_v34 = vadd.f32 %v5049_v59, %v1727_v43  ;;  %v1802_v29 = vpop.permute.xlu1 %1801  ;;  %v1675_v54 = vadd.f32 %v1671_v33, %v1649_v38  ;;  %v1813_v22 = vmul.f32 %v4547_v21, %v1808_v58  ;;  %v1422_v52 = vmul.f32 %v5027_v12, %v1417_v0  ;;  %v5057_v43 = vld [vmem:[#allocation89_spill] sm:$0xff] }
 0x3ea   :  { %v1336_v30 = vadd.f32 %v4427_v23, %v1282_v53  ;;  %v1258_v7 = vadd.f32 %v5048_v8, %v1248_v3  ;;  %v4542_v45 = vpop.permute.xlu0 %1795  ;;  %v1419_v25 = vsel %vm86_vm5, 0.0, %v5051_v62  ;;  %v4559_v5 = vstv %s4519_s6 }
 0x3eb   :  { %v1763_v27 = vadd.f32 %v1759_v55, %v1737_v34  ;;  %v1729_v60 = vadd.f32 %v4433_v9, %v1675_v54  ;;  %v1810_v10 = vsel %vm86_vm5, 0.0, %v1802_v29  ;;  %v1453_v35 = vsel %vm85_vm6, 0.0, %v5052_v42 }
 0x3ec   :  { %v1346_v23 = vadd.f32 %v5050_v57, %v1336_v30  ;;  %v1284_v16 = vadd.f32 %v1280_v40, %v1258_v7  ;;  %v1761_v56 = vmul.f32 %v5046_v4, %v1756_v18  ;;  %v1424_v37 = vmul.f32 %v5027_v12, %v1419_v25  ;;  %v5058_v40 = vld [vmem:[#allocation85_spill] sm:$0xff]  ;;  %v5060_v18 = vld [vmem:[#allocation54_spill] sm:$0xff]  ;;  %v5061_v57 = vld [vmem:[#allocation68_spill] sm:$0xff] }
 0x3ed   :  { %v1817_v48 = vadd.f32 %v1813_v22, %v1763_v27  ;;  %v1834_v15 = vpop.permute.xlu1 %1833  ;;  %v1739_v44 = vadd.f32 %v5053_v51, %v1729_v60  ;;  %v1458_v28 = vmul.f32 %v5033_v46, %v1453_v35  ;;  %v1455_v33 = vsel %vm85_vm6, 0.0, %v5057_v43  ;;  %v5062_v27 = vld [vmem:[#allocation82_spill] sm:$0xff]  ;;  %v5064_v35 = vld [vmem:[#allocation67_spill] sm:$0xff] }
 0x3ee   :  { %v1372_v6 = vadd.f32 %v1368_v13, %v1346_v23  ;;  %v1338_v63 = vadd.f32 %v4430_v61, %v1284_v16  ;;  %v1616_v20 = vpop.permute.xlu0 %1615  ;;  %v1844_v9 = vsel %vm85_vm6, 0.0, %v1834_v15  ;;  %v1815_v13 = vmul.f32 %v4547_v21, %v1810_v10  ;;  %v5063_v10 = vld [vmem:[#allocation29_spill] sm:$0xff] }
 0x3ef   :  { %v1827_v26 = vadd.f32 %v5055_v36, %v1817_v48  ;;  %v1765_v41 = vadd.f32 %v1761_v56, %v1739_v44  ;;  %v1627_v14 = vsel %vm86_vm5, 0.0, %v1616_v20  ;;  %v1849_v32 = vmul.f32 %v4559_v5, %v1844_v9  ;;  %v5065_v44 = vld [vmem:[#allocation70_spill] sm:$0xff]  ;;  %v5066_v9 = vld [vmem:[#allocation49_spill] sm:$0xff] }
 0x3f0   :  { %v1348_v47 = vadd.f32 %v5054_v2, %v1338_v63  ;;  %v1426_v61 = vadd.f32 %v1422_v52, %v1372_v6  ;;  %v1632_v30 = vmul.f32 %v5034_v11, %v1627_v14  ;;  %v1460_v34 = vmul.f32 %v5033_v46, %v1455_v33  ;;  %v5067_v2 = vld [vmem:[#allocation72_spill] sm:$0xff]  ;;  %v5069_v33 = vld [vmem:[#allocation46_spill] sm:$0xff] }
 0x3f1   :  { %v1838_v53 = vpop.permute.xlu1 %1837  ;;  %v1819_v55 = vadd.f32 %v1815_v13, %v1765_v41  ;;  %v1853_v31 = vadd.f32 %v1849_v32, %v1827_v26  ;;  %v1642_v23 = vmul.f32 %v5061_v57, %v5060_v18  ;;  %v1717_v22 = vsel %vm86_vm5, 0.0, %v5062_v27 }
 0x3f2   :  { %v1374_v17 = vadd.f32 %v1370_v1, %v1348_v47  ;;  %v1436_v0 = vadd.f32 %v5056_v19, %v1426_v61  ;;  %v1620_v3 = vpop.permute.xlu0 %1619  ;;  %v1846_v38 = vsel %vm85_vm6, 0.0, %v1838_v53  ;;  %v5059_v1 = vld [vmem:[#allocation19_spill] sm:$0xff]  ;;  %v1722_v63 = vmul.f32 %v4151_v39, %v1717_v22 }
 0x3f3   :  { %v1851_v8 = vmul.f32 %v4559_v5, %v1846_v38  ;;  %v1629_v7 = vsel %vm86_vm5, 0.0, %v1620_v3  ;;  %1858 = vst.msk [vmem:[#allocation11 + $0x8] sm:$0xff] %vm1856_vm7, %v1853_v31  ;;  %v1829_v59 = vadd.f32 %v5058_v40, %v1819_v55  ;;  %v1644_v15 = vmul.f32 %v5061_v57, %v5063_v10  ;;  %v5068_v3 = vld [vmem:[#allocation44_spill] sm:$0xff]  ;;  %v5070_v55 = vld [vmem:[#allocation30_spill] sm:$0xff] }
 0x3f4   :  { %v1462_v58 = vadd.f32 %v1458_v28, %v1436_v0  ;;  %v1428_v12 = vadd.f32 %v1424_v37, %v1374_v17  ;;  %v1634_v60 = vmul.f32 %v5034_v11, %v1629_v7  ;;  %v1719_v51 = vsel %vm86_vm5, 0.0, %v5064_v35 }
 0x3f5   :  { %v1855_v62 = vadd.f32 %v1851_v8, %v1829_v59  ;;  %v1753_v11 = vsel %vm85_vm6, 0.0, %v5065_v44  ;;  %v1732_v47 = vmul.f32 %v5067_v2, %v5066_v9  ;;  %v1807_v41 = vsel %vm86_vm5, 0.0, %v4542_v45 }
 0x3f6   :  { %v1636_v29 = vadd.f32 %v1632_v30, %v1462_v58  ;;  %v1438_v54 = vadd.f32 %v5059_v1, %v1428_v12  ;;  %v1652_v16 = vpop.permute.xlu0 %1651  ;;  %v1724_v14 = vmul.f32 %v4151_v39, %v1719_v51  ;;  %v1758_v13 = vmul.f32 %v5046_v4, %v1753_v11 }
 0x3f7   :  { %v1663_v52 = vsel %vm85_vm6, 0.0, %v1652_v16  ;;  %1860 = vst.msk [vmem:[#allocation11 + $0x18] sm:$0xff] %vm1856_vm7, %v1855_v62  ;;  %v1755_v17 = vsel %vm85_vm6, 0.0, %v4346_v49  ;;  %v1812_v19 = vmul.f32 %v4547_v21, %v1807_v41  ;;  %v1822_v31 = vmul.f32 %v5070_v55, %v5069_v33 }
 0x3f8   :  { %v1464_v25 = vadd.f32 %v1460_v34, %v1438_v54  ;;  %v1646_v6 = vadd.f32 %v1642_v23, %v1636_v29  ;;  %v1668_v46 = vmul.f32 %v5039_v50, %v1663_v52  ;;  %v1760_v39 = vmul.f32 %v5046_v4, %v1755_v17  ;;  %v5071_v34 = vld [vmem:[#allocation53_spill] sm:$0xff] }
 0x3f9   :  { %v1824_v4 = vmul.f32 %v5070_v55, %v5071_v34 }
 0x3fa   :  { %v1638_v20 = vadd.f32 %v1634_v60, %v1464_v25  ;;  %v1672_v48 = vadd.f32 %v1668_v46, %v1646_v6  ;;  %v1656_v42 = vpop.permute.xlu0 %1655 }
 0x3fb   :  { %v1665_v56 = vsel %vm85_vm6, 0.0, %v1656_v42 }
 0x3fc   :  { %v1726_v61 = vadd.f32 %v1722_v63, %v1672_v48  ;;  %v1648_v36 = vadd.f32 %v1644_v15, %v1638_v20  ;;  %v1670_v26 = vmul.f32 %v5039_v50, %v1665_v56  ;;  %v1734_v50 = vmul.f32 %v5067_v2, %v5068_v3 }
 0x3fe   :  { %v1736_v32 = vadd.f32 %v1732_v47, %v1726_v61  ;;  %v1674_v37 = vadd.f32 %v1670_v26, %v1648_v36  ;;  %v1800_v28 = vpop.permute.xlu0 %1799 }
 0x3ff   :  { %v1809_v45 = vsel %vm86_vm5, 0.0, %v1800_v28 }
 0x400   :  { %v1728_v0 = vadd.f32 %v1724_v14, %v1674_v37  ;;  %v1762_v53 = vadd.f32 %v1758_v13, %v1736_v32  ;;  %v1814_v12 = vmul.f32 %v4547_v21, %v1809_v45 }
 0x402   :  { %v1738_v43 = vadd.f32 %v1734_v50, %v1728_v0  ;;  %v1832_v38 = vpop.permute.xlu0 %1831  ;;  %v1816_v58 = vadd.f32 %v1812_v19, %v1762_v53 }
 0x403   :  { %v1843_v49 = vsel %vm85_vm6, 0.0, %v1832_v38 }
 0x404   :  { %v1764_v30 = vadd.f32 %v1760_v39, %v1738_v43  ;;  %v1826_v8 = vadd.f32 %v1822_v31, %v1816_v58  ;;  %v1848_v7 = vmul.f32 %v4559_v5, %v1843_v49 }
 0x406   :  { %v1818_v40 = vadd.f32 %v1814_v12, %v1764_v30  ;;  %v1852_v59 = vadd.f32 %v1848_v7, %v1826_v8  ;;  %v1836_v29 = vpop.permute.xlu0 %1835 }
 0x407   :  { %v1845_v1 = vsel %vm85_vm6, 0.0, %v1836_v29 }
 0x408   :  { %1857 = vst.msk [vmem:[#allocation11] sm:$0xff] %vm1856_vm7, %v1852_v59  ;;  %v1828_v54 = vadd.f32 %v1824_v4, %v1818_v40  ;;  %v1850_v18 = vmul.f32 %v4559_v5, %v1845_v1 }
 0x40a   :  { %v1854_v21 = vadd.f32 %v1850_v18, %v1828_v54 }
 0x40c   :  { %1859 = vst.msk [vmem:[#allocation11 + $0x10] sm:$0xff] %vm1856_vm7, %v1854_v21 }
 0x40d   :  { %2033 = shalt.err (!%p2030_p13)
}
 0x40e   :  { %s5072_s12 = sld [smem:[#allocation94_spill]] }
 0x414   :  { %s2034_s2 = scalar_lea.hbm %s5072_s12, 512 }
 0x415   :  { %p2035_p0 = scmp.ne.s32.totalorder %s5072_s12, %s2034_s2  ;;  %p2038_p1 = scmp.lt.u32.totalorder %s2034_s2, %s5072_s12 }
 0x417   :  { %p2040_p2 = pnand %p2038_p1, %p2035_p0 }
 0x419   :  { %2043 = shalt.err (!%p2040_p2)
}
 0x41a   :  { %s5073_s21 = smov 8   ;;  %s5074_s22 = smov 128  }
 0x41b   :  { %1872 = dma.vmem_to_hbm [thread:$0]  %s1867_s8, 512, %s5072_s12, [#allocation5], %s5074_s22, %s5074_s22, %s5073_s21  }
 0x41c   :  { %2050 = dma.done.wait [#allocation5], 512  }
 0x41d   :  { %2051 = vsyncadd [#allocation5], 4294966784 }
 0x41e   :  { %1876 = vsyncpa [#allocation4], 1 }
 0x41f   :  { %1877 = vsyncpa [#allocation5], 1 }
 0x420   :  { %1878 = vsyncpa [#allocation6], 1 }
 0x421   :  { %1879 = vsyncpa [#allocation8], 1 }

</bundles_post_ra>
